<compile_context>
chip_gen: v7x
topology: tpu7x:2x2x1
jax: 0.10.0
libtpu: 0.0.40
codegen_flags: <defaults>
</compile_context>

<pallas_src>
import jax
import jax.numpy as jnp
from jax.experimental import pallas as pl
from jax.experimental.pallas import tpu as pltpu

FEAT = 768        # backbone output dim (matches nn.Linear(768, 768))
PROJ = 128        # projection_dim


def _round_up(x, m):
    return (x + m - 1) // m * m


def simclr_kernel(x_ref, wb_ref, bb_ref, w1_ref, b1_ref, w2_ref, b2_ref,
                  z_ref, h_acc):
    """Fused backbone-linear (K-tiled) -> Linear -> ReLU -> Linear."""
    k = pl.program_id(1)

    @pl.when(k == 0)
    def _init():
        h_acc[...] = jnp.zeros_like(h_acc)

    # Backbone stand-in: accumulate x_tile @ Wb_tile in f32 (bf16 MXU inputs).
    h_acc[...] += jnp.dot(x_ref[...], wb_ref[...],
                          preferred_element_type=jnp.float32)

    @pl.when(k == pl.num_programs(1) - 1)
    def _finalize():
        h = h_acc[...] + bb_ref[...]                       # (tm, FEAT) f32
        a = jnp.dot(h.astype(jnp.bfloat16), w1_ref[...],
                    preferred_element_type=jnp.float32) + b1_ref[...]
        a = jnp.maximum(a, 0.0)                            # ReLU
        z = jnp.dot(a.astype(jnp.bfloat16), w2_ref[...],
                    preferred_element_type=jnp.float32) + b2_ref[...]
        z_ref[...] = z.astype(z_ref.dtype)


def simclr_projection(x_flat, wb, bb, w1, b1, w2, b2, *, tk_target=1024):
    """Encode + project a (M, Din) batch of flattened views in one pallas_call.

    wb/w1/w2 are expected pre-cast to bf16; wb pre-padded to a multiple of 128
    rows (done once in init_params).
    """
    M, Din = x_flat.shape
    din_pad = wb.shape[0]
    assert din_pad % 128 == 0 and din_pad >= Din

    # --- batch tile: 256 fills the 256-wide MXU (v6e/v7x) & maximizes Wb
    # reuse; keep >= 2 tiles so v7x's second TensorCore stays busy.
    if M >= 512:
        tm = 256
    elif M >= 128:
        tm = 128
    else:
        tm = _round_up(max(M, 1), 16)
    m_pad = _round_up(M, tm)

    # --- K tile: largest multiple of 128 <= tk_target that divides din_pad
    # (no zero-pad waste on the reduction axis).
    tk = 128
    for mult in range(din_pad // 128, 0, -1):
        cand = 128 * mult
        if cand <= min(tk_target, din_pad) and din_pad % cand == 0:
            tk = cand
            break

    x_b = x_flat.astype(jnp.bfloat16)
    if m_pad != M or din_pad != Din:
        x_b = jnp.pad(x_b, ((0, m_pad - M), (0, din_pad - Din)))

    grid_m = m_pad // tm
    grid_k = din_pad // tk

    flops = 2 * m_pad * (din_pad * FEAT + FEAT * FEAT + FEAT * PROJ)
    bytes_accessed = (x_b.size * 2                      # activations, read once
                      + grid_m * wb.size * 2            # Wb streamed per batch tile
                      + w1.size * 2 + w2.size * 2       # resident head weights
                      + (bb.size + b1.size + b2.size) * 4
                      + m_pad * PROJ * 4)               # output

    resident = dict(pipeline_mode=pl.Buffered(1))       # constant index_map

    z = pl.pallas_call(
        simclr_kernel,
        out_shape=jax.ShapeDtypeStruct((m_pad, PROJ), jnp.float32),
        grid_spec=pltpu.PrefetchScalarGridSpec(
            num_scalar_prefetch=0,
            grid=(grid_m, grid_k),
            in_specs=[
                pl.BlockSpec((tm, tk), lambda i, k: (i, k)),        # x tile
                pl.BlockSpec((tk, FEAT), lambda i, k: (k, 0)),      # Wb K-tile
                pl.BlockSpec((1, FEAT), lambda i, k: (0, 0), **resident),   # bb
                pl.BlockSpec((FEAT, FEAT), lambda i, k: (0, 0), **resident),  # W1
                pl.BlockSpec((1, FEAT), lambda i, k: (0, 0), **resident),   # b1
                pl.BlockSpec((FEAT, PROJ), lambda i, k: (0, 0), **resident),  # W2
                pl.BlockSpec((1, PROJ), lambda i, k: (0, 0), **resident),   # b2
            ],
            out_specs=pl.BlockSpec((tm, PROJ), lambda i, k: (i, 0)),
            scratch_shapes=[pltpu.VMEM((tm, FEAT), jnp.float32)],   # h accumulator
        ),
        compiler_params=pltpu.CompilerParams(
            dimension_semantics=("parallel", "arbitrary")),
        cost_estimate=pl.CostEstimate(flops=flops, transcendentals=0,
                                      bytes_accessed=bytes_accessed),
    )(x_b, wb, bb, w1, b1, w2, b2)
    return z[:M]


def simclr_forward(x, params, aug_key):
    """Mirror SimCLR.forward: generate two views, encode + project each."""
    B = x.shape[0]
    # TODO(synk): augmentation.apply_random_augmentation is an external module;
    # deterministic stand-ins (h-flip, additive Gaussian noise) are used instead.
    # Views are flattened + cast to bf16 immediately (single HBM pass each).
    x1 = jnp.flip(x, axis=-1).reshape(B, -1).astype(jnp.bfloat16)
    x2 = (x + 0.1 * jax.random.normal(aug_key, x.shape, x.dtype)
          ).reshape(B, -1).astype(jnp.bfloat16)
    # Stack both views along the batch axis -> a single fused kernel call.
    xf = jnp.concatenate([x1, x2], axis=0)
    z = simclr_projection(xf, *params)
    return z[:B], z[B:]


def init_params(key, in_dim):
    """Weights are pre-cast to bf16 (MXU operands) and Wb pre-padded to a
    128-multiple of rows, so no per-forward cast/pad HBM traffic."""
    ks = jax.random.split(key, 3)
    scale = lambda fan_in: 1.0 / jnp.sqrt(jnp.float32(fan_in))
    din_pad = _round_up(in_dim, 128)
    wb = jax.random.normal(ks[0], (in_dim, FEAT), jnp.float32) * scale(in_dim)
    wb = jnp.pad(wb, ((0, din_pad - in_dim), (0, 0))).astype(jnp.bfloat16)
    bb = jnp.zeros((1, FEAT), jnp.float32)
    w1 = (jax.random.normal(ks[1], (FEAT, FEAT), jnp.float32)
          * scale(FEAT)).astype(jnp.bfloat16)
    b1 = jnp.zeros((1, FEAT), jnp.float32)
    w2 = (jax.random.normal(ks[2], (FEAT, PROJ), jnp.float32)
          * scale(FEAT)).astype(jnp.bfloat16)
    b2 = jnp.zeros((1, PROJ), jnp.float32)
    return (wb, bb, w1, b1, w2, b2)


def _reference_forward(x, params, aug_key):
    """Pure-JAX reference (same bf16 operand / f32 accumulate convention)."""
    wb, bb, w1, b1, w2, b2 = params
    B = x.shape[0]
    x1 = jnp.flip(x, axis=-1).reshape(B, -1).astype(jnp.bfloat16)
    x2 = (x + 0.1 * jax.random.normal(aug_key, x.shape, x.dtype)
          ).reshape(B, -1).astype(jnp.bfloat16)
    xf = jnp.concatenate([x1, x2], axis=0)
    xf = jnp.pad(xf, ((0, 0), (0, wb.shape[0] - xf.shape[1])))
    h = jnp.dot(xf, wb, preferred_element_type=jnp.float32) + bb
    a = jnp.maximum(jnp.dot(h.astype(jnp.bfloat16), w1,
                            preferred_element_type=jnp.float32) + b1, 0.0)
    z = jnp.dot(a.astype(jnp.bfloat16), w2,
                preferred_element_type=jnp.float32) + b2
    return z[:B], z[B:]


if __name__ == "__main__":
    key = jax.random.PRNGKey(0)
    kx, kp, kaug = jax.random.split(key, 3)

    B, C, H, W = 2, 4, 16, 16          # small NCHW input
    x = jax.random.normal(kx, (B, C, H, W), jnp.float32)
    params = init_params(kp, C * H * W)

    z1, z2 = jax.jit(simclr_forward)(x, params, kaug)
    jax.block_until_ready((z1, z2))

    assert z1.shape == (B, PROJ) and z2.shape == (B, PROJ)
    assert z1.dtype == jnp.float32 and z2.dtype == jnp.float32

    r1, r2 = _reference_forward(x, params, kaug)
    assert jnp.allclose(z1, r1, rtol=5e-2, atol=5e-2)
    assert jnp.allclose(z2, r2, rtol=5e-2, atol=5e-2)
    print("KERNEL_OK")
</pallas_src>

<mosaic_0001>
module attributes {stable_mosaic.version = 11 : i64} {
  func.func @simclr_kernel(%arg0: i32, %arg1: i32, %arg2: memref<16x1024xbf16, #tpu.memory_space<vmem>>, %arg3: memref<1024x768xbf16, #tpu.memory_space<vmem>>, %arg4: memref<1x768xf32, #tpu.memory_space<vmem>>, %arg5: memref<768x768xbf16, #tpu.memory_space<vmem>>, %arg6: memref<1x768xf32, #tpu.memory_space<vmem>>, %arg7: memref<768x128xbf16, #tpu.memory_space<vmem>>, %arg8: memref<1x128xf32, #tpu.memory_space<vmem>>, %arg9: memref<16x128xf32, #tpu.memory_space<vmem>>, %arg10: memref<16x768xf32, #tpu.memory_space<vmem>>) attributes {dimension_semantics = [#tpu.dimension_semantics<parallel>, #tpu.dimension_semantics<arbitrary>], iteration_bounds = array<i64: 1, 1>, scalar_prefetch = 0 : i64, scratch_operands = 1 : i64, tpu.core_type = #tpu.core_type<tc>, window_params = [{transform_indices = @transform_0, window_bounds = array<i64: 16, 1024>}, {transform_indices = @transform_1, window_bounds = array<i64: 1024, 768>}, {pipeline_mode = #tpu.pipeline_mode<synchronous>, transform_indices = @transform_2, window_bounds = array<i64: 1, 768>}, {pipeline_mode = #tpu.pipeline_mode<synchronous>, transform_indices = @transform_3, window_bounds = array<i64: 768, 768>}, {pipeline_mode = #tpu.pipeline_mode<synchronous>, transform_indices = @transform_4, window_bounds = array<i64: 1, 768>}, {pipeline_mode = #tpu.pipeline_mode<synchronous>, transform_indices = @transform_5, window_bounds = array<i64: 768, 128>}, {pipeline_mode = #tpu.pipeline_mode<synchronous>, transform_indices = @transform_6, window_bounds = array<i64: 1, 128>}, {transform_indices = @transform_7, window_bounds = array<i64: 16, 128>}]} {
    %c0_i32 = arith.constant 0 : i32
    %0 = arith.cmpi eq, %arg1, %c0_i32 : i32
    %1 = arith.extui %0 : i1 to i32
    %c0_i32_0 = arith.constant 0 : i32
    %2 = arith.cmpi ne, %1, %c0_i32_0 : i32
    scf.if %2 {
      %cst_10 = arith.constant 0.000000e+00 : f32
      %12 = vector.broadcast %cst_10 : f32 to vector<16x768xf32>
      %c0_11 = arith.constant 0 : index
      %c0_12 = arith.constant 0 : index
      %13 = vector.load %arg10[%c0_11, %c0_12] : memref<16x768xf32, #tpu.memory_space<vmem>>, vector<16x768xf32>
      tpu.vector_store %arg10[%c0_11, %c0_12], %12 {strides = array<i32>} : memref<16x768xf32, #tpu.memory_space<vmem>>, vector<16x768xf32>,
    } else {
    }
    %c0 = arith.constant 0 : index
    %c0_1 = arith.constant 0 : index
    %3 = vector.load %arg10[%c0, %c0_1] : memref<16x768xf32, #tpu.memory_space<vmem>>, vector<16x768xf32>
    %c0_2 = arith.constant 0 : index
    %c0_3 = arith.constant 0 : index
    %4 = vector.load %arg2[%c0_2, %c0_3] : memref<16x1024xbf16, #tpu.memory_space<vmem>>, vector<16x1024xbf16>
    %c0_4 = arith.constant 0 : index
    %c0_5 = arith.constant 0 : index
    %5 = vector.load %arg3[%c0_4, %c0_5] : memref<1024x768xbf16, #tpu.memory_space<vmem>>, vector<1024x768xbf16>
    %cst = arith.constant dense<0.000000e+00> : vector<16x768xf32>
    %6 = tpu.matmul %4, %5, %cst {dimension_numbers = #tpu.dot_dimension_numbers<[1], [0], [0], [1], [0, 0, 1, 1], [], []>} : vector<16x1024xbf16>, vector<1024x768xbf16>, vector<16x768xf32> -> vector<16x768xf32>
    %7 = arith.addf %3, %6 : vector<16x768xf32>
    %c0_6 = arith.constant 0 : index
    %c0_7 = arith.constant 0 : index
    %8 = vector.load %arg10[%c0_6, %c0_7] : memref<16x768xf32, #tpu.memory_space<vmem>>, vector<16x768xf32>
    tpu.vector_store %arg10[%c0_6, %c0_7], %7 {strides = array<i32>} : memref<16x768xf32, #tpu.memory_space<vmem>>, vector<16x768xf32>,
    %c0_i32_8 = arith.constant 0 : i32
    %9 = arith.cmpi eq, %arg1, %c0_i32_8 : i32
    %10 = arith.extui %9 : i1 to i32
    %c0_i32_9 = arith.constant 0 : i32
    %11 = arith.cmpi ne, %10, %c0_i32_9 : i32
    scf.if %11 {
      %c0_10 = arith.constant 0 : index
      %c0_11 = arith.constant 0 : index
      %12 = vector.load %arg10[%c0_10, %c0_11] : memref<16x768xf32, #tpu.memory_space<vmem>>, vector<16x768xf32>
      %c0_12 = arith.constant 0 : index
      %c0_13 = arith.constant 0 : index
      %13 = vector.load %arg4[%c0_12, %c0_13] : memref<1x768xf32, #tpu.memory_space<vmem>>, vector<1x768xf32>
      %14 = vector.broadcast %13 : vector<1x768xf32> to vector<16x768xf32>
      %15 = arith.addf %12, %14 : vector<16x768xf32>
      %16 = arith.truncf %15 : vector<16x768xf32> to vector<16x768xbf16>
      %c0_14 = arith.constant 0 : index
      %c0_15 = arith.constant 0 : index
      %17 = vector.load %arg5[%c0_14, %c0_15] : memref<768x768xbf16, #tpu.memory_space<vmem>>, vector<768x768xbf16>
      %cst_16 = arith.constant dense<0.000000e+00> : vector<16x768xf32>
      %18 = tpu.matmul %16, %17, %cst_16 {dimension_numbers = #tpu.dot_dimension_numbers<[1], [0], [0], [1], [0, 0, 1, 1], [], []>} : vector<16x768xbf16>, vector<768x768xbf16>, vector<16x768xf32> -> vector<16x768xf32>
      %c0_17 = arith.constant 0 : index
      %c0_18 = arith.constant 0 : index
      %19 = vector.load %arg6[%c0_17, %c0_18] : memref<1x768xf32, #tpu.memory_space<vmem>>, vector<1x768xf32>
      %20 = vector.broadcast %19 : vector<1x768xf32> to vector<16x768xf32>
      %21 = arith.addf %18, %20 : vector<16x768xf32>
      %cst_19 = arith.constant 0.000000e+00 : f32
      %22 = vector.broadcast %cst_19 : f32 to vector<16x768xf32>
      %23 = arith.maximumf %21, %22 : vector<16x768xf32>
      %24 = arith.truncf %23 : vector<16x768xf32> to vector<16x768xbf16>
      %c0_20 = arith.constant 0 : index
      %c0_21 = arith.constant 0 : index
      %25 = vector.load %arg7[%c0_20, %c0_21] : memref<768x128xbf16, #tpu.memory_space<vmem>>, vector<768x128xbf16>
      %cst_22 = arith.constant dense<0.000000e+00> : vector<16x128xf32>
      %26 = tpu.matmul %24, %25, %cst_22 {dimension_numbers = #tpu.dot_dimension_numbers<[1], [0], [0], [1], [0, 0, 1, 1], [], []>} : vector<16x768xbf16>, vector<768x128xbf16>, vector<16x128xf32> -> vector<16x128xf32>
      %c0_23 = arith.constant 0 : index
      %c0_24 = arith.constant 0 : index
      %27 = vector.load %arg8[%c0_23, %c0_24] : memref<1x128xf32, #tpu.memory_space<vmem>>, vector<1x128xf32>
      %28 = vector.broadcast %27 : vector<1x128xf32> to vector<16x128xf32>
      %29 = arith.addf %26, %28 : vector<16x128xf32>
      %c0_25 = arith.constant 0 : index
      %c0_26 = arith.constant 0 : index
      %30 = vector.load %arg9[%c0_25, %c0_26] : memref<16x128xf32, #tpu.memory_space<vmem>>, vector<16x128xf32>
      tpu.vector_store %arg9[%c0_25, %c0_26], %29 {strides = array<i32>} : memref<16x128xf32, #tpu.memory_space<vmem>>, vector<16x128xf32>,
    } else {
    }
    return
  }
  func.func @transform_0(%arg0: i32, %arg1: i32) -> (i32, i32) {
    %c0_i32 = arith.constant 0 : i32
    return %arg0, %arg1 : i32, i32
  }
  func.func @transform_1(%arg0: i32, %arg1: i32) -> (i32, i32) {
    %c0_i32 = arith.constant 0 : i32
    %c0_i32_0 = arith.constant 0 : i32
    return %arg1, %c0_i32 : i32, i32
  }
  func.func @transform_2(%arg0: i32, %arg1: i32) -> (i32, i32) {
    %c0_i32 = arith.constant 0 : i32
    %c0_i32_0 = arith.constant 0 : i32
    %c0_i32_1 = arith.constant 0 : i32
    return %c0_i32, %c0_i32_0 : i32, i32
  }
  func.func @transform_3(%arg0: i32, %arg1: i32) -> (i32, i32) {
    %c0_i32 = arith.constant 0 : i32
    %c0_i32_0 = arith.constant 0 : i32
    %c0_i32_1 = arith.constant 0 : i32
    return %c0_i32, %c0_i32_0 : i32, i32
  }
  func.func @transform_4(%arg0: i32, %arg1: i32) -> (i32, i32) {
    %c0_i32 = arith.constant 0 : i32
    %c0_i32_0 = arith.constant 0 : i32
    %c0_i32_1 = arith.constant 0 : i32
    return %c0_i32, %c0_i32_0 : i32, i32
  }
  func.func @transform_5(%arg0: i32, %arg1: i32) -> (i32, i32) {
    %c0_i32 = arith.constant 0 : i32
    %c0_i32_0 = arith.constant 0 : i32
    %c0_i32_1 = arith.constant 0 : i32
    return %c0_i32, %c0_i32_0 : i32, i32
  }
  func.func @transform_6(%arg0: i32, %arg1: i32) -> (i32, i32) {
    %c0_i32 = arith.constant 0 : i32
    %c0_i32_0 = arith.constant 0 : i32
    %c0_i32_1 = arith.constant 0 : i32
    return %c0_i32, %c0_i32_0 : i32, i32
  }
  func.func @transform_7(%arg0: i32, %arg1: i32) -> (i32, i32) {
    %c0_i32 = arith.constant 0 : i32
    %c0_i32_0 = arith.constant 0 : i32
    return %arg0, %c0_i32 : i32, i32
  }
}

</mosaic_0001>

<bundles_post_ra>
// kernel: simclr_forward.1
= control target key start
LH: loop header
LB: loop body
LE: loop exit
PB: predicated region body
PF: predicated region fallthrough
CT: control target
= control target key end

     0   :  { %12 = vsyncpa [#allocation4], 0  ;;  %s8144_s0 = inlined_call_operand.vmem [shape: bf16[16,1024], index: 0, kind: input, shape index: {}]   ;;  %s8145_s1 = inlined_call_operand.hbm [shape: bf16[1024,768], index: 1, kind: input, shape index: {}]   ;;  %s8146_s2 = inlined_call_operand.hbm [shape: f32[1,768], index: 2, kind: input, shape index: {}]   ;;  %s8147_s3 = inlined_call_operand.hbm [shape: bf16[768,768], index: 3, kind: input, shape index: {}]   ;;  %s8148_s4 = inlined_call_operand.hbm [shape: f32[1,768], index: 4, kind: input, shape index: {}]   ;;  %s8149_s5 = inlined_call_operand.hbm [shape: bf16[768,128], index: 5, kind: input, shape index: {}]   ;;  %s8150_s6 = inlined_call_operand.hbm [shape: f32[1,128], index: 6, kind: input, shape index: {}]   ;;  %s8151_s7 = inlined_call_operand.vmem [shape: f32[16,128], index: 7, kind: output, shape index: {}]  }
   0x1   :  { %13 = vsyncpa [#allocation6], 0 }
   0x2   :  { %14 = vsyncpa [#allocation9], 0 }
   0x3   :  { %15 = vsyncpa [#allocation12], 0  ;;  %s7850_s24 = smov [#allocation5]   ;;  %s7851_s26 = smov [#allocation8]  }
   0x4   :  { %s36_s25 = sshll.u32 %s7850_s24, 4  ;;  %s58_s27 = sshll.u32 %s7851_s26, 4  ;;  %s37_s25 = int_to_ptr.vmem [resolvable:$true] %s36_s25  ;;  %s59_s27 = int_to_ptr.vmem [resolvable:$true] %s58_s27 }
   0x5   :  { %s7710_s30 = scalar_lea.hbm %s8146_s2, 96 }
   0x6   :  { %p7711_p0 = scmp.ne.s32.totalorder %s8146_s2, %s7710_s30  ;;  %p7714_p1 = scmp.lt.u32.totalorder %s7710_s30, %s8146_s2 }
   0x8   :  { %p7716_p2 = pnand %p7714_p1, %p7711_p0 }
   0xa   :  { %7719 = shalt.err (!%p7716_p2)
}
   0xb   :  { %s7720_s12 = scalar_lea.vmem %s37_s25, 96  ;;  %p7725_p4 = scmp.lt.s32.totalorder %s37_s25, %s37_s25 }
   0xc   :  { %p7721_p3 = scmp.ne.s32.totalorder %s37_s25, %s7720_s12  ;;  %p7726_p5 = scmp.lt.s32.totalorder %s7720_s12, %s7720_s12 }
   0xe   :  { %p7727_p6 = por %p7726_p5, %p7725_p4 }
  0x10   :  { %p7728_p7 = pnand %p7727_p6, %p7721_p3 }
  0x12   :  { %7731 = shalt.err (!%p7728_p7)
}
  0x13   :  { %39 = dma.hbm_to_vmem [thread:$0]  %s8146_s2, 96, %s37_s25, [#allocation6]  }
  0x14   :  { %s7732_s17 = scalar_lea.hbm %s8148_s4, 96 }
  0x15   :  { %p7733_p8 = scmp.ne.s32.totalorder %s8148_s4, %s7732_s17  ;;  %p7736_p9 = scmp.lt.u32.totalorder %s7732_s17, %s8148_s4 }
  0x17   :  { %p7738_p10 = pnand %p7736_p9, %p7733_p8 }
  0x19   :  { %7741 = shalt.err (!%p7738_p10)
}
  0x1a   :  { %s7742_s22 = scalar_lea.vmem %s59_s27, 96  ;;  %p7747_p12 = scmp.lt.s32.totalorder %s59_s27, %s59_s27 }
  0x1b   :  { %p7743_p11 = scmp.ne.s32.totalorder %s59_s27, %s7742_s22  ;;  %p7748_p13 = scmp.lt.s32.totalorder %s7742_s22, %s7742_s22 }
  0x1d   :  { %p7749_p0 = por %p7748_p13, %p7747_p12 }
  0x1f   :  { %p7750_p1 = pnand %p7749_p0, %p7743_p11 }
  0x21   :  { %7753 = shalt.err (!%p7750_p1)
}
  0x22   :  { %61 = dma.hbm_to_vmem [thread:$0]  %s8148_s4, 96, %s59_s27, [#allocation9]  }
  0x23   :  { %s7852_s24 = smov [#allocation3]   ;;  %s7754_s29 = scalar_lea.hbm %s8145_s1, 49152 }
  0x24   :  { %s23_s25 = sshll.u32 %s7852_s24, 4  ;;  %p7755_p2 = scmp.ne.s32.totalorder %s8145_s1, %s7754_s29  ;;  %s24_s25 = int_to_ptr.vmem [resolvable:$true] %s23_s25 }
  0x25   :  { %p7758_p3 = scmp.lt.u32.totalorder %s7754_s29, %s8145_s1 }
  0x27   :  { %p7760_p4 = pnand %p7758_p3, %p7755_p2 }
  0x29   :  { %7763 = shalt.err (!%p7760_p4)
}
  0x2a   :  { %s7764_s11 = scalar_lea.vmem %s24_s25, 49152  ;;  %p7769_p6 = scmp.lt.s32.totalorder %s24_s25, %s24_s25 }
  0x2b   :  { %p7765_p5 = scmp.ne.s32.totalorder %s24_s25, %s7764_s11  ;;  %p7770_p7 = scmp.lt.s32.totalorder %s7764_s11, %s7764_s11 }
  0x2d   :  { %p7771_p8 = por %p7770_p7, %p7769_p6 }
  0x2f   :  { %p7772_p9 = pnand %p7771_p8, %p7765_p5 }
  0x31   :  { %7775 = shalt.err (!%p7772_p9)
}
  0x32   :  { %s7853_s4 = smov 384   ;;  %s7854_s27 = smov 24  }
  0x33   :  { %29 = dma.hbm_to_vmem [thread:$0]  %s8145_s1, 49152, %s24_s25, [#allocation4], %s7853_s4, %s7853_s4, %s7854_s27  }
  0x34   :  { %s7855_s14 = smov [#allocation7]   ;;  %s7856_s16 = smov [#allocation10]  }
  0x35   :  { %s45_s15 = sshll.u32 %s7855_s14, 4  ;;  %s67_s17 = sshll.u32 %s7856_s16, 4  ;;  %s46_s15 = int_to_ptr.vmem [resolvable:$true] %s45_s15  ;;  %s68_s17 = int_to_ptr.vmem [resolvable:$true] %s67_s17 }
  0x36   :  { %s7776_s20 = scalar_lea.hbm %s8147_s3, 36864 }
  0x37   :  { %p7777_p10 = scmp.ne.s32.totalorder %s8147_s3, %s7776_s20  ;;  %p7780_p11 = scmp.lt.u32.totalorder %s7776_s20, %s8147_s3 }
  0x39   :  { %p7782_p12 = pnand %p7780_p11, %p7777_p10 }
  0x3b   :  { %7785 = shalt.err (!%p7782_p12)
}
  0x3c   :  { %s7786_s1 = scalar_lea.vmem %s46_s15, 36864  ;;  %p7791_p0 = scmp.lt.s32.totalorder %s46_s15, %s46_s15 }
  0x3d   :  { %p7787_p13 = scmp.ne.s32.totalorder %s46_s15, %s7786_s1  ;;  %p7792_p1 = scmp.lt.s32.totalorder %s7786_s1, %s7786_s1 }
  0x3f   :  { %p7793_p2 = por %p7792_p1, %p7791_p0 }
  0x41   :  { %p7794_p3 = pnand %p7793_p2, %p7787_p13 }
  0x43   :  { %7797 = shalt.err (!%p7794_p3)
}
  0x44   :  { %51 = dma.hbm_to_vmem [thread:$0]  %s8147_s3, 36864, %s46_s15, [#allocation6], %s7853_s4, %s7853_s4, %s7854_s27  }
  0x45   :  { %s7798_s29 = scalar_lea.hbm %s8149_s5, 6144 }
  0x46   :  { %p7799_p4 = scmp.ne.s32.totalorder %s8149_s5, %s7798_s29  ;;  %p7802_p5 = scmp.lt.u32.totalorder %s7798_s29, %s8149_s5 }
  0x48   :  { %p7804_p6 = pnand %p7802_p5, %p7799_p4 }
  0x4a   :  { %7807 = shalt.err (!%p7804_p6)
}
  0x4b   :  { %s7808_s11 = scalar_lea.vmem %s68_s17, 6144  ;;  %p7813_p8 = scmp.lt.s32.totalorder %s68_s17, %s68_s17 }
  0x4c   :  { %p7809_p7 = scmp.ne.s32.totalorder %s68_s17, %s7808_s11  ;;  %p7814_p9 = scmp.lt.s32.totalorder %s7808_s11, %s7808_s11 }
  0x4e   :  { %p7815_p10 = por %p7814_p9, %p7813_p8 }
  0x50   :  { %p7816_p11 = pnand %p7815_p10, %p7809_p7 }
  0x52   :  { %7819 = shalt.err (!%p7816_p11)
}
  0x53   :  { %s7857_s3 = smov 64   ;;  %s7858_s4 = smov 4  }
  0x54   :  { %73 = dma.hbm_to_vmem [thread:$0]  %s8149_s5, 6144, %s68_s17, [#allocation9], %s7857_s3, %s7857_s3, %s7858_s4  }
  0x55   :  { %s7859_s13 = smov [#allocation11]   ;;  %s7820_s18 = scalar_lea.hbm %s8150_s6, 16 }
  0x56   :  { %s80_s14 = sshll.u32 %s7859_s13, 4  ;;  %p7821_p12 = scmp.ne.s32.totalorder %s8150_s6, %s7820_s18  ;;  %s81_s14 = int_to_ptr.vmem [resolvable:$true] %s80_s14 }
  0x57   :  { %p7824_p13 = scmp.lt.u32.totalorder %s7820_s18, %s8150_s6 }
  0x59   :  { %p7826_p0 = pnand %p7824_p13, %p7821_p12 }
  0x5b   :  { %7829 = shalt.err (!%p7826_p0)
}
  0x5c   :  { %s7830_s2 = scalar_lea.vmem %s81_s14, 16  ;;  %s7834_s5 = scalar_lea.vmem %s81_s14, 32 }
  0x5d   :  { %p7831_p1 = scmp.ne.s32.totalorder %s81_s14, %s7830_s2  ;;  %p7835_p2 = scmp.lt.s32.totalorder %s81_s14, %s81_s14 }
  0x5e   :  { %p7836_p3 = scmp.lt.s32.totalorder %s7834_s5, %s7830_s2 }
  0x60   :  { %p7837_p4 = por %p7836_p3, %p7835_p2 }
  0x62   :  { %p7838_p5 = pnand %p7837_p4, %p7831_p1 }
  0x64   :  { %7841 = shalt.err (!%p7838_p5)
}
  0x65   :  { %83 = dma.hbm_to_vmem [thread:$0]  %s8150_s6, 16, %s81_s14, [#allocation12]  }
  0x66   :  { %7842 = dma.done.wait [#allocation4], 49152  }
  0x67   :  { %7843 = vsyncadd [#allocation4], 4294918144 }
  0x68   :  { %7844 = dma.done.wait [#allocation6], 36960  }
  0x69   :  { %7845 = vsyncadd [#allocation6], 4294930336 }
  0x6a   :  { %7846 = dma.done.wait [#allocation9], 6240  }
  0x6b   :  { %7847 = vsyncadd [#allocation9], 4294961056 }
  0x6c   :  { %7848 = dma.done.wait [#allocation12], 16  }
  0x6d   :  { %7849 = vsyncadd [#allocation12], 4294967280  ;;  %v6654_v0 = vld [vmem:[#allocation3 + $0x4] ss:$24 sps:$4 sm:$0xff]   ;;  %v6658_v2 = vld [vmem:[#allocation3] ss:$24 sps:$4 sm:$0xff]  }
  0x6e   :  { %v6656_v1 = vld [vmem:[#allocation3 + $0xc] ss:$24 sps:$4 sm:$0xff]   ;;  %2483 = vmatprep.subr.bf16.mxu0 %v6654_v0  ;;  %v6659_v3 = vld [vmem:[#allocation3 + $0x8] ss:$24 sps:$4 sm:$0xff]   ;;  %v6662_v5 = vld [vmem:[#allocation3 + $0x3c] ss:$24 sps:$4 sm:$0xff]  }
  0x6f   :  { %2655 = vmatprep.subr.bf16.mxu1 %v6656_v1  ;;  %v6660_v4 = vld [vmem:[#allocation3 + $0x34] ss:$24 sps:$4 sm:$0xff]   ;;  %2484 = vmatpush1.bf16.msra.mxu0 %v6658_v2  ;;  %v6664_v6 = vld [vmem:[#allocation3 + $0x30] ss:$24 sps:$4 sm:$0xff]   ;;  %v6666_v8 = vld [vmem:[#allocation3 + $0x64] ss:$24 sps:$4 sm:$0xff]  }
  0x70   :  { %2656 = vmatpush1.bf16.msra.mxu1 %v6659_v3  ;;  %2485 = vmatprep.subr.bf16.mxu0 %v6660_v4  ;;  %v6665_v7 = vld [vmem:[#allocation3 + $0x38] ss:$24 sps:$4 sm:$0xff]   ;;  %v6668_v9 = vld [vmem:[#allocation3 + $0x6c] ss:$24 sps:$4 sm:$0xff]   ;;  %v6671_v11 = vld [vmem:[#allocation3 + $0x68] ss:$24 sps:$4 sm:$0xff]  }
  0x71   :  { %2657 = vmatprep.subr.bf16.mxu1 %v6662_v5  ;;  %v6670_v10 = vld [vmem:[#allocation3 + $0x60] ss:$24 sps:$4 sm:$0xff]   ;;  %v6672_v12 = vld [vmem:[#allocation3 + $0x94] ss:$24 sps:$4 sm:$0xff]   ;;  %v6676_v14 = vld [vmem:[#allocation3 + $0x90] ss:$24 sps:$4 sm:$0xff]  }
  0x72   :  { %v6674_v13 = vld [vmem:[#allocation3 + $0x9c] ss:$24 sps:$4 sm:$0xff]   ;;  %v6677_v15 = vld [vmem:[#allocation3 + $0x98] ss:$24 sps:$4 sm:$0xff]   ;;  %v6680_v17 = vld [vmem:[#allocation3 + $0xcc] ss:$24 sps:$4 sm:$0xff]  }
  0x73   :  { %2486 = vmatpush1.bf16.msra.mxu0 %v6664_v6  ;;  %v6678_v16 = vld [vmem:[#allocation3 + $0xc4] ss:$24 sps:$4 sm:$0xff]   ;;  %v6682_v18 = vld [vmem:[#allocation3 + $0xc0] ss:$24 sps:$4 sm:$0xff]   ;;  %v6684_v20 = vld [vmem:[#allocation3 + $0xf4] ss:$24 sps:$4 sm:$0xff]  }
  0x74   :  { %2658 = vmatpush1.bf16.msra.mxu1 %v6665_v7  ;;  %2487 = vmatprep.subr.bf16.mxu0 %v6666_v8  ;;  %v6683_v19 = vld [vmem:[#allocation3 + $0xc8] ss:$24 sps:$4 sm:$0xff]   ;;  %v6686_v21 = vld [vmem:[#allocation3 + $0xfc] ss:$24 sps:$4 sm:$0xff]   ;;  %v6689_v23 = vld [vmem:[#allocation3 + $0xf8] ss:$24 sps:$4 sm:$0xff]  }
  0x75   :  { %2659 = vmatprep.subr.bf16.mxu1 %v6668_v9  ;;  %v6688_v22 = vld [vmem:[#allocation3 + $0xf0] ss:$24 sps:$4 sm:$0xff]   ;;  %v6690_v24 = vld [vmem:[#allocation3 + $0x124] ss:$24 sps:$4 sm:$0xff]   ;;  %v6694_v26 = vld [vmem:[#allocation3 + $0x120] ss:$24 sps:$4 sm:$0xff]  }
  0x76   :  { %v6692_v25 = vld [vmem:[#allocation3 + $0x12c] ss:$24 sps:$4 sm:$0xff]   ;;  %v6695_v27 = vld [vmem:[#allocation3 + $0x128] ss:$24 sps:$4 sm:$0xff]   ;;  %v6698_v29 = vld [vmem:[#allocation3 + $0x15c] ss:$24 sps:$4 sm:$0xff]  }
  0x77   :  { %2488 = vmatpush1.bf16.msra.mxu0 %v6670_v10  ;;  %v6696_v28 = vld [vmem:[#allocation3 + $0x154] ss:$24 sps:$4 sm:$0xff]   ;;  %v6700_v30 = vld [vmem:[#allocation3 + $0x150] ss:$24 sps:$4 sm:$0xff]   ;;  %v6702_v32 = vld [vmem:[#allocation3 + $0x184] ss:$24 sps:$4 sm:$0xff]  }
  0x78   :  { %2660 = vmatpush1.bf16.msra.mxu1 %v6671_v11  ;;  %2489 = vmatprep.subr.bf16.mxu0 %v6672_v12  ;;  %v6701_v31 = vld [vmem:[#allocation3 + $0x158] ss:$24 sps:$4 sm:$0xff]   ;;  %v6704_v33 = vld [vmem:[#allocation3 + $0x18c] ss:$24 sps:$4 sm:$0xff]   ;;  %v6707_v35 = vld [vmem:[#allocation3 + $0x188] ss:$24 sps:$4 sm:$0xff]  }
  0x79   :  { %2661 = vmatprep.subr.bf16.mxu1 %v6674_v13  ;;  %v6706_v34 = vld [vmem:[#allocation3 + $0x180] ss:$24 sps:$4 sm:$0xff]   ;;  %v6708_v36 = vld [vmem:[#allocation3 + $0x1b4] ss:$24 sps:$4 sm:$0xff]   ;;  %v6712_v38 = vld [vmem:[#allocation3 + $0x1b0] ss:$24 sps:$4 sm:$0xff]  }
  0x7a   :  { %v6710_v37 = vld [vmem:[#allocation3 + $0x1bc] ss:$24 sps:$4 sm:$0xff]   ;;  %v6713_v39 = vld [vmem:[#allocation3 + $0x1b8] ss:$24 sps:$4 sm:$0xff]   ;;  %v6716_v41 = vld [vmem:[#allocation3 + $0x1ec] ss:$24 sps:$4 sm:$0xff]  }
  0x7b   :  { %2490 = vmatpush1.bf16.msra.mxu0 %v6676_v14  ;;  %v6714_v40 = vld [vmem:[#allocation3 + $0x1e4] ss:$24 sps:$4 sm:$0xff]   ;;  %v6718_v42 = vld [vmem:[#allocation3 + $0x1e0] ss:$24 sps:$4 sm:$0xff]   ;;  %v6720_v44 = vld [vmem:[#allocation3 + $0x214] ss:$24 sps:$4 sm:$0xff]  }
  0x7c   :  { %2662 = vmatpush1.bf16.msra.mxu1 %v6677_v15  ;;  %2491 = vmatprep.subr.bf16.mxu0 %v6678_v16  ;;  %v6719_v43 = vld [vmem:[#allocation3 + $0x1e8] ss:$24 sps:$4 sm:$0xff]   ;;  %v6722_v45 = vld [vmem:[#allocation3 + $0x21c] ss:$24 sps:$4 sm:$0xff]   ;;  %v6725_v49 = vld [vmem:[#allocation3 + $0x218] ss:$24 sps:$4 sm:$0xff]  }
  0x7d   :  { %2663 = vmatprep.subr.bf16.mxu1 %v6680_v17  ;;  %v131_v46 = vld [vmem:[%s8144_s0] sm:$0xff]  ;;  %v6724_v48 = vld [vmem:[#allocation3 + $0x210] ss:$24 sps:$4 sm:$0xff]   ;;  %v6732_v55 = vld [vmem:[#allocation3 + $0x274] ss:$24 sps:$4 sm:$0xff]  }
  0x7e   :  { %v135_v47 = vld [vmem:[%s8144_s0 + $0x20] sm:$0xff]  ;;  %v6734_v56 = vld [vmem:[#allocation3 + $0x27c] ss:$24 sps:$4 sm:$0xff]   ;;  %v6736_v57 = vld [vmem:[#allocation3 + $0x270] ss:$24 sps:$4 sm:$0xff]  }
  0x7f   :  { %2492 = vmatpush1.bf16.msra.mxu0 %v6682_v18  ;;  %v7978_v50 = vcombine.high %v131_v46, %v135_v47  ;;  %v6726_v51 = vld [vmem:[#allocation3 + $0x244] ss:$24 sps:$4 sm:$0xff]   ;;  %v6730_v53 = vld [vmem:[#allocation3 + $0x240] ss:$24 sps:$4 sm:$0xff]   ;;  %v6744_v63 = vld [vmem:[#allocation3 + $0x2d4] ss:$24 sps:$4 sm:$0xff]   ;;  %v7982_v5 = vcombine.low %v131_v46, %v135_v47 }
  0x80   :  { %2664 = vmatpush1.bf16.msra.mxu1 %v6683_v19  ;;  %2493 = vmatprep.subr.bf16.mxu0 %v6684_v20  ;;  %v6728_v52 = vld [vmem:[#allocation3 + $0x24c] ss:$24 sps:$4 sm:$0xff]   ;;  %v6731_v54 = vld [vmem:[#allocation3 + $0x248] ss:$24 sps:$4 sm:$0xff]   ;;  %v6737_v58 = vld [vmem:[#allocation3 + $0x278] ss:$24 sps:$4 sm:$0xff]  }
  0x81   :  { %2665 = vmatprep.subr.bf16.mxu1 %v6686_v21  ;;  %2515 = vmatprep.mubr.bf16.mxu0 %v7978_v50  ;;  %v6738_v59 = vld [vmem:[#allocation3 + $0x2a4] ss:$24 sps:$4 sm:$0xff]   ;;  %v6742_v61 = vld [vmem:[#allocation3 + $0x2a0] ss:$24 sps:$4 sm:$0xff]   ;;  %v6748_v1 = vld [vmem:[#allocation3 + $0x2d0] ss:$24 sps:$4 sm:$0xff]  }
  0x82   :  { %2687 = vmatprep.mubr.bf16.mxu1 %v7978_v50  ;;  %v6740_v60 = vld [vmem:[#allocation3 + $0x2ac] ss:$24 sps:$4 sm:$0xff]   ;;  %v6743_v62 = vld [vmem:[#allocation3 + $0x2a8] ss:$24 sps:$4 sm:$0xff]   ;;  %v6746_v0 = vld [vmem:[#allocation3 + $0x2dc] ss:$24 sps:$4 sm:$0xff]  }
  0x83   :  { %2494 = vmatpush1.bf16.msra.mxu0 %v6688_v22  ;;  %v6749_v2 = vld [vmem:[#allocation3 + $0x2d8] ss:$24 sps:$4 sm:$0xff]   ;;  %v6752_v3 = vld [vmem:[#allocation3 + $0x304] ss:$24 sps:$4 sm:$0xff]   ;;  %v6753_v7 = vld [vmem:[#allocation3 + $0x308] ss:$24 sps:$4 sm:$0xff]  }
  0x84   :  { %2666 = vmatpush1.bf16.msra.mxu1 %v6689_v23  ;;  %2495 = vmatprep.subr.bf16.mxu0 %v6690_v24  ;;  %v6755_v4 = vld [vmem:[#allocation3 + $0x30c] ss:$24 sps:$4 sm:$0xff]   ;;  %v6750_v6 = vld [vmem:[#allocation3 + $0x300] ss:$24 sps:$4 sm:$0xff]   ;;  %v6761_v9 = vld [vmem:[#allocation3 + $0x33c] ss:$24 sps:$4 sm:$0xff]  }
  0x85   :  { %2667 = vmatprep.subr.bf16.mxu1 %v6692_v25  ;;  %v6758_v8 = vld [vmem:[#allocation3 + $0x334] ss:$24 sps:$4 sm:$0xff]   ;;  %v6756_v10 = vld [vmem:[#allocation3 + $0x330] ss:$24 sps:$4 sm:$0xff]   ;;  %v6764_v12 = vld [vmem:[#allocation3 + $0x364] ss:$24 sps:$4 sm:$0xff]  }
  0x86   :  { %v6759_v11 = vld [vmem:[#allocation3 + $0x338] ss:$24 sps:$4 sm:$0xff]   ;;  %v6767_v13 = vld [vmem:[#allocation3 + $0x36c] ss:$24 sps:$4 sm:$0xff]   ;;  %v6765_v15 = vld [vmem:[#allocation3 + $0x368] ss:$24 sps:$4 sm:$0xff]  }
  0x87   :  { %2496 = vmatpush1.bf16.msra.mxu0 %v6694_v26  ;;  %v6762_v14 = vld [vmem:[#allocation3 + $0x360] ss:$24 sps:$4 sm:$0xff]   ;;  %v6770_v16 = vld [vmem:[#allocation3 + $0x394] ss:$24 sps:$4 sm:$0xff]   ;;  %v6768_v18 = vld [vmem:[#allocation3 + $0x390] ss:$24 sps:$4 sm:$0xff]  }
  0x88   :  { %2668 = vmatpush1.bf16.msra.mxu1 %v6695_v27  ;;  %2497 = vmatprep.subr.bf16.mxu0 %v6696_v28  ;;  %v6773_v17 = vld [vmem:[#allocation3 + $0x39c] ss:$24 sps:$4 sm:$0xff]   ;;  %v6771_v19 = vld [vmem:[#allocation3 + $0x398] ss:$24 sps:$4 sm:$0xff]   ;;  %v6779_v21 = vld [vmem:[#allocation3 + $0x3cc] ss:$24 sps:$4 sm:$0xff]  }
  0x89   :  { %2669 = vmatprep.subr.bf16.mxu1 %v6698_v29  ;;  %v6776_v20 = vld [vmem:[#allocation3 + $0x3c4] ss:$24 sps:$4 sm:$0xff]   ;;  %v6774_v22 = vld [vmem:[#allocation3 + $0x3c0] ss:$24 sps:$4 sm:$0xff]   ;;  %v6782_v24 = vld [vmem:[#allocation3 + $0x3f4] ss:$24 sps:$4 sm:$0xff]  }
  0x8a   :  { %v6777_v23 = vld [vmem:[#allocation3 + $0x3c8] ss:$24 sps:$4 sm:$0xff]   ;;  %v6785_v25 = vld [vmem:[#allocation3 + $0x3fc] ss:$24 sps:$4 sm:$0xff]   ;;  %v6783_v27 = vld [vmem:[#allocation3 + $0x3f8] ss:$24 sps:$4 sm:$0xff]  }
  0x8b   :  { %2498 = vmatpush1.bf16.msra.mxu0 %v6700_v30  ;;  %v6780_v26 = vld [vmem:[#allocation3 + $0x3f0] ss:$24 sps:$4 sm:$0xff]   ;;  %v6788_v28 = vld [vmem:[#allocation3 + $0x424] ss:$24 sps:$4 sm:$0xff]  }
  0x8c   :  { %2670 = vmatpush1.bf16.msra.mxu1 %v6701_v31  ;;  %2499 = vmatprep.subr.bf16.mxu0 %v6702_v32  ;;  %v6791_v29 = vld [vmem:[#allocation3 + $0x42c] ss:$24 sps:$4 sm:$0xff]   ;;  %v6786_v32 = vld [vmem:[#allocation3 + $0x420] ss:$24 sps:$4 sm:$0xff]  }
  0x8d   :  { %2671 = vmatprep.subr.bf16.mxu1 %v6704_v33  ;;  %v7989_v30 = vld [vmem:[%s8144_s0 + $0x8] sm:$0xff]  ;;  %v6807_v46 = vld [vmem:[#allocation3 + $0x4b8] ss:$24 sps:$4 sm:$0xff]   ;;  %v6812_v47 = vld [vmem:[#allocation3 + $0x4e4] ss:$24 sps:$4 sm:$0xff]  }
  0x8e   :  { %v7994_v31 = vld [vmem:[%s8144_s0 + $0x28] sm:$0xff] }
  0x8f   :  { %2500 = vmatpush1.bf16.msra.mxu0 %v6706_v34  ;;  %v6789_v33 = vld [vmem:[#allocation3 + $0x428] ss:$24 sps:$4 sm:$0xff]   ;;  %v7998_v34 = vcombine.high %v7989_v30, %v7994_v31 }
  0x90   :  { %2672 = vmatpush1.bf16.msra.mxu1 %v6707_v35  ;;  %2501 = vmatprep.subr.bf16.mxu0 %v6708_v36  ;;  %v6794_v35 = vld [vmem:[#allocation3 + $0x454] ss:$24 sps:$4 sm:$0xff]  }
  0x91   :  { %2673 = vmatprep.subr.bf16.mxu1 %v6710_v37  ;;  %v6797_v36 = vld [vmem:[#allocation3 + $0x45c] ss:$24 sps:$4 sm:$0xff]   ;;  %v6792_v37 = vld [vmem:[#allocation3 + $0x450] ss:$24 sps:$4 sm:$0xff]  }
  0x93   :  { %2502 = vmatpush1.bf16.msra.mxu0 %v6712_v38  ;;  %v6795_v38 = vld [vmem:[#allocation3 + $0x458] ss:$24 sps:$4 sm:$0xff]  }
  0x94   :  { %2674 = vmatpush1.bf16.msra.mxu1 %v6713_v39  ;;  %2503 = vmatprep.subr.bf16.mxu0 %v6714_v40  ;;  %v6800_v39 = vld [vmem:[#allocation3 + $0x484] ss:$24 sps:$4 sm:$0xff]  }
  0x95   :  { %2675 = vmatprep.subr.bf16.mxu1 %v6716_v41  ;;  %v6803_v40 = vld [vmem:[#allocation3 + $0x48c] ss:$24 sps:$4 sm:$0xff]   ;;  %v6798_v41 = vld [vmem:[#allocation3 + $0x480] ss:$24 sps:$4 sm:$0xff]  }
  0x97   :  { %2504 = vmatpush1.bf16.msra.mxu0 %v6718_v42  ;;  %v6801_v42 = vld [vmem:[#allocation3 + $0x488] ss:$24 sps:$4 sm:$0xff]  }
  0x98   :  { %2676 = vmatpush1.bf16.msra.mxu1 %v6719_v43  ;;  %2505 = vmatprep.subr.bf16.mxu0 %v6720_v44  ;;  %v6806_v43 = vld [vmem:[#allocation3 + $0x4b4] ss:$24 sps:$4 sm:$0xff]  }
  0x99   :  { %2677 = vmatprep.subr.bf16.mxu1 %v6722_v45  ;;  %v6809_v44 = vld [vmem:[#allocation3 + $0x4bc] ss:$24 sps:$4 sm:$0xff]   ;;  %v6804_v45 = vld [vmem:[#allocation3 + $0x4b0] ss:$24 sps:$4 sm:$0xff]  }
  0x9b   :  { %2506 = vmatpush1.bf16.msra.mxu0 %v6724_v48  ;;  %v6815_v48 = vld [vmem:[#allocation3 + $0x4ec] ss:$24 sps:$4 sm:$0xff]  }
  0x9c   :  { %2678 = vmatpush1.bf16.msra.mxu1 %v6725_v49  ;;  %2507 = vmatprep.subr.bf16.mxu0 %v6726_v51  ;;  %v6810_v49 = vld [vmem:[#allocation3 + $0x4e0] ss:$24 sps:$4 sm:$0xff]  }
  0x9d   :  { %2679 = vmatprep.subr.bf16.mxu1 %v6728_v52  ;;  %v6813_v51 = vld [vmem:[#allocation3 + $0x4e8] ss:$24 sps:$4 sm:$0xff]   ;;  %v6818_v52 = vld [vmem:[#allocation3 + $0x514] ss:$24 sps:$4 sm:$0xff]  }
  0x9f   :  { %2508 = vmatpush1.bf16.msra.mxu0 %v6730_v53  ;;  %v6821_v53 = vld [vmem:[#allocation3 + $0x51c] ss:$24 sps:$4 sm:$0xff]  }
  0xa0   :  { %2680 = vmatpush1.bf16.msra.mxu1 %v6731_v54  ;;  %2509 = vmatprep.subr.bf16.mxu0 %v6732_v55  ;;  %v6816_v54 = vld [vmem:[#allocation3 + $0x510] ss:$24 sps:$4 sm:$0xff]  }
  0xa1   :  { %2681 = vmatprep.subr.bf16.mxu1 %v6734_v56  ;;  %v6819_v55 = vld [vmem:[#allocation3 + $0x518] ss:$24 sps:$4 sm:$0xff]   ;;  %v6824_v56 = vld [vmem:[#allocation3 + $0x544] ss:$24 sps:$4 sm:$0xff]  }
  0xa3   :  { %2510 = vmatpush1.bf16.msra.mxu0 %v6736_v57  ;;  %v6827_v57 = vld [vmem:[#allocation3 + $0x54c] ss:$24 sps:$4 sm:$0xff]  }
  0xa4   :  { %2682 = vmatpush1.bf16.msra.mxu1 %v6737_v58  ;;  %2511 = vmatprep.subr.bf16.mxu0 %v6738_v59  ;;  %v6822_v58 = vld [vmem:[#allocation3 + $0x540] ss:$24 sps:$4 sm:$0xff]  }
  0xa5   :  { %2683 = vmatprep.subr.bf16.mxu1 %v6740_v60  ;;  %v6825_v59 = vld [vmem:[#allocation3 + $0x548] ss:$24 sps:$4 sm:$0xff]   ;;  %v6830_v60 = vld [vmem:[#allocation3 + $0x574] ss:$24 sps:$4 sm:$0xff]  }
  0xa7   :  { %2512 = vmatpush1.bf16.msra.mxu0 %v6742_v61  ;;  %v6833_v61 = vld [vmem:[#allocation3 + $0x57c] ss:$24 sps:$4 sm:$0xff]  }
  0xa8   :  { %2684 = vmatpush1.bf16.msra.mxu1 %v6743_v62  ;;  %2513 = vmatprep.subr.bf16.mxu0 %v6744_v63  ;;  %v6828_v62 = vld [vmem:[#allocation3 + $0x570] ss:$24 sps:$4 sm:$0xff]  }
  0xa9   :  { %2685 = vmatprep.subr.bf16.mxu1 %v6746_v0  ;;  %v6831_v63 = vld [vmem:[#allocation3 + $0x578] ss:$24 sps:$4 sm:$0xff]   ;;  %v6836_v0 = vld [vmem:[#allocation3 + $0x5a4] ss:$24 sps:$4 sm:$0xff]  }
  0xab   :  { %2514 = vmatpush1.bf16.msra.mxu0 %v6748_v1  ;;  %v6839_v1 = vld [vmem:[#allocation3 + $0x5ac] ss:$24 sps:$4 sm:$0xff]  }
  0xac   :  { %2686 = vmatpush1.bf16.msra.mxu1 %v6749_v2  ;;  %2526 = vmatprep.subr.bf16.mxu0 %v6752_v3  ;;  %v6834_v2 = vld [vmem:[#allocation3 + $0x5a0] ss:$24 sps:$4 sm:$0xff]  }
  0xad   :  { %2698 = vmatprep.subr.bf16.mxu1 %v6755_v4  ;;  %v6837_v3 = vld [vmem:[#allocation3 + $0x5a8] ss:$24 sps:$4 sm:$0xff]   ;;  %v6842_v4 = vld [vmem:[#allocation3 + $0x5d4] ss:$24 sps:$4 sm:$0xff]  }
  0xae   :  { %2516 = vmatmul.mubr.bf16.vlgmr.msra.gmra.mrb[0].mxu0 %v7982_v5 }
  0xaf   :  { %2688 = vmatmul.mubr.bf16.vlgmr.msra.gmra.mrb[0].mxu1 %v7982_v5  ;;  %2527 = vmatpush1.bf16.msra.mxu0 %v6750_v6  ;;  %v6845_v6 = vld [vmem:[#allocation3 + $0x5dc] ss:$24 sps:$4 sm:$0xff]  }
  0xb0   :  { %2699 = vmatpush1.bf16.msra.mxu1 %v6753_v7  ;;  %2528 = vmatprep.subr.bf16.mxu0 %v6758_v8  ;;  %v6840_v7 = vld [vmem:[#allocation3 + $0x5d0] ss:$24 sps:$4 sm:$0xff]  }
  0xb1   :  { %2700 = vmatprep.subr.bf16.mxu1 %v6761_v9  ;;  %2558 = vmatprep.mubr.bf16.mxu0 %v7998_v34  ;;  %v6843_v8 = vld [vmem:[#allocation3 + $0x5d8] ss:$24 sps:$4 sm:$0xff]   ;;  %v6848_v9 = vld [vmem:[#allocation3 + $0x604] ss:$24 sps:$4 sm:$0xff]  }
  0xb2   :  { %2730 = vmatprep.mubr.bf16.mxu1 %v7998_v34 }
  0xb3   :  { %2529 = vmatpush1.bf16.msra.mxu0 %v6756_v10  ;;  %v6851_v10 = vld [vmem:[#allocation3 + $0x60c] ss:$24 sps:$4 sm:$0xff]  }
  0xb4   :  { %2701 = vmatpush1.bf16.msra.mxu1 %v6759_v11  ;;  %2530 = vmatprep.subr.bf16.mxu0 %v6764_v12  ;;  %v8004_v11 = vcombine.low %v7989_v30, %v7994_v31  ;;  %v6846_v12 = vld [vmem:[#allocation3 + $0x600] ss:$24 sps:$4 sm:$0xff]   ;;  %v6875_v30 = vld [vmem:[#allocation3 + $0x6cc] ss:$24 sps:$4 sm:$0xff]  }
  0xb5   :  { %2702 = vmatprep.subr.bf16.mxu1 %v6767_v13  ;;  %v6849_v13 = vld [vmem:[#allocation3 + $0x608] ss:$24 sps:$4 sm:$0xff]  }
  0xb6   :  { %v6870_v31 = vld [vmem:[#allocation3 + $0x6c0] ss:$24 sps:$4 sm:$0xff]  }
  0xb7   :  { %2531 = vmatpush1.bf16.msra.mxu0 %v6762_v14  ;;  %v6854_v14 = vld [vmem:[#allocation3 + $0x634] ss:$24 sps:$4 sm:$0xff]  }
  0xb8   :  { %2703 = vmatpush1.bf16.msra.mxu1 %v6765_v15  ;;  %2532 = vmatprep.subr.bf16.mxu0 %v6770_v16  ;;  %v6857_v15 = vld [vmem:[#allocation3 + $0x63c] ss:$24 sps:$4 sm:$0xff]  }
  0xb9   :  { %2704 = vmatprep.subr.bf16.mxu1 %v6773_v17  ;;  %v8009_v16 = vld [vmem:[%s8144_s0 + $0x10] sm:$0xff] }
  0xba   :  { %v8014_v17 = vld [vmem:[%s8144_s0 + $0x30] sm:$0xff] }
  0xbb   :  { %2533 = vmatpush1.bf16.msra.mxu0 %v6768_v18  ;;  %v8018_v18 = vcombine.high %v8009_v16, %v8014_v17 }
  0xbc   :  { %2705 = vmatpush1.bf16.msra.mxu1 %v6771_v19  ;;  %2534 = vmatprep.subr.bf16.mxu0 %v6776_v20  ;;  %v6852_v19 = vld [vmem:[#allocation3 + $0x630] ss:$24 sps:$4 sm:$0xff]  }
  0xbd   :  { %2706 = vmatprep.subr.bf16.mxu1 %v6779_v21  ;;  %v6855_v20 = vld [vmem:[#allocation3 + $0x638] ss:$24 sps:$4 sm:$0xff]   ;;  %v6860_v21 = vld [vmem:[#allocation3 + $0x664] ss:$24 sps:$4 sm:$0xff]  }
  0xbf   :  { %2535 = vmatpush1.bf16.msra.mxu0 %v6774_v22  ;;  %v6863_v22 = vld [vmem:[#allocation3 + $0x66c] ss:$24 sps:$4 sm:$0xff]  }
  0xc0   :  { %2707 = vmatpush1.bf16.msra.mxu1 %v6777_v23  ;;  %2536 = vmatprep.subr.bf16.mxu0 %v6782_v24  ;;  %v6858_v23 = vld [vmem:[#allocation3 + $0x660] ss:$24 sps:$4 sm:$0xff]  }
  0xc1   :  { %2708 = vmatprep.subr.bf16.mxu1 %v6785_v25  ;;  %v6861_v24 = vld [vmem:[#allocation3 + $0x668] ss:$24 sps:$4 sm:$0xff]   ;;  %v6866_v25 = vld [vmem:[#allocation3 + $0x694] ss:$24 sps:$4 sm:$0xff]  }
  0xc3   :  { %2537 = vmatpush1.bf16.msra.mxu0 %v6780_v26  ;;  %v6869_v26 = vld [vmem:[#allocation3 + $0x69c] ss:$24 sps:$4 sm:$0xff]  }
  0xc4   :  { %2709 = vmatpush1.bf16.msra.mxu1 %v6783_v27  ;;  %2538 = vmatprep.subr.bf16.mxu0 %v6788_v28  ;;  %v6864_v27 = vld [vmem:[#allocation3 + $0x690] ss:$24 sps:$4 sm:$0xff]  }
  0xc5   :  { %2710 = vmatprep.subr.bf16.mxu1 %v6791_v29  ;;  %v6867_v28 = vld [vmem:[#allocation3 + $0x698] ss:$24 sps:$4 sm:$0xff]   ;;  %v6872_v29 = vld [vmem:[#allocation3 + $0x6c4] ss:$24 sps:$4 sm:$0xff]  }
  0xc7   :  { %2539 = vmatpush1.bf16.msra.mxu0 %v6786_v32  ;;  %v6873_v32 = vld [vmem:[#allocation3 + $0x6c8] ss:$24 sps:$4 sm:$0xff]  }
  0xc8   :  { %2711 = vmatpush1.bf16.msra.mxu1 %v6789_v33  ;;  %2540 = vmatprep.subr.bf16.mxu0 %v6794_v35  ;;  %v6878_v33 = vld [vmem:[#allocation3 + $0x6f4] ss:$24 sps:$4 sm:$0xff]  }
  0xc9   :  { %2712 = vmatprep.subr.bf16.mxu1 %v6797_v36  ;;  %v6881_v35 = vld [vmem:[#allocation3 + $0x6fc] ss:$24 sps:$4 sm:$0xff]   ;;  %v6876_v36 = vld [vmem:[#allocation3 + $0x6f0] ss:$24 sps:$4 sm:$0xff]  }
  0xcb   :  { %2541 = vmatpush1.bf16.msra.mxu0 %v6792_v37  ;;  %v6879_v37 = vld [vmem:[#allocation3 + $0x6f8] ss:$24 sps:$4 sm:$0xff]  }
  0xcc   :  { %2713 = vmatpush1.bf16.msra.mxu1 %v6795_v38  ;;  %2542 = vmatprep.subr.bf16.mxu0 %v6800_v39  ;;  %v6884_v38 = vld [vmem:[#allocation3 + $0x724] ss:$24 sps:$4 sm:$0xff]  }
  0xcd   :  { %2714 = vmatprep.subr.bf16.mxu1 %v6803_v40  ;;  %v6887_v39 = vld [vmem:[#allocation3 + $0x72c] ss:$24 sps:$4 sm:$0xff]   ;;  %v6882_v40 = vld [vmem:[#allocation3 + $0x720] ss:$24 sps:$4 sm:$0xff]  }
  0xcf   :  { %2543 = vmatpush1.bf16.msra.mxu0 %v6798_v41  ;;  %v6885_v41 = vld [vmem:[#allocation3 + $0x728] ss:$24 sps:$4 sm:$0xff]  }
  0xd0   :  { %2715 = vmatpush1.bf16.msra.mxu1 %v6801_v42  ;;  %2544 = vmatprep.subr.bf16.mxu0 %v6806_v43  ;;  %v6890_v42 = vld [vmem:[#allocation3 + $0x754] ss:$24 sps:$4 sm:$0xff]  }
  0xd1   :  { %2716 = vmatprep.subr.bf16.mxu1 %v6809_v44  ;;  %v6893_v43 = vld [vmem:[#allocation3 + $0x75c] ss:$24 sps:$4 sm:$0xff]   ;;  %v6888_v44 = vld [vmem:[#allocation3 + $0x750] ss:$24 sps:$4 sm:$0xff]  }
  0xd3   :  { %2545 = vmatpush1.bf16.msra.mxu0 %v6804_v45  ;;  %v6891_v45 = vld [vmem:[#allocation3 + $0x758] ss:$24 sps:$4 sm:$0xff]  }
  0xd4   :  { %2717 = vmatpush1.bf16.msra.mxu1 %v6807_v46  ;;  %2546 = vmatprep.subr.bf16.mxu0 %v6812_v47  ;;  %v6896_v46 = vld [vmem:[#allocation3 + $0x784] ss:$24 sps:$4 sm:$0xff]  }
  0xd5   :  { %2718 = vmatprep.subr.bf16.mxu1 %v6815_v48  ;;  %v6899_v47 = vld [vmem:[#allocation3 + $0x78c] ss:$24 sps:$4 sm:$0xff]   ;;  %v6894_v48 = vld [vmem:[#allocation3 + $0x780] ss:$24 sps:$4 sm:$0xff]  }
  0xd7   :  { %2547 = vmatpush1.bf16.msra.mxu0 %v6810_v49  ;;  %v6897_v49 = vld [vmem:[#allocation3 + $0x788] ss:$24 sps:$4 sm:$0xff]  }
  0xd8   :  { %2719 = vmatpush1.bf16.msra.mxu1 %v6813_v51  ;;  %2548 = vmatprep.subr.bf16.mxu0 %v6818_v52  ;;  %v6902_v51 = vld [vmem:[#allocation3 + $0x7b4] ss:$24 sps:$4 sm:$0xff]  }
  0xd9   :  { %2720 = vmatprep.subr.bf16.mxu1 %v6821_v53  ;;  %v6905_v52 = vld [vmem:[#allocation3 + $0x7bc] ss:$24 sps:$4 sm:$0xff]   ;;  %v6900_v53 = vld [vmem:[#allocation3 + $0x7b0] ss:$24 sps:$4 sm:$0xff]  }
  0xdb   :  { %2549 = vmatpush1.bf16.msra.mxu0 %v6816_v54  ;;  %v6903_v54 = vld [vmem:[#allocation3 + $0x7b8] ss:$24 sps:$4 sm:$0xff]  }
  0xdc   :  { %2721 = vmatpush1.bf16.msra.mxu1 %v6819_v55  ;;  %2550 = vmatprep.subr.bf16.mxu0 %v6824_v56  ;;  %v6908_v55 = vld [vmem:[#allocation3 + $0x7e4] ss:$24 sps:$4 sm:$0xff]  }
  0xdd   :  { %2722 = vmatprep.subr.bf16.mxu1 %v6827_v57  ;;  %v6911_v56 = vld [vmem:[#allocation3 + $0x7ec] ss:$24 sps:$4 sm:$0xff]   ;;  %v6906_v57 = vld [vmem:[#allocation3 + $0x7e0] ss:$24 sps:$4 sm:$0xff]  }
  0xdf   :  { %2551 = vmatpush1.bf16.msra.mxu0 %v6822_v58  ;;  %v6909_v58 = vld [vmem:[#allocation3 + $0x7e8] ss:$24 sps:$4 sm:$0xff]  }
  0xe0   :  { %2723 = vmatpush1.bf16.msra.mxu1 %v6825_v59  ;;  %2552 = vmatprep.subr.bf16.mxu0 %v6830_v60  ;;  %v6914_v59 = vld [vmem:[#allocation3 + $0x814] ss:$24 sps:$4 sm:$0xff]  }
  0xe1   :  { %2724 = vmatprep.subr.bf16.mxu1 %v6833_v61  ;;  %v6917_v60 = vld [vmem:[#allocation3 + $0x81c] ss:$24 sps:$4 sm:$0xff]   ;;  %v6912_v61 = vld [vmem:[#allocation3 + $0x810] ss:$24 sps:$4 sm:$0xff]  }
  0xe3   :  { %2553 = vmatpush1.bf16.msra.mxu0 %v6828_v62  ;;  %v6915_v62 = vld [vmem:[#allocation3 + $0x818] ss:$24 sps:$4 sm:$0xff]  }
  0xe4   :  { %2725 = vmatpush1.bf16.msra.mxu1 %v6831_v63  ;;  %2554 = vmatprep.subr.bf16.mxu0 %v6836_v0  ;;  %v6920_v63 = vld [vmem:[#allocation3 + $0x844] ss:$24 sps:$4 sm:$0xff]  }
  0xe5   :  { %2726 = vmatprep.subr.bf16.mxu1 %v6839_v1  ;;  %v6923_v0 = vld [vmem:[#allocation3 + $0x84c] ss:$24 sps:$4 sm:$0xff]   ;;  %v6918_v1 = vld [vmem:[#allocation3 + $0x840] ss:$24 sps:$4 sm:$0xff]  }
  0xe7   :  { %2555 = vmatpush1.bf16.msra.mxu0 %v6834_v2  ;;  %v6921_v2 = vld [vmem:[#allocation3 + $0x848] ss:$24 sps:$4 sm:$0xff]  }
  0xe8   :  { %2727 = vmatpush1.bf16.msra.mxu1 %v6837_v3  ;;  %2556 = vmatprep.subr.bf16.mxu0 %v6842_v4  ;;  %v6926_v3 = vld [vmem:[#allocation3 + $0x874] ss:$24 sps:$4 sm:$0xff]  }
  0xe9   :  { %2728 = vmatprep.subr.bf16.mxu1 %v6845_v6  ;;  %v6929_v4 = vld [vmem:[#allocation3 + $0x87c] ss:$24 sps:$4 sm:$0xff]   ;;  %v6924_v6 = vld [vmem:[#allocation3 + $0x870] ss:$24 sps:$4 sm:$0xff]  }
  0xeb   :  { %2557 = vmatpush1.bf16.msra.mxu0 %v6840_v7  ;;  %v6927_v7 = vld [vmem:[#allocation3 + $0x878] ss:$24 sps:$4 sm:$0xff]  }
  0xec   :  { %2729 = vmatpush1.bf16.msra.mxu1 %v6843_v8  ;;  %2569 = vmatprep.subr.bf16.mxu0 %v6848_v9  ;;  %v6932_v8 = vld [vmem:[#allocation3 + $0x8a4] ss:$24 sps:$4 sm:$0xff]  }
  0xed   :  { %2741 = vmatprep.subr.bf16.mxu1 %v6851_v10  ;;  %v6935_v9 = vld [vmem:[#allocation3 + $0x8ac] ss:$24 sps:$4 sm:$0xff]   ;;  %v6930_v10 = vld [vmem:[#allocation3 + $0x8a0] ss:$24 sps:$4 sm:$0xff]  }
  0xee   :  { %2559 = vmatmul.mubr.bf16.vlgmr.msra.gmra.mrb[0].mxu0 %v8004_v11 }
  0xef   :  { %2731 = vmatmul.mubr.bf16.vlgmr.msra.gmra.mrb[0].mxu1 %v8004_v11  ;;  %2570 = vmatpush1.bf16.msra.mxu0 %v6846_v12  ;;  %v6933_v12 = vld [vmem:[#allocation3 + $0x8a8] ss:$24 sps:$4 sm:$0xff]  }
  0xf0   :  { %2742 = vmatpush1.bf16.msra.mxu1 %v6849_v13  ;;  %2571 = vmatprep.subr.bf16.mxu0 %v6854_v14  ;;  %v6938_v13 = vld [vmem:[#allocation3 + $0x8d4] ss:$24 sps:$4 sm:$0xff]  }
  0xf1   :  { %2743 = vmatprep.subr.bf16.mxu1 %v6857_v15  ;;  %2601 = vmatprep.mubr.bf16.mxu0 %v8018_v18  ;;  %v6941_v14 = vld [vmem:[#allocation3 + $0x8dc] ss:$24 sps:$4 sm:$0xff]   ;;  %v6936_v15 = vld [vmem:[#allocation3 + $0x8d0] ss:$24 sps:$4 sm:$0xff]  }
  0xf2   :  { %2773 = vmatprep.mubr.bf16.mxu1 %v8018_v18 }
  0xf3   :  { %2572 = vmatpush1.bf16.msra.mxu0 %v6852_v19  ;;  %v6939_v19 = vld [vmem:[#allocation3 + $0x8d8] ss:$24 sps:$4 sm:$0xff]  }
  0xf4   :  { %2744 = vmatpush1.bf16.msra.mxu1 %v6855_v20  ;;  %2573 = vmatprep.subr.bf16.mxu0 %v6860_v21  ;;  %v6944_v20 = vld [vmem:[#allocation3 + $0x904] ss:$24 sps:$4 sm:$0xff]  }
  0xf5   :  { %2745 = vmatprep.subr.bf16.mxu1 %v6863_v22  ;;  %v6947_v21 = vld [vmem:[#allocation3 + $0x90c] ss:$24 sps:$4 sm:$0xff]   ;;  %v6942_v22 = vld [vmem:[#allocation3 + $0x900] ss:$24 sps:$4 sm:$0xff]  }
  0xf7   :  { %2574 = vmatpush1.bf16.msra.mxu0 %v6858_v23  ;;  %v6945_v23 = vld [vmem:[#allocation3 + $0x908] ss:$24 sps:$4 sm:$0xff]  }
  0xf8   :  { %2746 = vmatpush1.bf16.msra.mxu1 %v6861_v24  ;;  %2575 = vmatprep.subr.bf16.mxu0 %v6866_v25  ;;  %v8026_v24 = vcombine.low %v8009_v16, %v8014_v17  ;;  %v8031_v25 = vld [vmem:[%s8144_s0 + $0x18] sm:$0xff]  ;;  %v6948_v17 = vld [vmem:[#allocation3 + $0x930] ss:$24 sps:$4 sm:$0xff]  }
  0xf9   :  { %2747 = vmatprep.subr.bf16.mxu1 %v6869_v26  ;;  %v8036_v26 = vld [vmem:[%s8144_s0 + $0x38] sm:$0xff] }
  0xfa   :  { %v8040_v16 = vcombine.high %v8031_v25, %v8036_v26 }
  0xfb   :  { %2576 = vmatpush1.bf16.msra.mxu0 %v6864_v27  ;;  %v6950_v27 = vld [vmem:[#allocation3 + $0x934] ss:$24 sps:$4 sm:$0xff]  }
  0xfc   :  { %2748 = vmatpush1.bf16.msra.mxu1 %v6867_v28  ;;  %2577 = vmatprep.subr.bf16.mxu0 %v6872_v29  ;;  %v6953_v28 = vld [vmem:[#allocation3 + $0x93c] ss:$24 sps:$4 sm:$0xff]   ;;  %v6951_v29 = vld [vmem:[#allocation3 + $0x938] ss:$24 sps:$4 sm:$0xff]  }
  0xfd   :  { %2749 = vmatprep.subr.bf16.mxu1 %v6875_v30  ;;  %v6956_v30 = vld [vmem:[#allocation3 + $0x964] ss:$24 sps:$4 sm:$0xff]  }
  0xff   :  { %2578 = vmatpush1.bf16.msra.mxu0 %v6870_v31  ;;  %v6959_v31 = vld [vmem:[#allocation3 + $0x96c] ss:$24 sps:$4 sm:$0xff]  }
 0x100   :  { %2750 = vmatpush1.bf16.msra.mxu1 %v6873_v32  ;;  %2579 = vmatprep.subr.bf16.mxu0 %v6878_v33  ;;  %v6954_v32 = vld [vmem:[#allocation3 + $0x960] ss:$24 sps:$4 sm:$0xff]  }
 0x101   :  { %2751 = vmatprep.subr.bf16.mxu1 %v6881_v35  ;;  %v6957_v33 = vld [vmem:[#allocation3 + $0x968] ss:$24 sps:$4 sm:$0xff]   ;;  %v6962_v35 = vld [vmem:[#allocation3 + $0x994] ss:$24 sps:$4 sm:$0xff]  }
 0x103   :  { %2580 = vmatpush1.bf16.msra.mxu0 %v6876_v36  ;;  %v6965_v36 = vld [vmem:[#allocation3 + $0x99c] ss:$24 sps:$4 sm:$0xff]  }
 0x104   :  { %2752 = vmatpush1.bf16.msra.mxu1 %v6879_v37  ;;  %2581 = vmatprep.subr.bf16.mxu0 %v6884_v38  ;;  %v6960_v37 = vld [vmem:[#allocation3 + $0x990] ss:$24 sps:$4 sm:$0xff]  }
 0x105   :  { %2753 = vmatprep.subr.bf16.mxu1 %v6887_v39  ;;  %v6963_v38 = vld [vmem:[#allocation3 + $0x998] ss:$24 sps:$4 sm:$0xff]   ;;  %v6968_v39 = vld [vmem:[#allocation3 + $0x9c4] ss:$24 sps:$4 sm:$0xff]  }
 0x107   :  { %2582 = vmatpush1.bf16.msra.mxu0 %v6882_v40  ;;  %v6971_v40 = vld [vmem:[#allocation3 + $0x9cc] ss:$24 sps:$4 sm:$0xff]  }
 0x108   :  { %2754 = vmatpush1.bf16.msra.mxu1 %v6885_v41  ;;  %2583 = vmatprep.subr.bf16.mxu0 %v6890_v42  ;;  %v6966_v41 = vld [vmem:[#allocation3 + $0x9c0] ss:$24 sps:$4 sm:$0xff]  }
 0x109   :  { %2755 = vmatprep.subr.bf16.mxu1 %v6893_v43  ;;  %v6969_v42 = vld [vmem:[#allocation3 + $0x9c8] ss:$24 sps:$4 sm:$0xff]   ;;  %v6974_v43 = vld [vmem:[#allocation3 + $0x9f4] ss:$24 sps:$4 sm:$0xff]  }
 0x10b   :  { %2584 = vmatpush1.bf16.msra.mxu0 %v6888_v44  ;;  %v6977_v44 = vld [vmem:[#allocation3 + $0x9fc] ss:$24 sps:$4 sm:$0xff]  }
 0x10c   :  { %2756 = vmatpush1.bf16.msra.mxu1 %v6891_v45  ;;  %2585 = vmatprep.subr.bf16.mxu0 %v6896_v46  ;;  %v6972_v45 = vld [vmem:[#allocation3 + $0x9f0] ss:$24 sps:$4 sm:$0xff]  }
 0x10d   :  { %2757 = vmatprep.subr.bf16.mxu1 %v6899_v47  ;;  %v6975_v46 = vld [vmem:[#allocation3 + $0x9f8] ss:$24 sps:$4 sm:$0xff]   ;;  %v6980_v47 = vld [vmem:[#allocation3 + $0xa24] ss:$24 sps:$4 sm:$0xff]  }
 0x10f   :  { %2586 = vmatpush1.bf16.msra.mxu0 %v6894_v48  ;;  %v6983_v48 = vld [vmem:[#allocation3 + $0xa2c] ss:$24 sps:$4 sm:$0xff]  }
 0x110   :  { %2758 = vmatpush1.bf16.msra.mxu1 %v6897_v49  ;;  %2587 = vmatprep.subr.bf16.mxu0 %v6902_v51  ;;  %v6978_v49 = vld [vmem:[#allocation3 + $0xa20] ss:$24 sps:$4 sm:$0xff]  }
 0x111   :  { %2759 = vmatprep.subr.bf16.mxu1 %v6905_v52  ;;  %v6981_v51 = vld [vmem:[#allocation3 + $0xa28] ss:$24 sps:$4 sm:$0xff]   ;;  %v6986_v52 = vld [vmem:[#allocation3 + $0xa54] ss:$24 sps:$4 sm:$0xff]  }
 0x113   :  { %2588 = vmatpush1.bf16.msra.mxu0 %v6900_v53  ;;  %v6989_v53 = vld [vmem:[#allocation3 + $0xa5c] ss:$24 sps:$4 sm:$0xff]  }
 0x114   :  { %2760 = vmatpush1.bf16.msra.mxu1 %v6903_v54  ;;  %2589 = vmatprep.subr.bf16.mxu0 %v6908_v55  ;;  %v6984_v54 = vld [vmem:[#allocation3 + $0xa50] ss:$24 sps:$4 sm:$0xff]  }
 0x115   :  { %2761 = vmatprep.subr.bf16.mxu1 %v6911_v56  ;;  %v6987_v55 = vld [vmem:[#allocation3 + $0xa58] ss:$24 sps:$4 sm:$0xff]   ;;  %v6992_v56 = vld [vmem:[#allocation3 + $0xa84] ss:$24 sps:$4 sm:$0xff]  }
 0x117   :  { %2590 = vmatpush1.bf16.msra.mxu0 %v6906_v57  ;;  %v6995_v57 = vld [vmem:[#allocation3 + $0xa8c] ss:$24 sps:$4 sm:$0xff]  }
 0x118   :  { %2762 = vmatpush1.bf16.msra.mxu1 %v6909_v58  ;;  %2591 = vmatprep.subr.bf16.mxu0 %v6914_v59  ;;  %v6990_v58 = vld [vmem:[#allocation3 + $0xa80] ss:$24 sps:$4 sm:$0xff]  }
 0x119   :  { %2763 = vmatprep.subr.bf16.mxu1 %v6917_v60  ;;  %v6993_v59 = vld [vmem:[#allocation3 + $0xa88] ss:$24 sps:$4 sm:$0xff]   ;;  %v6998_v60 = vld [vmem:[#allocation3 + $0xab4] ss:$24 sps:$4 sm:$0xff]  }
 0x11b   :  { %2592 = vmatpush1.bf16.msra.mxu0 %v6912_v61  ;;  %v7001_v61 = vld [vmem:[#allocation3 + $0xabc] ss:$24 sps:$4 sm:$0xff]  }
 0x11c   :  { %2764 = vmatpush1.bf16.msra.mxu1 %v6915_v62  ;;  %2593 = vmatprep.subr.bf16.mxu0 %v6920_v63  ;;  %v6996_v62 = vld [vmem:[#allocation3 + $0xab0] ss:$24 sps:$4 sm:$0xff]  }
 0x11d   :  { %2765 = vmatprep.subr.bf16.mxu1 %v6923_v0  ;;  %v6999_v63 = vld [vmem:[#allocation3 + $0xab8] ss:$24 sps:$4 sm:$0xff]   ;;  %v7004_v0 = vld [vmem:[#allocation3 + $0xae4] ss:$24 sps:$4 sm:$0xff]  }
 0x11f   :  { %2594 = vmatpush1.bf16.msra.mxu0 %v6918_v1  ;;  %v7007_v1 = vld [vmem:[#allocation3 + $0xaec] ss:$24 sps:$4 sm:$0xff]  }
 0x120   :  { %2766 = vmatpush1.bf16.msra.mxu1 %v6921_v2  ;;  %2595 = vmatprep.subr.bf16.mxu0 %v6926_v3  ;;  %v7002_v2 = vld [vmem:[#allocation3 + $0xae0] ss:$24 sps:$4 sm:$0xff]  }
 0x121   :  { %2767 = vmatprep.subr.bf16.mxu1 %v6929_v4  ;;  %v7005_v3 = vld [vmem:[#allocation3 + $0xae8] ss:$24 sps:$4 sm:$0xff]   ;;  %v7010_v4 = vld [vmem:[#allocation3 + $0xb14] ss:$24 sps:$4 sm:$0xff]  }
 0x123   :  { %2596 = vmatpush1.bf16.msra.mxu0 %v6924_v6  ;;  %v7013_v6 = vld [vmem:[#allocation3 + $0xb1c] ss:$24 sps:$4 sm:$0xff]  }
 0x124   :  { %2768 = vmatpush1.bf16.msra.mxu1 %v6927_v7  ;;  %2597 = vmatprep.subr.bf16.mxu0 %v6932_v8  ;;  %v7008_v7 = vld [vmem:[#allocation3 + $0xb10] ss:$24 sps:$4 sm:$0xff]  }
 0x125   :  { %2769 = vmatprep.subr.bf16.mxu1 %v6935_v9  ;;  %v7011_v8 = vld [vmem:[#allocation3 + $0xb18] ss:$24 sps:$4 sm:$0xff]   ;;  %v7016_v9 = vld [vmem:[#allocation3 + $0xb44] ss:$24 sps:$4 sm:$0xff]  }
 0x127   :  { %2598 = vmatpush1.bf16.msra.mxu0 %v6930_v10  ;;  %v7019_v10 = vld [vmem:[#allocation3 + $0xb4c] ss:$24 sps:$4 sm:$0xff]  }
 0x128   :  { %2770 = vmatpush1.bf16.msra.mxu1 %v6933_v12  ;;  %2599 = vmatprep.subr.bf16.mxu0 %v6938_v13  ;;  %v7014_v12 = vld [vmem:[#allocation3 + $0xb40] ss:$24 sps:$4 sm:$0xff]  }
 0x129   :  { %2771 = vmatprep.subr.bf16.mxu1 %v6941_v14  ;;  %v7017_v13 = vld [vmem:[#allocation3 + $0xb48] ss:$24 sps:$4 sm:$0xff]   ;;  %v7022_v14 = vld [vmem:[#allocation3 + $0xb74] ss:$24 sps:$4 sm:$0xff]  }
 0x12b   :  { %2600 = vmatpush1.bf16.msra.mxu0 %v6936_v15  ;;  %v7025_v15 = vld [vmem:[#allocation3 + $0xb7c] ss:$24 sps:$4 sm:$0xff]  }
 0x12c   :  { %2772 = vmatpush1.bf16.msra.mxu1 %v6939_v19  ;;  %2612 = vmatprep.subr.bf16.mxu0 %v6944_v20  ;;  %v7020_v19 = vld [vmem:[#allocation3 + $0xb70] ss:$24 sps:$4 sm:$0xff]  }
 0x12d   :  { %2784 = vmatprep.subr.bf16.mxu1 %v6947_v21  ;;  %v7023_v20 = vld [vmem:[#allocation3 + $0xb78] ss:$24 sps:$4 sm:$0xff]   ;;  %v7028_v21 = vld [vmem:[#allocation3 + $0xba4] ss:$24 sps:$4 sm:$0xff]  }
 0x12e   :  { %2602 = vmatmul.mubr.bf16.vlgmr.msra.gmra.mrb[0].mxu0 %v8026_v24 }
 0x12f   :  { %2774 = vmatmul.mubr.bf16.vlgmr.msra.gmra.mrb[0].mxu1 %v8026_v24  ;;  %2613 = vmatpush1.bf16.msra.mxu0 %v6942_v22  ;;  %v7031_v22 = vld [vmem:[#allocation3 + $0xbac] ss:$24 sps:$4 sm:$0xff]  }
 0x130   :  { %2785 = vmatpush1.bf16.msra.mxu1 %v6945_v23  ;;  %2614 = vmatprep.subr.bf16.mxu0 %v6950_v27  ;;  %v7026_v23 = vld [vmem:[#allocation3 + $0xba0] ss:$24 sps:$4 sm:$0xff]  }
 0x131   :  { %2786 = vmatprep.subr.bf16.mxu1 %v6953_v28  ;;  %2644 = vmatprep.mubr.bf16.mxu0 %v8040_v16  ;;  %v7029_v27 = vld [vmem:[#allocation3 + $0xba8] ss:$24 sps:$4 sm:$0xff]   ;;  %v7034_v28 = vld [vmem:[#allocation3 + $0xbd4] ss:$24 sps:$4 sm:$0xff]  }
 0x132   :  { %2816 = vmatprep.mubr.bf16.mxu1 %v8040_v16 }
 0x133   :  { %2615 = vmatpush1.bf16.msra.mxu0 %v6948_v17  ;;  %v7037_v17 = vld [vmem:[#allocation3 + $0xbdc] ss:$24 sps:$4 sm:$0xff]  }
 0x134   :  { %2787 = vmatpush1.bf16.msra.mxu1 %v6951_v29  ;;  %2616 = vmatprep.subr.bf16.mxu0 %v6956_v30  ;;  %v7032_v29 = vld [vmem:[#allocation3 + $0xbd0] ss:$24 sps:$4 sm:$0xff]  }
 0x135   :  { %2788 = vmatprep.subr.bf16.mxu1 %v6959_v31  ;;  %v7035_v30 = vld [vmem:[#allocation3 + $0xbd8] ss:$24 sps:$4 sm:$0xff]   ;;  %v7040_v31 = vld [vmem:[#allocation3 + $0x14] ss:$24 sps:$4 sm:$0xff]  }
 0x137   :  { %2617 = vmatpush1.bf16.msra.mxu0 %v6954_v32  ;;  %v8048_v32 = vcombine.low %v8031_v25, %v8036_v26  ;;  %v7047_v25 = vld [vmem:[#allocation3 + $0xa0] ss:$24 sps:$4 sm:$0xff]   ;;  %v7052_v26 = vld [vmem:[#allocation3 + $0xd4] ss:$24 sps:$4 sm:$0xff]  }
 0x138   :  { %2789 = vmatpush1.bf16.msra.mxu1 %v6957_v33  ;;  %2618 = vmatprep.subr.bf16.mxu0 %v6962_v35  ;;  %v7038_v33 = vld [vmem:[#allocation3 + $0x10] ss:$24 sps:$4 sm:$0xff]   ;;  %v7043_v35 = vld [vmem:[#allocation3 + $0x44] ss:$24 sps:$4 sm:$0xff]  }
 0x139   :  { %2790 = vmatprep.subr.bf16.mxu1 %v6965_v36  ;;  %v7041_v36 = vld [vmem:[#allocation3 + $0x40] ss:$24 sps:$4 sm:$0xff]  }
 0x13b   :  { %2619 = vmatpush1.bf16.msra.mxu0 %v6960_v37  ;;  %v7046_v37 = vld [vmem:[#allocation3 + $0x74] ss:$24 sps:$4 sm:$0xff]  }
 0x13c   :  { %2791 = vmatpush1.bf16.msra.mxu1 %v6963_v38  ;;  %2620 = vmatprep.subr.bf16.mxu0 %v6968_v39  ;;  %v7044_v38 = vld [vmem:[#allocation3 + $0x70] ss:$24 sps:$4 sm:$0xff]   ;;  %v7049_v39 = vld [vmem:[#allocation3 + $0xa4] ss:$24 sps:$4 sm:$0xff]  }
 0x13d   :  { %2792 = vmatprep.subr.bf16.mxu1 %v6971_v40  ;;  %v7050_v40 = vld [vmem:[#allocation3 + $0xd0] ss:$24 sps:$4 sm:$0xff]  }
 0x13f   :  { %2621 = vmatpush1.bf16.msra.mxu0 %v6966_v41  ;;  %v7055_v41 = vld [vmem:[#allocation3 + $0x104] ss:$24 sps:$4 sm:$0xff]  }
 0x140   :  { %2793 = vmatpush1.bf16.msra.mxu1 %v6969_v42  ;;  %2622 = vmatprep.subr.bf16.mxu0 %v6974_v43  ;;  %v7053_v42 = vld [vmem:[#allocation3 + $0x100] ss:$24 sps:$4 sm:$0xff]   ;;  %v7058_v43 = vld [vmem:[#allocation3 + $0x134] ss:$24 sps:$4 sm:$0xff]  }
 0x141   :  { %2794 = vmatprep.subr.bf16.mxu1 %v6977_v44  ;;  %v7056_v44 = vld [vmem:[#allocation3 + $0x130] ss:$24 sps:$4 sm:$0xff]  }
 0x143   :  { %2623 = vmatpush1.bf16.msra.mxu0 %v6972_v45  ;;  %v7059_v45 = vld [vmem:[#allocation3 + $0x160] ss:$24 sps:$4 sm:$0xff]  }
 0x144   :  { %2795 = vmatpush1.bf16.msra.mxu1 %v6975_v46  ;;  %2624 = vmatprep.subr.bf16.mxu0 %v6980_v47  ;;  %v7155_v46 = vld [vmem:[#allocation7] ss:$24 sps:$4 sm:$0xff]   ;;  %v7157_v47 = vld [vmem:[#allocation7 + $0x4] ss:$24 sps:$4 sm:$0xff]  }
 0x145   :  { %2796 = vmatprep.subr.bf16.mxu1 %v6983_v48  ;;  %v7064_v48 = vld [vmem:[#allocation3 + $0x194] ss:$24 sps:$4 sm:$0xff]  }
 0x147   :  { %2625 = vmatpush1.bf16.msra.mxu0 %v6978_v49  ;;  %v7062_v49 = vld [vmem:[#allocation3 + $0x190] ss:$24 sps:$4 sm:$0xff]  }
 0x148   :  { %2797 = vmatpush1.bf16.msra.mxu1 %v6981_v51  ;;  %2626 = vmatprep.subr.bf16.mxu0 %v6986_v52  ;;  %v7161_v51 = vld [vmem:[#allocation7 + $0x30] ss:$24 sps:$4 sm:$0xff]   ;;  %v7163_v52 = vld [vmem:[#allocation7 + $0x34] ss:$24 sps:$4 sm:$0xff]  }
 0x149   :  { %2798 = vmatprep.subr.bf16.mxu1 %v6989_v53  ;;  %v7067_v53 = vld [vmem:[#allocation3 + $0x1c4] ss:$24 sps:$4 sm:$0xff]  }
 0x14b   :  { %2627 = vmatpush1.bf16.msra.mxu0 %v6984_v54  ;;  %v7065_v54 = vld [vmem:[#allocation3 + $0x1c0] ss:$24 sps:$4 sm:$0xff]  }
 0x14c   :  { %2799 = vmatpush1.bf16.msra.mxu1 %v6987_v55  ;;  %2628 = vmatprep.subr.bf16.mxu0 %v6992_v56  ;;  %v7167_v55 = vld [vmem:[#allocation7 + $0x60] ss:$24 sps:$4 sm:$0xff]   ;;  %v7169_v56 = vld [vmem:[#allocation7 + $0x64] ss:$24 sps:$4 sm:$0xff]  }
 0x14d   :  { %2800 = vmatprep.subr.bf16.mxu1 %v6995_v57  ;;  %v7070_v57 = vld [vmem:[#allocation3 + $0x1f4] ss:$24 sps:$4 sm:$0xff]  }
 0x14f   :  { %2629 = vmatpush1.bf16.msra.mxu0 %v6990_v58  ;;  %v7068_v58 = vld [vmem:[#allocation3 + $0x1f0] ss:$24 sps:$4 sm:$0xff]  }
 0x150   :  { %2801 = vmatpush1.bf16.msra.mxu1 %v6993_v59  ;;  %2630 = vmatprep.subr.bf16.mxu0 %v6998_v60  ;;  %v7173_v59 = vld [vmem:[#allocation7 + $0x90] ss:$24 sps:$4 sm:$0xff]   ;;  %v7175_v60 = vld [vmem:[#allocation7 + $0x94] ss:$24 sps:$4 sm:$0xff]  }
 0x151   :  { %2802 = vmatprep.subr.bf16.mxu1 %v7001_v61  ;;  %v7073_v61 = vld [vmem:[#allocation3 + $0x224] ss:$24 sps:$4 sm:$0xff]  }
 0x153   :  { %2631 = vmatpush1.bf16.msra.mxu0 %v6996_v62  ;;  %v7071_v62 = vld [vmem:[#allocation3 + $0x220] ss:$24 sps:$4 sm:$0xff]  }
 0x154   :  { %2803 = vmatpush1.bf16.msra.mxu1 %v6999_v63  ;;  %2632 = vmatprep.subr.bf16.mxu0 %v7004_v0  ;;  %v7179_v63 = vld [vmem:[#allocation7 + $0xc0] ss:$24 sps:$4 sm:$0xff]   ;;  %v7181_v0 = vld [vmem:[#allocation7 + $0xc4] ss:$24 sps:$4 sm:$0xff]  }
 0x155   :  { %2804 = vmatprep.subr.bf16.mxu1 %v7007_v1  ;;  %v7076_v1 = vld [vmem:[#allocation3 + $0x254] ss:$24 sps:$4 sm:$0xff]  }
 0x157   :  { %2633 = vmatpush1.bf16.msra.mxu0 %v7002_v2  ;;  %v7074_v2 = vld [vmem:[#allocation3 + $0x250] ss:$24 sps:$4 sm:$0xff]  }
 0x158   :  { %2805 = vmatpush1.bf16.msra.mxu1 %v7005_v3  ;;  %2634 = vmatprep.subr.bf16.mxu0 %v7010_v4  ;;  %v7185_v3 = vld [vmem:[#allocation7 + $0xf0] ss:$24 sps:$4 sm:$0xff]   ;;  %v7187_v4 = vld [vmem:[#allocation7 + $0xf4] ss:$24 sps:$4 sm:$0xff]  }
 0x159   :  { %2806 = vmatprep.subr.bf16.mxu1 %v7013_v6  ;;  %v7079_v6 = vld [vmem:[#allocation3 + $0x284] ss:$24 sps:$4 sm:$0xff]  }
 0x15b   :  { %2635 = vmatpush1.bf16.msra.mxu0 %v7008_v7  ;;  %v7077_v7 = vld [vmem:[#allocation3 + $0x280] ss:$24 sps:$4 sm:$0xff]  }
 0x15c   :  { %2807 = vmatpush1.bf16.msra.mxu1 %v7011_v8  ;;  %2636 = vmatprep.subr.bf16.mxu0 %v7016_v9  ;;  %v7191_v8 = vld [vmem:[#allocation7 + $0x120] ss:$24 sps:$4 sm:$0xff]   ;;  %v7193_v9 = vld [vmem:[#allocation7 + $0x124] ss:$24 sps:$4 sm:$0xff]  }
 0x15d   :  { %2808 = vmatprep.subr.bf16.mxu1 %v7019_v10  ;;  %v7082_v10 = vld [vmem:[#allocation3 + $0x2b4] ss:$24 sps:$4 sm:$0xff]  }
 0x15f   :  { %2637 = vmatpush1.bf16.msra.mxu0 %v7014_v12  ;;  %v7080_v12 = vld [vmem:[#allocation3 + $0x2b0] ss:$24 sps:$4 sm:$0xff]  }
 0x160   :  { %2809 = vmatpush1.bf16.msra.mxu1 %v7017_v13  ;;  %2638 = vmatprep.subr.bf16.mxu0 %v7022_v14  ;;  %v7197_v13 = vld [vmem:[#allocation7 + $0x150] ss:$24 sps:$4 sm:$0xff]   ;;  %v7199_v14 = vld [vmem:[#allocation7 + $0x154] ss:$24 sps:$4 sm:$0xff]  }
 0x161   :  { %2810 = vmatprep.subr.bf16.mxu1 %v7025_v15  ;;  %v7085_v15 = vld [vmem:[#allocation3 + $0x2e4] ss:$24 sps:$4 sm:$0xff]  }
 0x163   :  { %2639 = vmatpush1.bf16.msra.mxu0 %v7020_v19  ;;  %v7083_v19 = vld [vmem:[#allocation3 + $0x2e0] ss:$24 sps:$4 sm:$0xff]  }
 0x164   :  { %2811 = vmatpush1.bf16.msra.mxu1 %v7023_v20  ;;  %2640 = vmatprep.subr.bf16.mxu0 %v7028_v21  ;;  %v7203_v20 = vld [vmem:[#allocation7 + $0x180] ss:$24 sps:$4 sm:$0xff]   ;;  %v7205_v21 = vld [vmem:[#allocation7 + $0x184] ss:$24 sps:$4 sm:$0xff]  }
 0x165   :  { %2812 = vmatprep.subr.bf16.mxu1 %v7031_v22  ;;  %v7088_v22 = vld [vmem:[#allocation3 + $0x314] ss:$24 sps:$4 sm:$0xff]  }
 0x167   :  { %2641 = vmatpush1.bf16.msra.mxu0 %v7026_v23  ;;  %v7086_v23 = vld [vmem:[#allocation3 + $0x310] ss:$24 sps:$4 sm:$0xff]  }
 0x168   :  { %2813 = vmatpush1.bf16.msra.mxu1 %v7029_v27  ;;  %2642 = vmatprep.subr.bf16.mxu0 %v7034_v28  ;;  %v7209_v27 = vld [vmem:[#allocation7 + $0x1b0] ss:$24 sps:$4 sm:$0xff]   ;;  %v7211_v28 = vld [vmem:[#allocation7 + $0x1b4] ss:$24 sps:$4 sm:$0xff]  }
 0x169   :  { %2814 = vmatprep.subr.bf16.mxu1 %v7037_v17  ;;  %v7091_v17 = vld [vmem:[#allocation3 + $0x344] ss:$24 sps:$4 sm:$0xff]  }
 0x16b   :  { %2643 = vmatpush1.bf16.msra.mxu0 %v7032_v29  ;;  %v7089_v29 = vld [vmem:[#allocation3 + $0x340] ss:$24 sps:$4 sm:$0xff]  }
 0x16c   :  { %2815 = vmatpush1.bf16.msra.mxu1 %v7035_v30  ;;  %2827 = vmatprep.subr.bf16.mxu0 %v7040_v31  ;;  %v7215_v30 = vld [vmem:[#allocation7 + $0x1e0] ss:$24 sps:$4 sm:$0xff]   ;;  %v7217_v31 = vld [vmem:[#allocation7 + $0x1e4] ss:$24 sps:$4 sm:$0xff]  }
 0x16d   :  { %4848 = vmatprep.subr.bf16.mxu1 %v7157_v47  ;;  %v7247_v47 = vld [vmem:[#allocation7 + $0x2d4] ss:$24 sps:$4 sm:$0xff]  }
 0x16e   :  { %2645 = vmatmul.mubr.bf16.vlgmr.msra.gmra.mrb[0].mxu0 %v8048_v32 }
 0x16f   :  { %2817 = vmatmul.mubr.bf16.vlgmr.msra.gmra.mrb[0].mxu1 %v8048_v32  ;;  %2828 = vmatpush1.bf16.msra.mxu0 %v7038_v33  ;;  %v7094_v33 = vld [vmem:[#allocation3 + $0x374] ss:$24 sps:$4 sm:$0xff]  }
 0x170   :  { %2859 = vmatprep.mubr.bf16.mxu0 %v7978_v50  ;;  %2829 = vmatprep.subr.bf16.mxu0 %v7043_v35  ;;  %v7061_v50 = vld [vmem:[#allocation3 + $0x164] ss:$24 sps:$4 sm:$0xff]   ;;  %v7092_v35 = vld [vmem:[#allocation3 + $0x370] ss:$24 sps:$4 sm:$0xff]  }
 0x171   :  { %4849 = vmatpush1.bf16.msra.mxu1 %v7155_v46  ;;  %v7104_v46 = vld [vmem:[#allocation3 + $0x430] ss:$24 sps:$4 sm:$0xff]  }
 0x172   :  { %4850 = vmatprep.subr.bf16.mxu1 %v7163_v52  ;;  %v7253_v52 = vld [vmem:[#allocation7 + $0x304] ss:$24 sps:$4 sm:$0xff]  }
 0x173   :  { %2830 = vmatpush1.bf16.msra.mxu0 %v7041_v36  ;;  %v7221_v36 = vld [vmem:[#allocation7 + $0x210] ss:$24 sps:$4 sm:$0xff]  }
 0x174   :  { %2831 = vmatprep.subr.bf16.mxu0 %v7046_v37  ;;  %v7223_v37 = vld [vmem:[#allocation7 + $0x214] ss:$24 sps:$4 sm:$0xff]  }
 0x175   :  { %4851 = vmatpush1.bf16.msra.mxu1 %v7161_v51  ;;  %v7107_v51 = vld [vmem:[#allocation3 + $0x460] ss:$24 sps:$4 sm:$0xff]  }
 0x176   :  { %4852 = vmatprep.subr.bf16.mxu1 %v7169_v56  ;;  %v7113_v56 = vld [vmem:[#allocation3 + $0x4c0] ss:$24 sps:$4 sm:$0xff]  }
 0x177   :  { %2832 = vmatpush1.bf16.msra.mxu0 %v7044_v38  ;;  %v7097_v38 = vld [vmem:[#allocation3 + $0x3a4] ss:$24 sps:$4 sm:$0xff]  }
 0x178   :  { %2833 = vmatprep.subr.bf16.mxu0 %v7049_v39  ;;  %v7227_v39 = vld [vmem:[#allocation7 + $0x240] ss:$24 sps:$4 sm:$0xff]  }
 0x179   :  { %4853 = vmatpush1.bf16.msra.mxu1 %v7167_v55  ;;  %v7115_v55 = vld [vmem:[#allocation3 + $0x4c4] ss:$24 sps:$4 sm:$0xff]  }
 0x17a   :  { %4854 = vmatprep.subr.bf16.mxu1 %v7175_v60  ;;  %v7119_v60 = vld [vmem:[#allocation3 + $0x520] ss:$24 sps:$4 sm:$0xff]  }
 0x17b   :  { %2834 = vmatpush1.bf16.msra.mxu0 %v7047_v25  ;;  %v7229_v25 = vld [vmem:[#allocation7 + $0x244] ss:$24 sps:$4 sm:$0xff]  }
 0x17c   :  { %2835 = vmatprep.subr.bf16.mxu0 %v7052_v26  ;;  %v7098_v26 = vld [vmem:[#allocation3 + $0x3d0] ss:$24 sps:$4 sm:$0xff]  }
 0x17d   :  { %4855 = vmatpush1.bf16.msra.mxu1 %v7173_v59  ;;  %v7121_v59 = vld [vmem:[#allocation3 + $0x524] ss:$24 sps:$4 sm:$0xff]  }
 0x17e   :  { %4856 = vmatprep.subr.bf16.mxu1 %v7181_v0  ;;  %v7125_v0 = vld [vmem:[#allocation3 + $0x580] ss:$24 sps:$4 sm:$0xff]  }
 0x17f   :  { %2836 = vmatpush1.bf16.msra.mxu0 %v7050_v40  ;;  %v7233_v40 = vld [vmem:[#allocation7 + $0x270] ss:$24 sps:$4 sm:$0xff]  }
 0x180   :  { %2837 = vmatprep.subr.bf16.mxu0 %v7055_v41  ;;  %v7235_v41 = vld [vmem:[#allocation7 + $0x274] ss:$24 sps:$4 sm:$0xff]  }
 0x181   :  { %4857 = vmatpush1.bf16.msra.mxu1 %v7179_v63  ;;  %v7127_v63 = vld [vmem:[#allocation3 + $0x584] ss:$24 sps:$4 sm:$0xff]  }
 0x182   :  { %4858 = vmatprep.subr.bf16.mxu1 %v7187_v4  ;;  %v7131_v4 = vld [vmem:[#allocation3 + $0x5e0] ss:$24 sps:$4 sm:$0xff]  }
 0x183   :  { %2838 = vmatpush1.bf16.msra.mxu0 %v7053_v42  ;;  %v7103_v42 = vld [vmem:[#allocation3 + $0x404] ss:$24 sps:$4 sm:$0xff]  }
 0x184   :  { %2839 = vmatprep.subr.bf16.mxu0 %v7058_v43  ;;  %v7101_v43 = vld [vmem:[#allocation3 + $0x400] ss:$24 sps:$4 sm:$0xff]  }
 0x185   :  { %4859 = vmatpush1.bf16.msra.mxu1 %v7185_v3  ;;  %v7133_v3 = vld [vmem:[#allocation3 + $0x5e4] ss:$24 sps:$4 sm:$0xff]  }
 0x186   :  { %4860 = vmatprep.subr.bf16.mxu1 %v7193_v9  ;;  %v7137_v9 = vld [vmem:[#allocation3 + $0x640] ss:$24 sps:$4 sm:$0xff]  }
 0x187   :  { %2840 = vmatpush1.bf16.msra.mxu0 %v7056_v44  ;;  %v7241_v44 = vld [vmem:[#allocation7 + $0x2a4] ss:$24 sps:$4 sm:$0xff]  }
 0x188   :  { %2841 = vmatprep.subr.bf16.mxu0 %v7061_v50  ;;  %v7106_v50 = vld [vmem:[#allocation3 + $0x434] ss:$24 sps:$4 sm:$0xff]  }
 0x189   :  { %4861 = vmatpush1.bf16.msra.mxu1 %v7191_v8  ;;  %v7139_v8 = vld [vmem:[#allocation3 + $0x644] ss:$24 sps:$4 sm:$0xff]  }
 0x18a   :  { %4862 = vmatprep.subr.bf16.mxu1 %v7199_v14  ;;  %v7143_v14 = vld [vmem:[#allocation3 + $0x6a0] ss:$24 sps:$4 sm:$0xff]  }
 0x18b   :  { %2842 = vmatpush1.bf16.msra.mxu0 %v7059_v45  ;;  %v7239_v45 = vld [vmem:[#allocation7 + $0x2a0] ss:$24 sps:$4 sm:$0xff]  }
 0x18c   :  { %2843 = vmatprep.subr.bf16.mxu0 %v7064_v48  ;;  %v7109_v48 = vld [vmem:[#allocation3 + $0x464] ss:$24 sps:$4 sm:$0xff]  }
 0x18d   :  { %4863 = vmatpush1.bf16.msra.mxu1 %v7197_v13  ;;  %v7145_v13 = vld [vmem:[#allocation3 + $0x6a4] ss:$24 sps:$4 sm:$0xff]  }
 0x18e   :  { %4864 = vmatprep.subr.bf16.mxu1 %v7205_v21  ;;  %v7154_v21 = vld [vmem:[#allocation3 + $0x734] ss:$24 sps:$4 sm:$0xff]  }
 0x18f   :  { %2844 = vmatpush1.bf16.msra.mxu0 %v7062_v49  ;;  %v7245_v49 = vld [vmem:[#allocation7 + $0x2d0] ss:$24 sps:$4 sm:$0xff]  }
 0x190   :  { %2845 = vmatprep.subr.bf16.mxu0 %v7067_v53  ;;  %v7112_v53 = vld [vmem:[#allocation3 + $0x494] ss:$24 sps:$4 sm:$0xff]  }
 0x191   :  { %4865 = vmatpush1.bf16.msra.mxu1 %v7203_v20  ;;  %v7151_v20 = vld [vmem:[#allocation3 + $0x704] ss:$24 sps:$4 sm:$0xff]  }
 0x192   :  { %4866 = vmatprep.subr.bf16.mxu1 %v7211_v28  ;;  %v7164_v28 = vld [vmem:[#allocation3 + $0x790] ss:$24 sps:$4 sm:$0xff]  }
 0x193   :  { %2846 = vmatpush1.bf16.msra.mxu0 %v7065_v54  ;;  %v7110_v54 = vld [vmem:[#allocation3 + $0x490] ss:$24 sps:$4 sm:$0xff]  }
 0x194   :  { %2847 = vmatprep.subr.bf16.mxu0 %v7070_v57  ;;  %v7118_v57 = vld [vmem:[#allocation3 + $0x4f4] ss:$24 sps:$4 sm:$0xff]  }
 0x195   :  { %4867 = vmatpush1.bf16.msra.mxu1 %v7209_v27  ;;  %v7166_v27 = vld [vmem:[#allocation3 + $0x794] ss:$24 sps:$4 sm:$0xff]  }
 0x196   :  { %4868 = vmatprep.subr.bf16.mxu1 %v7217_v31  ;;  %v7176_v31 = vld [vmem:[#allocation3 + $0x7f0] ss:$24 sps:$4 sm:$0xff]  }
 0x197   :  { %2848 = vmatpush1.bf16.msra.mxu0 %v7068_v58  ;;  %v7116_v58 = vld [vmem:[#allocation3 + $0x4f0] ss:$24 sps:$4 sm:$0xff]  }
 0x198   :  { %2849 = vmatprep.subr.bf16.mxu0 %v7073_v61  ;;  %v7124_v61 = vld [vmem:[#allocation3 + $0x554] ss:$24 sps:$4 sm:$0xff]  }
 0x199   :  { %4869 = vmatpush1.bf16.msra.mxu1 %v7215_v30  ;;  %v7178_v30 = vld [vmem:[#allocation3 + $0x7f4] ss:$24 sps:$4 sm:$0xff]  }
 0x19a   :  { %4870 = vmatprep.subr.bf16.mxu1 %v7223_v37  ;;  %v7188_v37 = vld [vmem:[#allocation3 + $0x850] ss:$24 sps:$4 sm:$0xff]  }
 0x19b   :  { %2850 = vmatpush1.bf16.msra.mxu0 %v7071_v62  ;;  %v7122_v62 = vld [vmem:[#allocation3 + $0x550] ss:$24 sps:$4 sm:$0xff]  }
 0x19c   :  { %2851 = vmatprep.subr.bf16.mxu0 %v7076_v1  ;;  %v7130_v1 = vld [vmem:[#allocation3 + $0x5b4] ss:$24 sps:$4 sm:$0xff]  }
 0x19d   :  { %4871 = vmatpush1.bf16.msra.mxu1 %v7221_v36  ;;  %v7190_v36 = vld [vmem:[#allocation3 + $0x854] ss:$24 sps:$4 sm:$0xff]  }
 0x19e   :  { %4872 = vmatprep.subr.bf16.mxu1 %v7229_v25  ;;  %v7200_v25 = vld [vmem:[#allocation3 + $0x8b0] ss:$24 sps:$4 sm:$0xff]  }
 0x19f   :  { %2852 = vmatpush1.bf16.msra.mxu0 %v7074_v2  ;;  %v7128_v2 = vld [vmem:[#allocation3 + $0x5b0] ss:$24 sps:$4 sm:$0xff]  }
 0x1a0   :  { %2853 = vmatprep.subr.bf16.mxu0 %v7079_v6  ;;  %v7136_v6 = vld [vmem:[#allocation3 + $0x614] ss:$24 sps:$4 sm:$0xff]  }
 0x1a1   :  { %4873 = vmatpush1.bf16.msra.mxu1 %v7227_v39  ;;  %v7202_v39 = vld [vmem:[#allocation3 + $0x8b4] ss:$24 sps:$4 sm:$0xff]  }
 0x1a2   :  { %4874 = vmatprep.subr.bf16.mxu1 %v7235_v41  ;;  %v7212_v41 = vld [vmem:[#allocation3 + $0x910] ss:$24 sps:$4 sm:$0xff]  }
 0x1a3   :  { %2854 = vmatpush1.bf16.msra.mxu0 %v7077_v7  ;;  %v7134_v7 = vld [vmem:[#allocation3 + $0x610] ss:$24 sps:$4 sm:$0xff]  }
 0x1a4   :  { %2855 = vmatprep.subr.bf16.mxu0 %v7082_v10  ;;  %v7142_v10 = vld [vmem:[#allocation3 + $0x674] ss:$24 sps:$4 sm:$0xff]  }
 0x1a5   :  { %4875 = vmatpush1.bf16.msra.mxu1 %v7233_v40  ;;  %v7214_v40 = vld [vmem:[#allocation3 + $0x914] ss:$24 sps:$4 sm:$0xff]  }
 0x1a6   :  { %4876 = vmatprep.subr.bf16.mxu1 %v7241_v44  ;;  %v7226_v44 = vld [vmem:[#allocation3 + $0x974] ss:$24 sps:$4 sm:$0xff]  }
 0x1a7   :  { %2856 = vmatpush1.bf16.msra.mxu0 %v7080_v12  ;;  %v7140_v12 = vld [vmem:[#allocation3 + $0x670] ss:$24 sps:$4 sm:$0xff]  }
 0x1a8   :  { %2857 = vmatprep.subr.bf16.mxu0 %v7085_v15  ;;  %v7148_v15 = vld [vmem:[#allocation3 + $0x6d4] ss:$24 sps:$4 sm:$0xff]  }
 0x1a9   :  { %4877 = vmatpush1.bf16.msra.mxu1 %v7239_v45  ;;  %v7224_v45 = vld [vmem:[#allocation3 + $0x970] ss:$24 sps:$4 sm:$0xff]  }
 0x1aa   :  { %4878 = vmatprep.subr.bf16.mxu1 %v7247_v47 }
 0x1ab   :  { %2858 = vmatpush1.bf16.msra.mxu0 %v7083_v19  ;;  %v7146_v19 = vld [vmem:[#allocation3 + $0x6d0] ss:$24 sps:$4 sm:$0xff]  }
 0x1ac   :  { %2870 = vmatprep.subr.bf16.mxu0 %v7088_v22  ;;  %v7160_v22 = vld [vmem:[#allocation3 + $0x764] ss:$24 sps:$4 sm:$0xff]  }
 0x1ad   :  { %4879 = vmatpush1.bf16.msra.mxu1 %v7245_v49  ;;  %v7238_v49 = vld [vmem:[#allocation3 + $0x9d4] ss:$24 sps:$4 sm:$0xff]  }
 0x1ae   :  { %2860 = vmatmul.mubr.bf16.vlgmr.msra.gmra.mrb[4].mxu0 %v7982_v5  ;;  %v7095_v5 = vld [vmem:[#allocation3 + $0x3a0] ss:$24 sps:$4 sm:$0xff]   ;;  %4891 = vmatprep.subr.bf16.mxu1 %v7253_v52 }
 0x1af   :  { %2871 = vmatpush1.bf16.msra.mxu0 %v7086_v23  ;;  %2902 = vmatprep.mubr.bf16.mxu0 %v7998_v34  ;;  %v7100_v34 = vld [vmem:[#allocation3 + $0x3d4] ss:$24 sps:$4 sm:$0xff]   ;;  %v7158_v23 = vld [vmem:[#allocation3 + $0x760] ss:$24 sps:$4 sm:$0xff]  }
 0x1b0   :  { %2872 = vmatprep.subr.bf16.mxu0 %v7091_v17  ;;  %v7172_v17 = vld [vmem:[#allocation3 + $0x7c4] ss:$24 sps:$4 sm:$0xff]  }
 0x1b1   :  { %v8062_v52 = vld [vmem:[#allocation5] sm:$0x3f] }
 0x1b3   :  { %2873 = vmatpush1.bf16.msra.mxu0 %v7089_v29  ;;  %v7170_v29 = vld [vmem:[#allocation3 + $0x7c0] ss:$24 sps:$4 sm:$0xff]  }
 0x1b4   :  { %2874 = vmatprep.subr.bf16.mxu0 %v7094_v33  ;;  %v7184_v33 = vld [vmem:[#allocation3 + $0x824] ss:$24 sps:$4 sm:$0xff]  }
 0x1b7   :  { %2875 = vmatpush1.bf16.msra.mxu0 %v7092_v35  ;;  %v7182_v35 = vld [vmem:[#allocation3 + $0x820] ss:$24 sps:$4 sm:$0xff]  }
 0x1b8   :  { %2876 = vmatprep.subr.bf16.mxu0 %v7097_v38  ;;  %v7196_v38 = vld [vmem:[#allocation3 + $0x884] ss:$24 sps:$4 sm:$0xff]  }
 0x1bb   :  { %2877 = vmatpush1.bf16.msra.mxu0 %v7095_v5  ;;  %v7194_v5 = vld [vmem:[#allocation3 + $0x880] ss:$24 sps:$4 sm:$0xff]  }
 0x1bc   :  { %2878 = vmatprep.subr.bf16.mxu0 %v7100_v34  ;;  %v7208_v34 = vld [vmem:[#allocation3 + $0x8e4] ss:$24 sps:$4 sm:$0xff]  }
 0x1bf   :  { %2879 = vmatpush1.bf16.msra.mxu0 %v7098_v26  ;;  %v7206_v26 = vld [vmem:[#allocation3 + $0x8e0] ss:$24 sps:$4 sm:$0xff]  }
 0x1c0   :  { %2880 = vmatprep.subr.bf16.mxu0 %v7103_v42  ;;  %v7220_v42 = vld [vmem:[#allocation3 + $0x944] ss:$24 sps:$4 sm:$0xff]  }
 0x1c3   :  { %2881 = vmatpush1.bf16.msra.mxu0 %v7101_v43  ;;  %v7218_v43 = vld [vmem:[#allocation3 + $0x940] ss:$24 sps:$4 sm:$0xff]  }
 0x1c4   :  { %2882 = vmatprep.subr.bf16.mxu0 %v7106_v50  ;;  %v3040_v50 = vlaneseq }
 0x1c6   :  { %v8059_v47 = vshrl.u32 %v3040_v50, 7  ;;  %v7289_v50 = vld [vmem:[#allocation7 + $0x424] ss:$24 sps:$4 sm:$0xff]  }
 0x1c7   :  { %2883 = vmatpush1.bf16.msra.mxu0 %v7104_v46  ;;  %v7232_v46 = vld [vmem:[#allocation3 + $0x9a4] ss:$24 sps:$4 sm:$0xff]  }
 0x1c8   :  { %2884 = vmatprep.subr.bf16.mxu0 %v7109_v48  ;;  %v7230_v48 = vld [vmem:[#allocation3 + $0x9a0] ss:$24 sps:$4 sm:$0xff]  }
 0x1cb   :  { %2885 = vmatpush1.bf16.msra.mxu0 %v7107_v51  ;;  %v3050_v51 = vsub.s32 2, %v8059_v47 }
 0x1cc   :  { %2886 = vmatprep.subr.bf16.mxu0 %v7112_v53  ;;  %v7244_v53 = vld [vmem:[#allocation3 + $0xa04] ss:$24 sps:$4 sm:$0xff]  }
 0x1cf   :  { %2887 = vmatpush1.bf16.msra.mxu0 %v7110_v54  ;;  %v3046_v54 = vsub.s32 1, %v8059_v47 }
 0x1d0   :  { %2888 = vmatprep.subr.bf16.mxu0 %v7115_v55  ;;  %v3054_v55 = vsub.s32 3, %v8059_v47 }
 0x1d3   :  { %2889 = vmatpush1.bf16.msra.mxu0 %v7113_v56  ;;  %v3051_v56 = vrot.slane %v8062_v52, %v3050_v51 }
 0x1d4   :  { %2890 = vmatprep.subr.bf16.mxu0 %v7118_v57  ;;  %v7242_v57 = vld [vmem:[#allocation3 + $0xa00] ss:$24 sps:$4 sm:$0xff]  }
 0x1d7   :  { %2891 = vmatpush1.bf16.msra.mxu0 %v7116_v58 }
 0x1d8   :  { %2892 = vmatprep.subr.bf16.mxu0 %v7121_v59  ;;  %v7250_v59 = vld [vmem:[#allocation3 + $0xa34] ss:$24 sps:$4 sm:$0xff]  }
 0x1db   :  { %2893 = vmatpush1.bf16.msra.mxu0 %v7119_v60 }
 0x1dc   :  { %2894 = vmatprep.subr.bf16.mxu0 %v7124_v61 }
 0x1df   :  { %2895 = vmatpush1.bf16.msra.mxu0 %v7122_v62  ;;  %v3047_v62 = vrot.slane %v8062_v52, %v3046_v54 }
 0x1e0   :  { %2896 = vmatprep.subr.bf16.mxu0 %v7127_v63  ;;  %v3055_v63 = vrot.slane %v8062_v52, %v3054_v55 }
 0x1e3   :  { %2897 = vmatpush1.bf16.msra.mxu0 %v7125_v0 }
 0x1e4   :  { %2898 = vmatprep.subr.bf16.mxu0 %v7130_v1 }
 0x1e7   :  { %2899 = vmatpush1.bf16.msra.mxu0 %v7128_v2 }
 0x1e8   :  { %2900 = vmatprep.subr.bf16.mxu0 %v7133_v3 }
 0x1eb   :  { %2901 = vmatpush1.bf16.msra.mxu0 %v7131_v4 }
 0x1ec   :  { %2913 = vmatprep.subr.bf16.mxu0 %v7136_v6  ;;  %v7248_v6 = vld [vmem:[#allocation3 + $0xa30] ss:$24 sps:$4 sm:$0xff]  }
 0x1ee   :  { %2903 = vmatmul.mubr.bf16.vlgmr.msra.gmra.mrb[4].mxu0 %v8004_v11  ;;  %v7149_v11 = vld [vmem:[#allocation3 + $0x700] ss:$24 sps:$4 sm:$0xff]  }
 0x1ef   :  { %2914 = vmatpush1.bf16.msra.mxu0 %v7134_v7  ;;  %2945 = vmatprep.mubr.bf16.mxu0 %v8018_v18  ;;  %v7152_v18 = vld [vmem:[#allocation3 + $0x730] ss:$24 sps:$4 sm:$0xff]  }
 0x1f0   :  { %2915 = vmatprep.subr.bf16.mxu0 %v7139_v8 }
 0x1f3   :  { %2916 = vmatpush1.bf16.msra.mxu0 %v7137_v9 }
 0x1f4   :  { %2917 = vmatprep.subr.bf16.mxu0 %v7142_v10 }
 0x1f7   :  { %2918 = vmatpush1.bf16.msra.mxu0 %v7140_v12 }
 0x1f8   :  { %2919 = vmatprep.subr.bf16.mxu0 %v7145_v13  ;;  %v7256_v13 = vld [vmem:[#allocation3 + $0xa64] ss:$24 sps:$4 sm:$0xff]  }
 0x1fb   :  { %2920 = vmatpush1.bf16.msra.mxu0 %v7143_v14 }
 0x1fc   :  { %2921 = vmatprep.subr.bf16.mxu0 %v7148_v15 }
 0x1ff   :  { %2922 = vmatpush1.bf16.msra.mxu0 %v7146_v19 }
 0x200   :  { %2923 = vmatprep.subr.bf16.mxu0 %v7151_v20 }
 0x203   :  { %2924 = vmatpush1.bf16.msra.mxu0 %v7149_v11 }
 0x204   :  { %2925 = vmatprep.subr.bf16.mxu0 %v7154_v21 }
 0x207   :  { %2926 = vmatpush1.bf16.msra.mxu0 %v7152_v18 }
 0x208   :  { %2927 = vmatprep.subr.bf16.mxu0 %v7160_v22 }
 0x20b   :  { %2928 = vmatpush1.bf16.msra.mxu0 %v7158_v23  ;;  %v7251_v23 = vld [vmem:[#allocation7 + $0x300] ss:$24 sps:$4 sm:$0xff]  }
 0x20c   :  { %2929 = vmatprep.subr.bf16.mxu0 %v7166_v27  ;;  %v7254_v27 = vld [vmem:[#allocation3 + $0xa60] ss:$24 sps:$4 sm:$0xff]  }
 0x20f   :  { %2930 = vmatpush1.bf16.msra.mxu0 %v7164_v28  ;;  %v7259_v28 = vld [vmem:[#allocation7 + $0x334] ss:$24 sps:$4 sm:$0xff]  }
 0x210   :  { %2931 = vmatprep.subr.bf16.mxu0 %v7172_v17  ;;  %v7262_v17 = vld [vmem:[#allocation3 + $0xa94] ss:$24 sps:$4 sm:$0xff]  }
 0x213   :  { %2932 = vmatpush1.bf16.msra.mxu0 %v7170_v29  ;;  %v7257_v29 = vld [vmem:[#allocation7 + $0x330] ss:$24 sps:$4 sm:$0xff]  }
 0x214   :  { %2933 = vmatprep.subr.bf16.mxu0 %v7178_v30  ;;  %v7260_v30 = vld [vmem:[#allocation3 + $0xa90] ss:$24 sps:$4 sm:$0xff]  }
 0x217   :  { %2934 = vmatpush1.bf16.msra.mxu0 %v7176_v31  ;;  %v7265_v31 = vld [vmem:[#allocation7 + $0x364] ss:$24 sps:$4 sm:$0xff]  }
 0x218   :  { %2935 = vmatprep.subr.bf16.mxu0 %v7184_v33  ;;  %v7268_v33 = vld [vmem:[#allocation3 + $0xac4] ss:$24 sps:$4 sm:$0xff]  }
 0x21b   :  { %2936 = vmatpush1.bf16.msra.mxu0 %v7182_v35  ;;  %v7263_v35 = vld [vmem:[#allocation7 + $0x360] ss:$24 sps:$4 sm:$0xff]  }
 0x21c   :  { %2937 = vmatprep.subr.bf16.mxu0 %v7190_v36  ;;  %v7266_v36 = vld [vmem:[#allocation3 + $0xac0] ss:$24 sps:$4 sm:$0xff]  }
 0x21f   :  { %2938 = vmatpush1.bf16.msra.mxu0 %v7188_v37  ;;  %v7271_v37 = vld [vmem:[#allocation7 + $0x394] ss:$24 sps:$4 sm:$0xff]  }
 0x220   :  { %2939 = vmatprep.subr.bf16.mxu0 %v7196_v38  ;;  %v7274_v38 = vld [vmem:[#allocation3 + $0xaf4] ss:$24 sps:$4 sm:$0xff]  }
 0x223   :  { %2940 = vmatpush1.bf16.msra.mxu0 %v7194_v5  ;;  %v7269_v5 = vld [vmem:[#allocation7 + $0x390] ss:$24 sps:$4 sm:$0xff]  }
 0x224   :  { %2941 = vmatprep.subr.bf16.mxu0 %v7202_v39  ;;  %v7272_v39 = vld [vmem:[#allocation3 + $0xaf0] ss:$24 sps:$4 sm:$0xff]  }
 0x227   :  { %2942 = vmatpush1.bf16.msra.mxu0 %v7200_v25  ;;  %v7277_v25 = vld [vmem:[#allocation7 + $0x3c4] ss:$24 sps:$4 sm:$0xff]  }
 0x228   :  { %2943 = vmatprep.subr.bf16.mxu0 %v7208_v34  ;;  %v7280_v34 = vld [vmem:[#allocation3 + $0xb24] ss:$24 sps:$4 sm:$0xff]  }
 0x22b   :  { %2944 = vmatpush1.bf16.msra.mxu0 %v7206_v26  ;;  %v7275_v26 = vld [vmem:[#allocation7 + $0x3c0] ss:$24 sps:$4 sm:$0xff]  }
 0x22c   :  { %2956 = vmatprep.subr.bf16.mxu0 %v7214_v40  ;;  %v7278_v40 = vld [vmem:[#allocation3 + $0xb20] ss:$24 sps:$4 sm:$0xff]  }
 0x22e   :  { %2946 = vmatmul.mubr.bf16.vlgmr.msra.gmra.mrb[4].mxu0 %v8026_v24  ;;  %v7236_v24 = vld [vmem:[#allocation3 + $0x9d0] ss:$24 sps:$4 sm:$0xff]  }
 0x22f   :  { %2957 = vmatpush1.bf16.msra.mxu0 %v7212_v41  ;;  %2988 = vmatprep.mubr.bf16.mxu0 %v8040_v16  ;;  %v3042_v16 = vsub.s32 0, %v8059_v47  ;;  %v7283_v41 = vld [vmem:[#allocation7 + $0x3f4] ss:$24 sps:$4 sm:$0xff]  }
 0x230   :  { %2958 = vmatprep.subr.bf16.mxu0 %v7220_v42  ;;  %v7286_v42 = vld [vmem:[#allocation3 + $0xb54] ss:$24 sps:$4 sm:$0xff]  }
 0x231   :  { %v3043_v58 = vrot.slane %v8062_v52, %v3042_v16 }
 0x233   :  { %2959 = vmatpush1.bf16.msra.mxu0 %v7218_v43  ;;  %v7281_v43 = vld [vmem:[#allocation7 + $0x3f0] ss:$24 sps:$4 sm:$0xff]  }
 0x234   :  { %2960 = vmatprep.subr.bf16.mxu0 %v7226_v44  ;;  %v7284_v44 = vld [vmem:[#allocation3 + $0xb50] ss:$24 sps:$4 sm:$0xff]  }
 0x237   :  { %2961 = vmatpush1.bf16.msra.mxu0 %v7224_v45  ;;  %v7292_v45 = vld [vmem:[#allocation3 + $0xb84] ss:$24 sps:$4 sm:$0xff]  }
 0x238   :  { %2962 = vmatprep.subr.bf16.mxu0 %v7232_v46  ;;  %v7287_v46 = vld [vmem:[#allocation7 + $0x420] ss:$24 sps:$4 sm:$0xff]  }
 0x23b   :  { %2963 = vmatpush1.bf16.msra.mxu0 %v7230_v48  ;;  %v7290_v48 = vld [vmem:[#allocation3 + $0xb80] ss:$24 sps:$4 sm:$0xff]  }
 0x23c   :  { %2964 = vmatprep.subr.bf16.mxu0 %v7238_v49  ;;  %v7295_v49 = vld [vmem:[#allocation7 + $0x454] ss:$24 sps:$4 sm:$0xff]  }
 0x23f   :  { %2965 = vmatpush1.bf16.msra.mxu0 %v7236_v24  ;;  %v7298_v24 = vld [vmem:[#allocation3 + $0xbb4] ss:$24 sps:$4 sm:$0xff]  }
 0x240   :  { %2966 = vmatprep.subr.bf16.mxu0 %v7244_v53  ;;  %v7293_v53 = vld [vmem:[#allocation7 + $0x450] ss:$24 sps:$4 sm:$0xff]  }
 0x241   :  { %v2646_v60 = vpop.f32.mrb[0].mxu0 }
 0x242   :  { %v2818_v61 = vpop.f32.mrb[0].mxu1  ;;  %v2648_v1 = vpop.f32.mrb[1].mxu0  ;;  %v3070_v7 = vadd.f32 %v3043_v58, %v2646_v60  ;;  %v7302_v60 = vld [vmem:[#allocation3 + $0xbe0] ss:$24 sps:$4 sm:$0xff]  }
 0x243   :  { %v3072_v0 = vadd.f32 %v3051_v56, %v2818_v61  ;;  %v2820_v2 = vpop.f32.mrb[1].mxu1  ;;  %v2650_v3 = vpop.f32.mrb[2].mxu0  ;;  %2967 = vmatpush1.bf16.msra.mxu0 %v7242_v57  ;;  %v3071_v14 = vadd.f32 %v3047_v62, %v2648_v1  ;;  %v7301_v57 = vld [vmem:[#allocation7 + $0x484] ss:$24 sps:$4 sm:$0xff]   ;;  %v7307_v61 = vld [vmem:[#allocation7 + $0x4b4] ss:$24 sps:$4 sm:$0xff]  }
 0x244   :  { %v2822_v4 = vpop.f32.mrb[2].mxu1  ;;  %v3076_v8 = vadd.f32 %v3043_v58, %v2650_v3  ;;  %v2652_v10 = vpop.f32.mrb[3].mxu0  ;;  %2968 = vmatprep.subr.bf16.mxu0 %v7250_v59  ;;  %v3073_v15 = vadd.f32 %v3055_v63, %v2820_v2  ;;  %v7304_v58 = vld [vmem:[#allocation3 + $0xbe4] ss:$24 sps:$4 sm:$0xff]  }
 0x245   :  { %v3078_v9 = vadd.f32 %v3051_v56, %v2822_v4  ;;  %v2824_v12 = vpop.f32.mrb[3].mxu1  ;;  %v3077_v19 = vadd.f32 %v3047_v62, %v2652_v10  ;;  %v7296_v56 = vld [vmem:[#allocation3 + $0xbb0] ss:$24 sps:$4 sm:$0xff]  }
 0x246   :  { %v3079_v20 = vadd.f32 %v3055_v63, %v2824_v12  ;;  %v8079_v11 = vpack.c.bf16 %v3076_v8, %v3070_v7  ;;  %v7299_v59 = vld [vmem:[#allocation7 + $0x480] ss:$24 sps:$4 sm:$0xff]   ;;  %v7310_v62 = vld [vmem:[#allocation7 + $0x14] ss:$24 sps:$4 sm:$0xff]   ;;  %v7305_v63 = vld [vmem:[#allocation7 + $0x4b0] ss:$24 sps:$4 sm:$0xff]  }
 0x247   :  { %v8081_v21 = vpack.c.bf16 %v3078_v9, %v3072_v0  ;;  %v8083_v18 = vpack.c.bf16 %v3077_v19, %v3071_v14  ;;  %2969 = vmatpush1.bf16.msra.mxu0 %v7248_v6  ;;  %v7308_v0 = vld [vmem:[#allocation7 + $0x10] ss:$24 sps:$4 sm:$0xff]   ;;  %v7313_v1 = vld [vmem:[#allocation7 + $0x4e4] ss:$24 sps:$4 sm:$0xff]   ;;  %v7311_v3 = vld [vmem:[#allocation7 + $0x4e0] ss:$24 sps:$4 sm:$0xff]  }
 0x248   :  { %v8085_v22 = vpack.c.bf16 %v3079_v20, %v3073_v15  ;;  %2970 = vmatprep.subr.bf16.mxu0 %v7256_v13  ;;  %v7316_v2 = vld [vmem:[#allocation7 + $0x44] ss:$24 sps:$4 sm:$0xff]   ;;  %v7314_v4 = vld [vmem:[#allocation7 + $0x40] ss:$24 sps:$4 sm:$0xff]   ;;  %v7319_v6 = vld [vmem:[#allocation7 + $0x514] ss:$24 sps:$4 sm:$0xff]  }
 0x249   :  { %4880 = vmatprep.mubr.bf16.mxu1 %v8083_v18  ;;  %v7322_v7 = vld [vmem:[#allocation7 + $0x74] ss:$24 sps:$4 sm:$0xff]   ;;  %v7317_v8 = vld [vmem:[#allocation7 + $0x510] ss:$24 sps:$4 sm:$0xff]   ;;  %v7325_v10 = vld [vmem:[#allocation7 + $0x544] ss:$24 sps:$4 sm:$0xff]  }
 0x24a   :  { %4881 = vmatmul.mubr.bf16.vlgmr.msra.gmra.mrb[4].mxu1 %v8079_v11  ;;  %v7320_v9 = vld [vmem:[#allocation7 + $0x70] ss:$24 sps:$4 sm:$0xff]   ;;  %v7328_v12 = vld [vmem:[#allocation7 + $0xa4] ss:$24 sps:$4 sm:$0xff]   ;;  %v7326_v13 = vld [vmem:[#allocation7 + $0xa0] ss:$24 sps:$4 sm:$0xff]  }
 0x24b   :  { %4892 = vmatpush1.bf16.msra.mxu1 %v7251_v23  ;;  %2971 = vmatpush1.bf16.msra.mxu0 %v7254_v27  ;;  %v7331_v14 = vld [vmem:[#allocation7 + $0x574] ss:$24 sps:$4 sm:$0xff]   ;;  %v7329_v19 = vld [vmem:[#allocation7 + $0x570] ss:$24 sps:$4 sm:$0xff]   ;;  %v7337_v23 = vld [vmem:[#allocation7 + $0x5a4] ss:$24 sps:$4 sm:$0xff]  }
 0x24c   :  { %4923 = vmatprep.mubr.bf16.mxu1 %v8085_v22  ;;  %4893 = vmatprep.subr.bf16.mxu1 %v7259_v28  ;;  %v7334_v15 = vld [vmem:[#allocation7 + $0xd4] ss:$24 sps:$4 sm:$0xff]   ;;  %v7332_v20 = vld [vmem:[#allocation7 + $0xd0] ss:$24 sps:$4 sm:$0xff]   ;;  %v7340_v27 = vld [vmem:[#allocation7 + $0x104] ss:$24 sps:$4 sm:$0xff]  }
 0x24d   :  { %2972 = vmatprep.subr.bf16.mxu0 %v7262_v17  ;;  %v7335_v28 = vld [vmem:[#allocation7 + $0x5a0] ss:$24 sps:$4 sm:$0xff]  }
 0x24e   :  { %v7338_v17 = vld [vmem:[#allocation7 + $0x100] ss:$24 sps:$4 sm:$0xff]  }
 0x24f   :  { %4894 = vmatpush1.bf16.msra.mxu1 %v7257_v29  ;;  %2973 = vmatpush1.bf16.msra.mxu0 %v7260_v30  ;;  %v7343_v29 = vld [vmem:[#allocation7 + $0x5d4] ss:$24 sps:$4 sm:$0xff]  }
 0x250   :  { %4895 = vmatprep.subr.bf16.mxu1 %v7265_v31  ;;  %2974 = vmatprep.subr.bf16.mxu0 %v7268_v33  ;;  %v7346_v30 = vld [vmem:[#allocation7 + $0x134] ss:$24 sps:$4 sm:$0xff]   ;;  %v7341_v31 = vld [vmem:[#allocation7 + $0x5d0] ss:$24 sps:$4 sm:$0xff]  }
 0x251   :  { %v7344_v33 = vld [vmem:[#allocation7 + $0x130] ss:$24 sps:$4 sm:$0xff]  }
 0x253   :  { %4896 = vmatpush1.bf16.msra.mxu1 %v7263_v35  ;;  %2975 = vmatpush1.bf16.msra.mxu0 %v7266_v36  ;;  %v7349_v35 = vld [vmem:[#allocation7 + $0x164] ss:$24 sps:$4 sm:$0xff]  }
 0x254   :  { %4897 = vmatprep.subr.bf16.mxu1 %v7271_v37  ;;  %2976 = vmatprep.subr.bf16.mxu0 %v7274_v38  ;;  %v7424_v36 = vld [vmem:[#allocation7 + $0x604] ss:$24 sps:$4 sm:$0xff]   ;;  %v7347_v37 = vld [vmem:[#allocation7 + $0x160] ss:$24 sps:$4 sm:$0xff]  }
 0x255   :  { %v7422_v38 = vld [vmem:[#allocation7 + $0x600] ss:$24 sps:$4 sm:$0xff]  }
 0x257   :  { %4898 = vmatpush1.bf16.msra.mxu1 %v7269_v5  ;;  %2977 = vmatpush1.bf16.msra.mxu0 %v7272_v39  ;;  %v7352_v5 = vld [vmem:[#allocation7 + $0x194] ss:$24 sps:$4 sm:$0xff]  }
 0x258   :  { %4899 = vmatprep.subr.bf16.mxu1 %v7277_v25  ;;  %2978 = vmatprep.subr.bf16.mxu0 %v7280_v34  ;;  %v7430_v39 = vld [vmem:[#allocation7 + $0x634] ss:$24 sps:$4 sm:$0xff]   ;;  %v7350_v25 = vld [vmem:[#allocation7 + $0x190] ss:$24 sps:$4 sm:$0xff]  }
 0x259   :  { %v7428_v34 = vld [vmem:[#allocation7 + $0x630] ss:$24 sps:$4 sm:$0xff]  }
 0x25b   :  { %4900 = vmatpush1.bf16.msra.mxu1 %v7275_v26  ;;  %2979 = vmatpush1.bf16.msra.mxu0 %v7278_v40  ;;  %v7355_v26 = vld [vmem:[#allocation7 + $0x1c4] ss:$24 sps:$4 sm:$0xff]  }
 0x25c   :  { %4901 = vmatprep.subr.bf16.mxu1 %v7283_v41  ;;  %2980 = vmatprep.subr.bf16.mxu0 %v7286_v42  ;;  %v7436_v40 = vld [vmem:[#allocation7 + $0x664] ss:$24 sps:$4 sm:$0xff]   ;;  %v7353_v41 = vld [vmem:[#allocation7 + $0x1c0] ss:$24 sps:$4 sm:$0xff]  }
 0x25d   :  { %v7434_v42 = vld [vmem:[#allocation7 + $0x660] ss:$24 sps:$4 sm:$0xff]  }
 0x25f   :  { %4902 = vmatpush1.bf16.msra.mxu1 %v7281_v43  ;;  %2981 = vmatpush1.bf16.msra.mxu0 %v7284_v44  ;;  %v7358_v43 = vld [vmem:[#allocation7 + $0x1f4] ss:$24 sps:$4 sm:$0xff]  }
 0x260   :  { %4903 = vmatprep.subr.bf16.mxu1 %v7289_v50  ;;  %2982 = vmatprep.subr.bf16.mxu0 %v7292_v45  ;;  %v7442_v44 = vld [vmem:[#allocation7 + $0x694] ss:$24 sps:$4 sm:$0xff]   ;;  %v7356_v50 = vld [vmem:[#allocation7 + $0x1f0] ss:$24 sps:$4 sm:$0xff]  }
 0x261   :  { %v7440_v45 = vld [vmem:[#allocation7 + $0x690] ss:$24 sps:$4 sm:$0xff]  }
 0x263   :  { %4904 = vmatpush1.bf16.msra.mxu1 %v7287_v46  ;;  %2983 = vmatpush1.bf16.msra.mxu0 %v7290_v48  ;;  %v7361_v46 = vld [vmem:[#allocation7 + $0x224] ss:$24 sps:$4 sm:$0xff]  }
 0x264   :  { %4905 = vmatprep.subr.bf16.mxu1 %v7295_v49  ;;  %2984 = vmatprep.subr.bf16.mxu0 %v7298_v24  ;;  %v7448_v48 = vld [vmem:[#allocation7 + $0x6c4] ss:$24 sps:$4 sm:$0xff]   ;;  %v7359_v49 = vld [vmem:[#allocation7 + $0x220] ss:$24 sps:$4 sm:$0xff]  }
 0x265   :  { %v7446_v24 = vld [vmem:[#allocation7 + $0x6c0] ss:$24 sps:$4 sm:$0xff]  }
 0x267   :  { %4906 = vmatpush1.bf16.msra.mxu1 %v7293_v53  ;;  %2985 = vmatpush1.bf16.msra.mxu0 %v7296_v56  ;;  %v7364_v53 = vld [vmem:[#allocation7 + $0x254] ss:$24 sps:$4 sm:$0xff]  }
 0x268   :  { %4907 = vmatprep.subr.bf16.mxu1 %v7301_v57  ;;  %2986 = vmatprep.subr.bf16.mxu0 %v7304_v58  ;;  %v7454_v56 = vld [vmem:[#allocation7 + $0x6f4] ss:$24 sps:$4 sm:$0xff]   ;;  %v7362_v57 = vld [vmem:[#allocation7 + $0x250] ss:$24 sps:$4 sm:$0xff]  }
 0x269   :  { %v7452_v58 = vld [vmem:[#allocation7 + $0x6f0] ss:$24 sps:$4 sm:$0xff]  }
 0x26b   :  { %4908 = vmatpush1.bf16.msra.mxu1 %v7299_v59  ;;  %2987 = vmatpush1.bf16.msra.mxu0 %v7302_v60  ;;  %v7367_v59 = vld [vmem:[#allocation7 + $0x284] ss:$24 sps:$4 sm:$0xff]  }
 0x26c   :  { %4909 = vmatprep.subr.bf16.mxu1 %v7307_v61  ;;  %5106 = vmatprep.subr.bf16.mxu0 %v7310_v62  ;;  %v7460_v60 = vld [vmem:[#allocation7 + $0x724] ss:$24 sps:$4 sm:$0xff]   ;;  %v7365_v61 = vld [vmem:[#allocation7 + $0x280] ss:$24 sps:$4 sm:$0xff]  }
 0x26d   :  { %v7458_v62 = vld [vmem:[#allocation7 + $0x720] ss:$24 sps:$4 sm:$0xff]  }
 0x26e   :  { %2989 = vmatmul.mubr.bf16.vlgmr.msra.gmra.mrb[4].mxu0 %v8048_v32  ;;  %v7323_v32 = vld [vmem:[#allocation7 + $0x540] ss:$24 sps:$4 sm:$0xff]  }
 0x26f   :  { %4910 = vmatpush1.bf16.msra.mxu1 %v7305_v63  ;;  %5107 = vmatpush1.bf16.msra.mxu0 %v7308_v0  ;;  %v7370_v63 = vld [vmem:[#allocation7 + $0x2b4] ss:$24 sps:$4 sm:$0xff]  }
 0x270   :  { %5138 = vmatprep.mubr.bf16.mxu0 %v8083_v18  ;;  %4911 = vmatprep.subr.bf16.mxu1 %v7313_v1  ;;  %v7466_v0 = vld [vmem:[#allocation7 + $0x754] ss:$24 sps:$4 sm:$0xff]   ;;  %v7368_v1 = vld [vmem:[#allocation7 + $0x2b0] ss:$24 sps:$4 sm:$0xff]  }
 0x271   :  { %5108 = vmatprep.subr.bf16.mxu0 %v7316_v2  ;;  %v7464_v2 = vld [vmem:[#allocation7 + $0x750] ss:$24 sps:$4 sm:$0xff]  }
 0x273   :  { %4912 = vmatpush1.bf16.msra.mxu1 %v7311_v3  ;;  %5109 = vmatpush1.bf16.msra.mxu0 %v7314_v4  ;;  %v7373_v3 = vld [vmem:[#allocation7 + $0x2e4] ss:$24 sps:$4 sm:$0xff]  }
 0x274   :  { %4913 = vmatprep.subr.bf16.mxu1 %v7319_v6  ;;  %5110 = vmatprep.subr.bf16.mxu0 %v7322_v7  ;;  %v7472_v4 = vld [vmem:[#allocation7 + $0x784] ss:$24 sps:$4 sm:$0xff]   ;;  %v7371_v6 = vld [vmem:[#allocation7 + $0x2e0] ss:$24 sps:$4 sm:$0xff]  }
 0x275   :  { %v7470_v7 = vld [vmem:[#allocation7 + $0x780] ss:$24 sps:$4 sm:$0xff]  }
 0x277   :  { %4914 = vmatpush1.bf16.msra.mxu1 %v7317_v8  ;;  %5111 = vmatpush1.bf16.msra.mxu0 %v7320_v9  ;;  %v7376_v8 = vld [vmem:[#allocation7 + $0x314] ss:$24 sps:$4 sm:$0xff]  }
 0x278   :  { %4915 = vmatprep.subr.bf16.mxu1 %v7325_v10  ;;  %5112 = vmatprep.subr.bf16.mxu0 %v7328_v12  ;;  %v7478_v9 = vld [vmem:[#allocation7 + $0x7b4] ss:$24 sps:$4 sm:$0xff]   ;;  %v7374_v10 = vld [vmem:[#allocation7 + $0x310] ss:$24 sps:$4 sm:$0xff]   ;;  %v7379_v12 = vld [vmem:[#allocation7 + $0x344] ss:$24 sps:$4 sm:$0xff]  }
 0x27b   :  { %4916 = vmatpush1.bf16.msra.mxu1 %v7323_v32  ;;  %5113 = vmatpush1.bf16.msra.mxu0 %v7326_v13  ;;  %v7476_v32 = vld [vmem:[#allocation7 + $0x7b0] ss:$24 sps:$4 sm:$0xff]   ;;  %v7484_v13 = vld [vmem:[#allocation7 + $0x7e4] ss:$24 sps:$4 sm:$0xff]  }
 0x27c   :  { %4917 = vmatprep.subr.bf16.mxu1 %v7331_v14  ;;  %5114 = vmatprep.subr.bf16.mxu0 %v7334_v15  ;;  %v7377_v14 = vld [vmem:[#allocation7 + $0x340] ss:$24 sps:$4 sm:$0xff]   ;;  %v7382_v15 = vld [vmem:[#allocation7 + $0x374] ss:$24 sps:$4 sm:$0xff]  }
 0x27f   :  { %4918 = vmatpush1.bf16.msra.mxu1 %v7329_v19  ;;  %5115 = vmatpush1.bf16.msra.mxu0 %v7332_v20  ;;  %v7482_v19 = vld [vmem:[#allocation7 + $0x7e0] ss:$24 sps:$4 sm:$0xff]   ;;  %v7490_v20 = vld [vmem:[#allocation7 + $0x814] ss:$24 sps:$4 sm:$0xff]  }
 0x280   :  { %4919 = vmatprep.subr.bf16.mxu1 %v7337_v23  ;;  %5116 = vmatprep.subr.bf16.mxu0 %v7340_v27  ;;  %v7380_v23 = vld [vmem:[#allocation7 + $0x370] ss:$24 sps:$4 sm:$0xff]   ;;  %v7385_v27 = vld [vmem:[#allocation7 + $0x3a4] ss:$24 sps:$4 sm:$0xff]  }
 0x283   :  { %4920 = vmatpush1.bf16.msra.mxu1 %v7335_v28  ;;  %5117 = vmatpush1.bf16.msra.mxu0 %v7338_v17  ;;  %v7488_v28 = vld [vmem:[#allocation7 + $0x810] ss:$24 sps:$4 sm:$0xff]   ;;  %v7496_v17 = vld [vmem:[#allocation7 + $0x844] ss:$24 sps:$4 sm:$0xff]  }
 0x284   :  { %4921 = vmatprep.subr.bf16.mxu1 %v7343_v29  ;;  %5118 = vmatprep.subr.bf16.mxu0 %v7346_v30  ;;  %v7383_v29 = vld [vmem:[#allocation7 + $0x3a0] ss:$24 sps:$4 sm:$0xff]   ;;  %v7388_v30 = vld [vmem:[#allocation7 + $0x3d4] ss:$24 sps:$4 sm:$0xff]  }
 0x287   :  { %4922 = vmatpush1.bf16.msra.mxu1 %v7341_v31  ;;  %5119 = vmatpush1.bf16.msra.mxu0 %v7344_v33  ;;  %v7494_v31 = vld [vmem:[#allocation7 + $0x840] ss:$24 sps:$4 sm:$0xff]   ;;  %v7502_v33 = vld [vmem:[#allocation7 + $0x874] ss:$24 sps:$4 sm:$0xff]  }
 0x288   :  { %5120 = vmatprep.subr.bf16.mxu0 %v7349_v35  ;;  %4934 = vmatprep.subr.bf16.mxu1 %v7424_v36  ;;  %v7386_v35 = vld [vmem:[#allocation7 + $0x3d0] ss:$24 sps:$4 sm:$0xff]   ;;  %v7391_v36 = vld [vmem:[#allocation7 + $0x404] ss:$24 sps:$4 sm:$0xff]  }
 0x28a   :  { %4924 = vmatmul.mubr.bf16.vlgmr.msra.gmra.mrb[4].mxu1 %v8081_v21 }
 0x28b   :  { %5121 = vmatpush1.bf16.msra.mxu0 %v7347_v37  ;;  %4935 = vmatpush1.bf16.msra.mxu1 %v7422_v38  ;;  %v7500_v37 = vld [vmem:[#allocation7 + $0x870] ss:$24 sps:$4 sm:$0xff]   ;;  %v7389_v38 = vld [vmem:[#allocation7 + $0x400] ss:$24 sps:$4 sm:$0xff]  }
 0x28c   :  { %5122 = vmatprep.subr.bf16.mxu0 %v7352_v5  ;;  %4936 = vmatprep.subr.bf16.mxu1 %v7430_v39  ;;  %v7394_v5 = vld [vmem:[#allocation7 + $0x434] ss:$24 sps:$4 sm:$0xff]   ;;  %v7508_v39 = vld [vmem:[#allocation7 + $0x8a4] ss:$24 sps:$4 sm:$0xff]  }
 0x28f   :  { %5123 = vmatpush1.bf16.msra.mxu0 %v7350_v25  ;;  %4937 = vmatpush1.bf16.msra.mxu1 %v7428_v34  ;;  %v7506_v25 = vld [vmem:[#allocation7 + $0x8a0] ss:$24 sps:$4 sm:$0xff]   ;;  %v7392_v34 = vld [vmem:[#allocation7 + $0x430] ss:$24 sps:$4 sm:$0xff]  }
 0x290   :  { %5124 = vmatprep.subr.bf16.mxu0 %v7355_v26  ;;  %4938 = vmatprep.subr.bf16.mxu1 %v7436_v40  ;;  %v7397_v26 = vld [vmem:[#allocation7 + $0x464] ss:$24 sps:$4 sm:$0xff]   ;;  %v7514_v40 = vld [vmem:[#allocation7 + $0x8d4] ss:$24 sps:$4 sm:$0xff]  }
 0x293   :  { %5125 = vmatpush1.bf16.msra.mxu0 %v7353_v41  ;;  %4939 = vmatpush1.bf16.msra.mxu1 %v7434_v42  ;;  %v7512_v41 = vld [vmem:[#allocation7 + $0x8d0] ss:$24 sps:$4 sm:$0xff]   ;;  %v7395_v42 = vld [vmem:[#allocation7 + $0x460] ss:$24 sps:$4 sm:$0xff]  }
 0x294   :  { %5126 = vmatprep.subr.bf16.mxu0 %v7358_v43  ;;  %4940 = vmatprep.subr.bf16.mxu1 %v7442_v44  ;;  %v7400_v43 = vld [vmem:[#allocation7 + $0x494] ss:$24 sps:$4 sm:$0xff]  }
 0x295   :  { %v7520_v44 = vld [vmem:[#allocation7 + $0xc] ss:$24 sps:$4 sm:$0xff]  }
 0x297   :  { %5127 = vmatpush1.bf16.msra.mxu0 %v7356_v50  ;;  %4941 = vmatpush1.bf16.msra.mxu1 %v7440_v45  ;;  %v7398_v50 = vld [vmem:[#allocation7 + $0x490] ss:$24 sps:$4 sm:$0xff]   ;;  %v7403_v45 = vld [vmem:[#allocation7 + $0x4c4] ss:$24 sps:$4 sm:$0xff]  }
 0x298   :  { %5128 = vmatprep.subr.bf16.mxu0 %v7361_v46  ;;  %4942 = vmatprep.subr.bf16.mxu1 %v7448_v48  ;;  %v7401_v46 = vld [vmem:[#allocation7 + $0x4c0] ss:$24 sps:$4 sm:$0xff]   ;;  %v7406_v48 = vld [vmem:[#allocation7 + $0x4f4] ss:$24 sps:$4 sm:$0xff]  }
 0x29b   :  { %5129 = vmatpush1.bf16.msra.mxu0 %v7359_v49  ;;  %4943 = vmatpush1.bf16.msra.mxu1 %v7446_v24  ;;  %v7404_v49 = vld [vmem:[#allocation7 + $0x4f0] ss:$24 sps:$4 sm:$0xff]   ;;  %v7409_v24 = vld [vmem:[#allocation7 + $0x524] ss:$24 sps:$4 sm:$0xff]  }
 0x29c   :  { %5130 = vmatprep.subr.bf16.mxu0 %v7364_v53  ;;  %4944 = vmatprep.subr.bf16.mxu1 %v7454_v56  ;;  %v7407_v53 = vld [vmem:[#allocation7 + $0x520] ss:$24 sps:$4 sm:$0xff]   ;;  %v7412_v56 = vld [vmem:[#allocation7 + $0x554] ss:$24 sps:$4 sm:$0xff]  }
 0x29f   :  { %5131 = vmatpush1.bf16.msra.mxu0 %v7362_v57  ;;  %4945 = vmatpush1.bf16.msra.mxu1 %v7452_v58  ;;  %v7410_v57 = vld [vmem:[#allocation7 + $0x550] ss:$24 sps:$4 sm:$0xff]   ;;  %v7415_v58 = vld [vmem:[#allocation7 + $0x584] ss:$24 sps:$4 sm:$0xff]  }
 0x2a0   :  { %5132 = vmatprep.subr.bf16.mxu0 %v7367_v59  ;;  %4946 = vmatprep.subr.bf16.mxu1 %v7460_v60  ;;  %v7413_v59 = vld [vmem:[#allocation7 + $0x580] ss:$24 sps:$4 sm:$0xff]   ;;  %v7418_v60 = vld [vmem:[#allocation7 + $0x5b4] ss:$24 sps:$4 sm:$0xff]  }
 0x2a3   :  { %5133 = vmatpush1.bf16.msra.mxu0 %v7365_v61  ;;  %4947 = vmatpush1.bf16.msra.mxu1 %v7458_v62  ;;  %v7416_v61 = vld [vmem:[#allocation7 + $0x5b0] ss:$24 sps:$4 sm:$0xff]   ;;  %v7421_v62 = vld [vmem:[#allocation7 + $0x5e4] ss:$24 sps:$4 sm:$0xff]  }
 0x2a4   :  { %5134 = vmatprep.subr.bf16.mxu0 %v7370_v63  ;;  %4948 = vmatprep.subr.bf16.mxu1 %v7466_v0  ;;  %v7419_v63 = vld [vmem:[#allocation7 + $0x5e0] ss:$24 sps:$4 sm:$0xff]   ;;  %v7427_v0 = vld [vmem:[#allocation7 + $0x614] ss:$24 sps:$4 sm:$0xff]  }
 0x2a7   :  { %5135 = vmatpush1.bf16.msra.mxu0 %v7368_v1  ;;  %4949 = vmatpush1.bf16.msra.mxu1 %v7464_v2  ;;  %v7425_v1 = vld [vmem:[#allocation7 + $0x610] ss:$24 sps:$4 sm:$0xff]   ;;  %v7433_v2 = vld [vmem:[#allocation7 + $0x644] ss:$24 sps:$4 sm:$0xff]  }
 0x2a8   :  { %5136 = vmatprep.subr.bf16.mxu0 %v7373_v3  ;;  %4950 = vmatprep.subr.bf16.mxu1 %v7472_v4  ;;  %v7431_v3 = vld [vmem:[#allocation7 + $0x640] ss:$24 sps:$4 sm:$0xff]   ;;  %v7439_v4 = vld [vmem:[#allocation7 + $0x674] ss:$24 sps:$4 sm:$0xff]  }
 0x2ab   :  { %5137 = vmatpush1.bf16.msra.mxu0 %v7371_v6  ;;  %4951 = vmatpush1.bf16.msra.mxu1 %v7470_v7  ;;  %v7437_v6 = vld [vmem:[#allocation7 + $0x670] ss:$24 sps:$4 sm:$0xff]   ;;  %v7445_v7 = vld [vmem:[#allocation7 + $0x6a4] ss:$24 sps:$4 sm:$0xff]  }
 0x2ac   :  { %5149 = vmatprep.subr.bf16.mxu0 %v7376_v8  ;;  %4952 = vmatprep.subr.bf16.mxu1 %v7478_v9  ;;  %v7443_v8 = vld [vmem:[#allocation7 + $0x6a0] ss:$24 sps:$4 sm:$0xff]   ;;  %v7451_v9 = vld [vmem:[#allocation7 + $0x6d4] ss:$24 sps:$4 sm:$0xff]  }
 0x2ae   :  { %5139 = vmatmul.mubr.bf16.vlgmr.msra.gmra.mrb[8].mxu0 %v8079_v11 }
 0x2af   :  { %5150 = vmatpush1.bf16.msra.mxu0 %v7374_v10  ;;  %5181 = vmatprep.mubr.bf16.mxu0 %v8085_v22  ;;  %v7449_v10 = vld [vmem:[#allocation7 + $0x6d0] ss:$24 sps:$4 sm:$0xff]  }
 0x2b0   :  { %5151 = vmatprep.subr.bf16.mxu0 %v7379_v12  ;;  %4953 = vmatpush1.bf16.msra.mxu1 %v7476_v32  ;;  %v7457_v12 = vld [vmem:[#allocation7 + $0x704] ss:$24 sps:$4 sm:$0xff]   ;;  %v7455_v32 = vld [vmem:[#allocation7 + $0x700] ss:$24 sps:$4 sm:$0xff]  }
 0x2b1   :  { %4954 = vmatprep.subr.bf16.mxu1 %v7484_v13  ;;  %v7463_v13 = vld [vmem:[#allocation7 + $0x734] ss:$24 sps:$4 sm:$0xff]  }
 0x2b3   :  { %5152 = vmatpush1.bf16.msra.mxu0 %v7377_v14  ;;  %v7461_v14 = vld [vmem:[#allocation7 + $0x730] ss:$24 sps:$4 sm:$0xff]  }
 0x2b4   :  { %5153 = vmatprep.subr.bf16.mxu0 %v7382_v15  ;;  %4955 = vmatpush1.bf16.msra.mxu1 %v7482_v19  ;;  %v7469_v15 = vld [vmem:[#allocation7 + $0x764] ss:$24 sps:$4 sm:$0xff]   ;;  %v7467_v19 = vld [vmem:[#allocation7 + $0x760] ss:$24 sps:$4 sm:$0xff]  }
 0x2b5   :  { %4956 = vmatprep.subr.bf16.mxu1 %v7490_v20  ;;  %v7475_v20 = vld [vmem:[#allocation7 + $0x794] ss:$24 sps:$4 sm:$0xff]  }
 0x2b7   :  { %5154 = vmatpush1.bf16.msra.mxu0 %v7380_v23  ;;  %v7473_v23 = vld [vmem:[#allocation7 + $0x790] ss:$24 sps:$4 sm:$0xff]  }
 0x2b8   :  { %5155 = vmatprep.subr.bf16.mxu0 %v7385_v27  ;;  %4957 = vmatpush1.bf16.msra.mxu1 %v7488_v28  ;;  %v7481_v27 = vld [vmem:[#allocation7 + $0x7c4] ss:$24 sps:$4 sm:$0xff]   ;;  %v7479_v28 = vld [vmem:[#allocation7 + $0x7c0] ss:$24 sps:$4 sm:$0xff]  }
 0x2b9   :  { %4958 = vmatprep.subr.bf16.mxu1 %v7496_v17  ;;  %v7487_v17 = vld [vmem:[#allocation7 + $0x7f4] ss:$24 sps:$4 sm:$0xff]  }
 0x2bb   :  { %5156 = vmatpush1.bf16.msra.mxu0 %v7383_v29  ;;  %v7485_v29 = vld [vmem:[#allocation7 + $0x7f0] ss:$24 sps:$4 sm:$0xff]  }
 0x2bc   :  { %5157 = vmatprep.subr.bf16.mxu0 %v7388_v30  ;;  %4959 = vmatpush1.bf16.msra.mxu1 %v7494_v31  ;;  %v7493_v30 = vld [vmem:[#allocation7 + $0x824] ss:$24 sps:$4 sm:$0xff]   ;;  %v7491_v31 = vld [vmem:[#allocation7 + $0x820] ss:$24 sps:$4 sm:$0xff]  }
 0x2bd   :  { %4960 = vmatprep.subr.bf16.mxu1 %v7502_v33  ;;  %v7499_v33 = vld [vmem:[#allocation7 + $0x854] ss:$24 sps:$4 sm:$0xff]  }
 0x2bf   :  { %5158 = vmatpush1.bf16.msra.mxu0 %v7386_v35  ;;  %v7497_v35 = vld [vmem:[#allocation7 + $0x850] ss:$24 sps:$4 sm:$0xff]  }
 0x2c0   :  { %5159 = vmatprep.subr.bf16.mxu0 %v7391_v36  ;;  %4961 = vmatpush1.bf16.msra.mxu1 %v7500_v37  ;;  %v7505_v36 = vld [vmem:[#allocation7 + $0x884] ss:$24 sps:$4 sm:$0xff]   ;;  %v7503_v37 = vld [vmem:[#allocation7 + $0x880] ss:$24 sps:$4 sm:$0xff]  }
 0x2c1   :  { %4962 = vmatprep.subr.bf16.mxu1 %v7508_v39  ;;  %v7517_v39 = vld [vmem:[#allocation7 + $0x8e4] ss:$24 sps:$4 sm:$0xff]  }
 0x2c3   :  { %5160 = vmatpush1.bf16.msra.mxu0 %v7389_v38  ;;  %v7511_v38 = vld [vmem:[#allocation7 + $0x8b4] ss:$24 sps:$4 sm:$0xff]  }
 0x2c4   :  { %5161 = vmatprep.subr.bf16.mxu0 %v7394_v5  ;;  %4963 = vmatpush1.bf16.msra.mxu1 %v7506_v25  ;;  %v7509_v5 = vld [vmem:[#allocation7 + $0x8b0] ss:$24 sps:$4 sm:$0xff]   ;;  %v7515_v25 = vld [vmem:[#allocation7 + $0x8e0] ss:$24 sps:$4 sm:$0xff]  }
 0x2c5   :  { %4964 = vmatprep.subr.bf16.mxu1 %v7514_v40 }
 0x2c7   :  { %5162 = vmatpush1.bf16.msra.mxu0 %v7392_v34  ;;  %v3058_v34 = vsub.s32 4, %v8059_v47 }
 0x2c8   :  { %5163 = vmatprep.subr.bf16.mxu0 %v7397_v26  ;;  %4965 = vmatpush1.bf16.msra.mxu1 %v7512_v41  ;;  %v3062_v26 = vsub.s32 5, %v8059_v47 }
 0x2c9   :  { %4977 = vmatprep.subr.bf16.mxu1 %v7520_v44  ;;  %v3059_v40 = vrot.slane %v8062_v52, %v3058_v34 }
 0x2cb   :  { %5164 = vmatpush1.bf16.msra.mxu0 %v7395_v42  ;;  %v3063_v42 = vrot.slane %v8062_v52, %v3062_v26  ;;  %v7521_v52 = vld [vmem:[#allocation7 + $0x38] ss:$24 sps:$4 sm:$0xff]  }
 0x2cc   :  { %5165 = vmatprep.subr.bf16.mxu0 %v7400_v43 }
 0x2cf   :  { %5166 = vmatpush1.bf16.msra.mxu0 %v7398_v50 }
 0x2d0   :  { %5167 = vmatprep.subr.bf16.mxu0 %v7403_v45 }
 0x2d3   :  { %5168 = vmatpush1.bf16.msra.mxu0 %v7401_v46 }
 0x2d4   :  { %5169 = vmatprep.subr.bf16.mxu0 %v7406_v48 }
 0x2d7   :  { %5170 = vmatpush1.bf16.msra.mxu0 %v7404_v49 }
 0x2d8   :  { %5171 = vmatprep.subr.bf16.mxu0 %v7409_v24 }
 0x2db   :  { %5172 = vmatpush1.bf16.msra.mxu0 %v7407_v53 }
 0x2dc   :  { %5173 = vmatprep.subr.bf16.mxu0 %v7412_v56  ;;  %v7518_v56 = vld [vmem:[#allocation7 + $0x8] ss:$24 sps:$4 sm:$0xff]  }
 0x2df   :  { %5174 = vmatpush1.bf16.msra.mxu0 %v7410_v57  ;;  %v7523_v57 = vld [vmem:[#allocation7 + $0x3c] ss:$24 sps:$4 sm:$0xff]  }
 0x2e0   :  { %5175 = vmatprep.subr.bf16.mxu0 %v7415_v58  ;;  %v7526_v58 = vld [vmem:[#allocation7 + $0x6c] ss:$24 sps:$4 sm:$0xff]  }
 0x2e3   :  { %5176 = vmatpush1.bf16.msra.mxu0 %v7413_v59  ;;  %v7524_v59 = vld [vmem:[#allocation7 + $0x68] ss:$24 sps:$4 sm:$0xff]  }
 0x2e4   :  { %5177 = vmatprep.subr.bf16.mxu0 %v7418_v60  ;;  %v7529_v60 = vld [vmem:[#allocation7 + $0x9c] ss:$24 sps:$4 sm:$0xff]  }
 0x2e7   :  { %5178 = vmatpush1.bf16.msra.mxu0 %v7416_v61  ;;  %v7527_v61 = vld [vmem:[#allocation7 + $0x98] ss:$24 sps:$4 sm:$0xff]  }
 0x2e8   :  { %5179 = vmatprep.subr.bf16.mxu0 %v7421_v62  ;;  %v7532_v62 = vld [vmem:[#allocation7 + $0xcc] ss:$24 sps:$4 sm:$0xff]  }
 0x2eb   :  { %5180 = vmatpush1.bf16.msra.mxu0 %v7419_v63  ;;  %v7530_v63 = vld [vmem:[#allocation7 + $0xc8] ss:$24 sps:$4 sm:$0xff]  }
 0x2ec   :  { %5192 = vmatprep.subr.bf16.mxu0 %v7427_v0  ;;  %v7535_v0 = vld [vmem:[#allocation7 + $0xfc] ss:$24 sps:$4 sm:$0xff]  }
 0x2ee   :  { %5182 = vmatmul.mubr.bf16.vlgmr.msra.gmra.mrb[8].mxu0 %v8081_v21 }
 0x2ef   :  { %5193 = vmatpush1.bf16.msra.mxu0 %v7425_v1  ;;  %v7533_v1 = vld [vmem:[#allocation7 + $0xf8] ss:$24 sps:$4 sm:$0xff]  }
 0x2f0   :  { %5194 = vmatprep.subr.bf16.mxu0 %v7433_v2  ;;  %v7538_v2 = vld [vmem:[#allocation7 + $0x12c] ss:$24 sps:$4 sm:$0xff]  }
 0x2f3   :  { %5195 = vmatpush1.bf16.msra.mxu0 %v7431_v3  ;;  %v7541_v3 = vld [vmem:[#allocation7 + $0x15c] ss:$24 sps:$4 sm:$0xff]  }
 0x2f4   :  { %5196 = vmatprep.subr.bf16.mxu0 %v7439_v4  ;;  %v7539_v4 = vld [vmem:[#allocation7 + $0x158] ss:$24 sps:$4 sm:$0xff]  }
 0x2f7   :  { %5197 = vmatpush1.bf16.msra.mxu0 %v7437_v6  ;;  %v7544_v6 = vld [vmem:[#allocation7 + $0x18c] ss:$24 sps:$4 sm:$0xff]  }
 0x2f8   :  { %5198 = vmatprep.subr.bf16.mxu0 %v7445_v7  ;;  %v7542_v7 = vld [vmem:[#allocation7 + $0x188] ss:$24 sps:$4 sm:$0xff]  }
 0x2fb   :  { %5199 = vmatpush1.bf16.msra.mxu0 %v7443_v8  ;;  %v7547_v8 = vld [vmem:[#allocation7 + $0x1bc] ss:$24 sps:$4 sm:$0xff]  }
 0x2fc   :  { %5200 = vmatprep.subr.bf16.mxu0 %v7451_v9  ;;  %v7545_v9 = vld [vmem:[#allocation7 + $0x1b8] ss:$24 sps:$4 sm:$0xff]  }
 0x2ff   :  { %5201 = vmatpush1.bf16.msra.mxu0 %v7449_v10  ;;  %v7550_v10 = vld [vmem:[#allocation7 + $0x1ec] ss:$24 sps:$4 sm:$0xff]  }
 0x300   :  { %5202 = vmatprep.subr.bf16.mxu0 %v7457_v12  ;;  %v7548_v12 = vld [vmem:[#allocation7 + $0x1e8] ss:$24 sps:$4 sm:$0xff]  }
 0x303   :  { %5203 = vmatpush1.bf16.msra.mxu0 %v7455_v32  ;;  %v7553_v32 = vld [vmem:[#allocation7 + $0x21c] ss:$24 sps:$4 sm:$0xff]  }
 0x304   :  { %5204 = vmatprep.subr.bf16.mxu0 %v7463_v13  ;;  %v7551_v13 = vld [vmem:[#allocation7 + $0x218] ss:$24 sps:$4 sm:$0xff]  }
 0x307   :  { %5205 = vmatpush1.bf16.msra.mxu0 %v7461_v14  ;;  %v7556_v14 = vld [vmem:[#allocation7 + $0x24c] ss:$24 sps:$4 sm:$0xff]  }
 0x308   :  { %5206 = vmatprep.subr.bf16.mxu0 %v7469_v15  ;;  %v7554_v15 = vld [vmem:[#allocation7 + $0x248] ss:$24 sps:$4 sm:$0xff]  }
 0x30b   :  { %5207 = vmatpush1.bf16.msra.mxu0 %v7467_v19  ;;  %v7559_v19 = vld [vmem:[#allocation7 + $0x27c] ss:$24 sps:$4 sm:$0xff]  }
 0x30c   :  { %5208 = vmatprep.subr.bf16.mxu0 %v7475_v20  ;;  %v7557_v20 = vld [vmem:[#allocation7 + $0x278] ss:$24 sps:$4 sm:$0xff]  }
 0x30f   :  { %5209 = vmatpush1.bf16.msra.mxu0 %v7473_v23  ;;  %v7562_v23 = vld [vmem:[#allocation7 + $0x2ac] ss:$24 sps:$4 sm:$0xff]  }
 0x310   :  { %5210 = vmatprep.subr.bf16.mxu0 %v7481_v27  ;;  %v7560_v27 = vld [vmem:[#allocation7 + $0x2a8] ss:$24 sps:$4 sm:$0xff]  }
 0x313   :  { %5211 = vmatpush1.bf16.msra.mxu0 %v7479_v28  ;;  %v7565_v28 = vld [vmem:[#allocation7 + $0x2dc] ss:$24 sps:$4 sm:$0xff]  }
 0x314   :  { %5212 = vmatprep.subr.bf16.mxu0 %v7487_v17  ;;  %v7563_v17 = vld [vmem:[#allocation7 + $0x2d8] ss:$24 sps:$4 sm:$0xff]  }
 0x317   :  { %5213 = vmatpush1.bf16.msra.mxu0 %v7485_v29  ;;  %v7568_v29 = vld [vmem:[#allocation7 + $0x30c] ss:$24 sps:$4 sm:$0xff]  }
 0x318   :  { %5214 = vmatprep.subr.bf16.mxu0 %v7493_v30  ;;  %v7566_v30 = vld [vmem:[#allocation7 + $0x308] ss:$24 sps:$4 sm:$0xff]  }
 0x31b   :  { %5215 = vmatpush1.bf16.msra.mxu0 %v7491_v31  ;;  %v7662_v31 = vld [vmem:[#allocation10 + $0x140] sm:$0xff]  }
 0x31c   :  { %5216 = vmatprep.subr.bf16.mxu0 %v7499_v33  ;;  %v7571_v33 = vld [vmem:[#allocation7 + $0x33c] ss:$24 sps:$4 sm:$0xff]  }
 0x31f   :  { %5217 = vmatpush1.bf16.msra.mxu0 %v7497_v35  ;;  %v7664_v35 = vld [vmem:[#allocation10 + $0x100] sm:$0xff]  }
 0x320   :  { %5218 = vmatprep.subr.bf16.mxu0 %v7505_v36  ;;  %v7569_v36 = vld [vmem:[#allocation7 + $0x338] ss:$24 sps:$4 sm:$0xff]  }
 0x323   :  { %5219 = vmatpush1.bf16.msra.mxu0 %v7503_v37  ;;  %v7666_v37 = vld [vmem:[#allocation10 + $0x148] sm:$0xff]  }
 0x324   :  { %5220 = vmatprep.subr.bf16.mxu0 %v7511_v38  ;;  %v7574_v38 = vld [vmem:[#allocation7 + $0x36c] ss:$24 sps:$4 sm:$0xff]  }
 0x327   :  { %5221 = vmatpush1.bf16.msra.mxu0 %v7509_v5  ;;  %v7668_v5 = vld [vmem:[#allocation10 + $0x108] sm:$0xff]  }
 0x328   :  { %5222 = vmatprep.subr.bf16.mxu0 %v7517_v39  ;;  %v7572_v39 = vld [vmem:[#allocation7 + $0x368] ss:$24 sps:$4 sm:$0xff]  }
 0x32b   :  { %5223 = vmatpush1.bf16.msra.mxu0 %v7515_v25  ;;  %v7670_v25 = vld [vmem:[#allocation10 + $0x150] sm:$0xff]  }
 0x32c   :  { %6550 = vmatprep.subr.bf16.mxu0 %v7662_v31  ;;  %v7628_v31 = vld [vmem:[#allocation7 + $0x6cc] ss:$24 sps:$4 sm:$0xff]  }
 0x341   :  { %v2990_v41 = vpop.f32.mrb[4].mxu0 }
 0x342   :  { %v2992_v43 = vpop.f32.mrb[5].mxu0  ;;  %v3074_v50 = vadd.f32 %v3059_v40, %v2990_v41  ;;  %v7672_v41 = vld [vmem:[#allocation10 + $0x110] sm:$0xff]  }
 0x343   :  { %v2994_v44 = vpop.f32.mrb[6].mxu0  ;;  %v3075_v48 = vadd.f32 %v3063_v42, %v2992_v43  ;;  %v7676_v43 = vld [vmem:[#allocation10 + $0x118] sm:$0xff]  }
 0x344   :  { %v3080_v45 = vadd.f32 %v3059_v40, %v2994_v44  ;;  %v2996_v46 = vpop.f32.mrb[7].mxu0  ;;  %v7577_v40 = vld [vmem:[#allocation7 + $0x39c] ss:$24 sps:$4 sm:$0xff]   ;;  %v7578_v44 = vld [vmem:[#allocation7 + $0x3c8] ss:$24 sps:$4 sm:$0xff]  }
 0x345   :  { %v3081_v49 = vadd.f32 %v3063_v42, %v2996_v46  ;;  %v7674_v42 = vld [vmem:[#allocation10 + $0x158] sm:$0xff]   ;;  %v7680_v46 = vld [vmem:[#allocation10 + $0x120] sm:$0xff]  }
 0x346   :  { %v8104_v24 = vpack.c.bf16 %v3080_v45, %v3074_v50  ;;  %v7678_v50 = vld [vmem:[#allocation10 + $0x160] sm:$0xff]   ;;  %v7583_v45 = vld [vmem:[#allocation7 + $0x3fc] ss:$24 sps:$4 sm:$0xff]  }
 0x347   :  { %v8106_v53 = vpack.c.bf16 %v3081_v49, %v3075_v48  ;;  %v7581_v48 = vld [vmem:[#allocation7 + $0x3f8] ss:$24 sps:$4 sm:$0xff]  }
 0x348   :  { %v7682_v49 = vld [vmem:[#allocation10 + $0x168] sm:$0xff]  }
 0x349   :  { %4966 = vmatprep.mubr.bf16.mxu1 %v8106_v53  ;;  %5224 = vmatprep.mubr.bf16.mxu0 %v8106_v53 }
 0x34a   :  { %4967 = vmatmul.mubr.bf16.vlgmr.msra.gmra.mrb[4].mxu1 %v8104_v24  ;;  %5225 = vmatmul.mubr.bf16.vlgmr.msra.gmra.mrb[8].mxu0 %v8104_v24 }
 0x34b   :  { %4978 = vmatpush1.bf16.msra.mxu1 %v7518_v56  ;;  %5009 = vmatprep.mubr.bf16.mxu1 %v8083_v18  ;;  %v7536_v18 = vld [vmem:[#allocation7 + $0x128] ss:$24 sps:$4 sm:$0xff]   ;;  %v7586_v56 = vld [vmem:[#allocation7 + $0x42c] ss:$24 sps:$4 sm:$0xff]  }
 0x34c   :  { %4979 = vmatprep.subr.bf16.mxu1 %v7523_v57  ;;  %6551 = vmatpush3.bf16.msra.mxu0 %v7664_v35  ;;  %v7684_v57 = vld [vmem:[#allocation10 + $0x128] sm:$0xff]  }
 0x34d   :  { %6552 = vmatprep.subr.bf16.mxu0 %v7666_v37  ;;  %v7631_v35 = vld [vmem:[#allocation7 + $0x6fc] ss:$24 sps:$4 sm:$0xff]  }
 0x34e   :  { %v7637_v37 = vld [vmem:[#allocation7 + $0x75c] ss:$24 sps:$4 sm:$0xff]  }
 0x34f   :  { %4980 = vmatpush1.bf16.msra.mxu1 %v7521_v52  ;;  %v7584_v52 = vld [vmem:[#allocation7 + $0x428] ss:$24 sps:$4 sm:$0xff]  }
 0x350   :  { %4981 = vmatprep.subr.bf16.mxu1 %v7526_v58  ;;  %6553 = vmatpush3.bf16.msra.mxu0 %v7668_v5  ;;  %v7686_v58 = vld [vmem:[#allocation10 + $0x170] sm:$0xff]   ;;  %v7640_v5 = vld [vmem:[#allocation7 + $0x78c] ss:$24 sps:$4 sm:$0xff]  }
 0x351   :  { %6554 = vmatprep.subr.bf16.mxu0 %v7670_v25  ;;  %v7643_v25 = vld [vmem:[#allocation7 + $0x7bc] ss:$24 sps:$4 sm:$0xff]  }
 0x353   :  { %4982 = vmatpush1.bf16.msra.mxu1 %v7524_v59  ;;  %v7589_v59 = vld [vmem:[#allocation7 + $0x45c] ss:$24 sps:$4 sm:$0xff]  }
 0x354   :  { %4983 = vmatprep.subr.bf16.mxu1 %v7529_v60  ;;  %6555 = vmatpush3.bf16.msra.mxu0 %v7672_v41  ;;  %v7688_v60 = vld [vmem:[#allocation10 + $0x130] sm:$0xff]   ;;  %v7646_v41 = vld [vmem:[#allocation7 + $0x7ec] ss:$24 sps:$4 sm:$0xff]  }
 0x355   :  { %6556 = vmatprep.subr.bf16.mxu0 %v7674_v42  ;;  %v7649_v42 = vld [vmem:[#allocation7 + $0x81c] ss:$24 sps:$4 sm:$0xff]  }
 0x357   :  { %4984 = vmatpush1.bf16.msra.mxu1 %v7527_v61  ;;  %v7587_v61 = vld [vmem:[#allocation7 + $0x458] ss:$24 sps:$4 sm:$0xff]  }
 0x358   :  { %4985 = vmatprep.subr.bf16.mxu1 %v7532_v62  ;;  %6557 = vmatpush3.bf16.msra.mxu0 %v7676_v43  ;;  %v7690_v62 = vld [vmem:[#allocation10 + $0x178] sm:$0xff]  }
 0x359   :  { %6558 = vmatprep.subr.bf16.mxu0 %v7678_v50  ;;  %v7652_v43 = vld [vmem:[#allocation7 + $0x84c] ss:$24 sps:$4 sm:$0xff]   ;;  %v7655_v50 = vld [vmem:[#allocation7 + $0x87c] ss:$24 sps:$4 sm:$0xff]  }
 0x35b   :  { %4986 = vmatpush1.bf16.msra.mxu1 %v7530_v63  ;;  %v7592_v63 = vld [vmem:[#allocation7 + $0x48c] ss:$24 sps:$4 sm:$0xff]  }
 0x35c   :  { %4987 = vmatprep.subr.bf16.mxu1 %v7535_v0  ;;  %6559 = vmatpush3.bf16.msra.mxu0 %v7680_v46  ;;  %v7692_v0 = vld [vmem:[#allocation10 + $0x138] sm:$0xff]  }
 0x35d   :  { %6560 = vmatprep.subr.bf16.mxu0 %v7682_v49  ;;  %v7658_v46 = vld [vmem:[#allocation7 + $0x8ac] ss:$24 sps:$4 sm:$0xff]   ;;  %v7661_v49 = vld [vmem:[#allocation7 + $0x8dc] ss:$24 sps:$4 sm:$0xff]  }
 0x35f   :  { %4988 = vmatpush1.bf16.msra.mxu1 %v7533_v1  ;;  %v7590_v1 = vld [vmem:[#allocation7 + $0x488] ss:$24 sps:$4 sm:$0xff]  }
 0x360   :  { %4989 = vmatprep.subr.bf16.mxu1 %v7538_v2  ;;  %6561 = vmatpush3.bf16.msra.mxu0 %v7684_v57  ;;  %v7595_v2 = vld [vmem:[#allocation7 + $0x4bc] ss:$24 sps:$4 sm:$0xff]   ;;  %v7663_v57 = vld [vmem:[#allocation10 + $0x40] sm:$0xff]  }
 0x361   :  { %6562 = vmatprep.subr.bf16.mxu0 %v7686_v58  ;;  %v7667_v58 = vld [vmem:[#allocation10 + $0x48] sm:$0xff]  }
 0x363   :  { %4990 = vmatpush1.bf16.msra.mxu1 %v7536_v18  ;;  %v7593_v18 = vld [vmem:[#allocation7 + $0x4b8] ss:$24 sps:$4 sm:$0xff]  }
 0x364   :  { %4991 = vmatprep.subr.bf16.mxu1 %v7541_v3  ;;  %6563 = vmatpush3.bf16.msra.mxu0 %v7688_v60  ;;  %v7598_v3 = vld [vmem:[#allocation7 + $0x4ec] ss:$24 sps:$4 sm:$0xff]   ;;  %v7671_v60 = vld [vmem:[#allocation10 + $0x50] sm:$0xff]  }
 0x365   :  { %6564 = vmatprep.subr.bf16.mxu0 %v7690_v62  ;;  %v7675_v62 = vld [vmem:[#allocation10 + $0x58] sm:$0xff]  }
 0x367   :  { %4992 = vmatpush1.bf16.msra.mxu1 %v7539_v4  ;;  %v7596_v4 = vld [vmem:[#allocation7 + $0x4e8] ss:$24 sps:$4 sm:$0xff]  }
 0x368   :  { %4993 = vmatprep.subr.bf16.mxu1 %v7544_v6  ;;  %6565 = vmatpush3.bf16.msra.mxu0 %v7692_v0  ;;  %v7601_v6 = vld [vmem:[#allocation7 + $0x51c] ss:$24 sps:$4 sm:$0xff]   ;;  %v7679_v0 = vld [vmem:[#allocation10 + $0x60] sm:$0xff]  }
 0x36b   :  { %4994 = vmatpush1.bf16.msra.mxu1 %v7542_v7  ;;  %v7599_v7 = vld [vmem:[#allocation7 + $0x518] ss:$24 sps:$4 sm:$0xff]  }
 0x36c   :  { %4995 = vmatprep.subr.bf16.mxu1 %v7547_v8  ;;  %v7604_v8 = vld [vmem:[#allocation7 + $0x54c] ss:$24 sps:$4 sm:$0xff]  }
 0x36f   :  { %4996 = vmatpush1.bf16.msra.mxu1 %v7545_v9  ;;  %v7602_v9 = vld [vmem:[#allocation7 + $0x548] ss:$24 sps:$4 sm:$0xff]  }
 0x370   :  { %4997 = vmatprep.subr.bf16.mxu1 %v7550_v10  ;;  %v7607_v10 = vld [vmem:[#allocation7 + $0x57c] ss:$24 sps:$4 sm:$0xff]  }
 0x373   :  { %4998 = vmatpush1.bf16.msra.mxu1 %v7548_v12  ;;  %v7605_v12 = vld [vmem:[#allocation7 + $0x578] ss:$24 sps:$4 sm:$0xff]  }
 0x374   :  { %4999 = vmatprep.subr.bf16.mxu1 %v7553_v32  ;;  %v7610_v32 = vld [vmem:[#allocation7 + $0x5ac] ss:$24 sps:$4 sm:$0xff]  }
 0x377   :  { %5000 = vmatpush1.bf16.msra.mxu1 %v7551_v13  ;;  %v7608_v13 = vld [vmem:[#allocation7 + $0x5a8] ss:$24 sps:$4 sm:$0xff]  }
 0x378   :  { %5001 = vmatprep.subr.bf16.mxu1 %v7556_v14  ;;  %v7613_v14 = vld [vmem:[#allocation7 + $0x5dc] ss:$24 sps:$4 sm:$0xff]  }
 0x37b   :  { %5002 = vmatpush1.bf16.msra.mxu1 %v7554_v15  ;;  %v7611_v15 = vld [vmem:[#allocation7 + $0x5d8] ss:$24 sps:$4 sm:$0xff]  }
 0x37c   :  { %5003 = vmatprep.subr.bf16.mxu1 %v7559_v19  ;;  %v7616_v19 = vld [vmem:[#allocation7 + $0x60c] ss:$24 sps:$4 sm:$0xff]  }
 0x37f   :  { %5004 = vmatpush1.bf16.msra.mxu1 %v7557_v20  ;;  %v7614_v20 = vld [vmem:[#allocation7 + $0x608] ss:$24 sps:$4 sm:$0xff]  }
 0x380   :  { %5005 = vmatprep.subr.bf16.mxu1 %v7562_v23  ;;  %v7619_v23 = vld [vmem:[#allocation7 + $0x63c] ss:$24 sps:$4 sm:$0xff]  }
 0x383   :  { %5006 = vmatpush1.bf16.msra.mxu1 %v7560_v27  ;;  %v7617_v27 = vld [vmem:[#allocation7 + $0x638] ss:$24 sps:$4 sm:$0xff]  }
 0x384   :  { %5007 = vmatprep.subr.bf16.mxu1 %v7565_v28  ;;  %v7622_v28 = vld [vmem:[#allocation7 + $0x66c] ss:$24 sps:$4 sm:$0xff]  }
 0x387   :  { %5008 = vmatpush1.bf16.msra.mxu1 %v7563_v17  ;;  %v7620_v17 = vld [vmem:[#allocation7 + $0x668] ss:$24 sps:$4 sm:$0xff]  }
 0x388   :  { %5020 = vmatprep.subr.bf16.mxu1 %v7568_v29  ;;  %v7625_v29 = vld [vmem:[#allocation7 + $0x69c] ss:$24 sps:$4 sm:$0xff]  }
 0x38a   :  { %5010 = vmatmul.mubr.bf16.vlgmr.msra.gmra.mrb[8].mxu1 %v8079_v11  ;;  %v7575_v11 = vld [vmem:[#allocation7 + $0x398] ss:$24 sps:$4 sm:$0xff]  }
 0x38b   :  { %5021 = vmatpush1.bf16.msra.mxu1 %v7566_v30  ;;  %5052 = vmatprep.mubr.bf16.mxu1 %v8085_v22  ;;  %v7580_v22 = vld [vmem:[#allocation7 + $0x3cc] ss:$24 sps:$4 sm:$0xff]   ;;  %v7623_v30 = vld [vmem:[#allocation7 + $0x698] ss:$24 sps:$4 sm:$0xff]  }
 0x38c   :  { %5022 = vmatprep.subr.bf16.mxu1 %v7571_v33  ;;  %v7626_v33 = vld [vmem:[#allocation7 + $0x6c8] ss:$24 sps:$4 sm:$0xff]  }
 0x38f   :  { %5023 = vmatpush1.bf16.msra.mxu1 %v7569_v36  ;;  %v7634_v36 = vld [vmem:[#allocation7 + $0x72c] ss:$24 sps:$4 sm:$0xff]  }
 0x390   :  { %5024 = vmatprep.subr.bf16.mxu1 %v7574_v38  ;;  %v7635_v38 = vld [vmem:[#allocation7 + $0x758] ss:$24 sps:$4 sm:$0xff]  }
 0x393   :  { %5025 = vmatpush1.bf16.msra.mxu1 %v7572_v39  ;;  %v7638_v39 = vld [vmem:[#allocation7 + $0x788] ss:$24 sps:$4 sm:$0xff]  }
 0x394   :  { %5026 = vmatprep.subr.bf16.mxu1 %v7577_v40  ;;  %v7641_v40 = vld [vmem:[#allocation7 + $0x7b8] ss:$24 sps:$4 sm:$0xff]  }
 0x397   :  { %5027 = vmatpush1.bf16.msra.mxu1 %v7575_v11  ;;  %v7644_v11 = vld [vmem:[#allocation7 + $0x7e8] ss:$24 sps:$4 sm:$0xff]  }
 0x398   :  { %5028 = vmatprep.subr.bf16.mxu1 %v7580_v22  ;;  %v7647_v22 = vld [vmem:[#allocation7 + $0x818] ss:$24 sps:$4 sm:$0xff]  }
 0x39b   :  { %5029 = vmatpush1.bf16.msra.mxu1 %v7578_v44  ;;  %v7650_v44 = vld [vmem:[#allocation7 + $0x848] ss:$24 sps:$4 sm:$0xff]  }
 0x39c   :  { %5030 = vmatprep.subr.bf16.mxu1 %v7583_v45  ;;  %v7653_v45 = vld [vmem:[#allocation7 + $0x878] ss:$24 sps:$4 sm:$0xff]  }
 0x39f   :  { %5031 = vmatpush1.bf16.msra.mxu1 %v7581_v48  ;;  %v7656_v48 = vld [vmem:[#allocation7 + $0x8a8] ss:$24 sps:$4 sm:$0xff]  }
 0x3a0   :  { %5032 = vmatprep.subr.bf16.mxu1 %v7586_v56  ;;  %v7659_v56 = vld [vmem:[#allocation7 + $0x8d8] ss:$24 sps:$4 sm:$0xff]  }
 0x3a3   :  { %5033 = vmatpush1.bf16.msra.mxu1 %v7584_v52  ;;  %v7665_v52 = vld [vmem:[#allocation10] sm:$0xff]  }
 0x3a4   :  { %5034 = vmatprep.subr.bf16.mxu1 %v7589_v59  ;;  %v7669_v59 = vld [vmem:[#allocation10 + $0x8] sm:$0xff]  }
 0x3a7   :  { %5035 = vmatpush1.bf16.msra.mxu1 %v7587_v61  ;;  %v7673_v61 = vld [vmem:[#allocation10 + $0x10] sm:$0xff]  }
 0x3a8   :  { %5036 = vmatprep.subr.bf16.mxu1 %v7592_v63  ;;  %v7677_v63 = vld [vmem:[#allocation10 + $0x18] sm:$0xff]  }
 0x3ab   :  { %5037 = vmatpush1.bf16.msra.mxu1 %v7590_v1  ;;  %v7681_v1 = vld [vmem:[#allocation10 + $0x20] sm:$0xff]  }
 0x3ac   :  { %5038 = vmatprep.subr.bf16.mxu1 %v7595_v2  ;;  %v8118_v2 = vld [vmem:[#allocation8] sm:$0x3f] }
 0x3af   :  { %5039 = vmatpush1.bf16.msra.mxu1 %v7593_v18  ;;  %v7683_v18 = vld [vmem:[#allocation10 + $0x68] sm:$0xff]  }
 0x3b0   :  { %5040 = vmatprep.subr.bf16.mxu1 %v7598_v3  ;;  %v3397_v3 = vrot.slane %v8118_v2, %v3058_v34 }
 0x3b3   :  { %5041 = vmatpush1.bf16.msra.mxu1 %v7596_v4  ;;  %v3385_v4 = vrot.slane %v8118_v2, %v3046_v54 }
 0x3b4   :  { %5042 = vmatprep.subr.bf16.mxu1 %v7601_v6  ;;  %v3401_v6 = vrot.slane %v8118_v2, %v3062_v26  ;;  %v7691_v26 = vld [vmem:[#allocation10 + $0x78] sm:$0xff]  }
 0x3b7   :  { %5043 = vmatpush1.bf16.msra.mxu1 %v7599_v7  ;;  %v7685_v7 = vld [vmem:[#allocation10 + $0x28] sm:$0xff]  }
 0x3b8   :  { %5044 = vmatprep.subr.bf16.mxu1 %v7604_v8  ;;  %v7687_v8 = vld [vmem:[#allocation10 + $0x70] sm:$0xff]  }
 0x3bb   :  { %5045 = vmatpush1.bf16.msra.mxu1 %v7602_v9 }
 0x3bc   :  { %5046 = vmatprep.subr.bf16.mxu1 %v7607_v10 }
 0x3bf   :  { %5047 = vmatpush1.bf16.msra.mxu1 %v7605_v12 }
 0x3c0   :  { %5048 = vmatprep.subr.bf16.mxu1 %v7610_v32 }
 0x3c3   :  { %5049 = vmatpush1.bf16.msra.mxu1 %v7608_v13 }
 0x3c4   :  { %5050 = vmatprep.subr.bf16.mxu1 %v7613_v14 }
 0x3c7   :  { %5051 = vmatpush1.bf16.msra.mxu1 %v7611_v15 }
 0x3c8   :  { %5063 = vmatprep.subr.bf16.mxu1 %v7616_v19 }
 0x3ca   :  { %5053 = vmatmul.mubr.bf16.vlgmr.msra.gmra.mrb[8].mxu1 %v8081_v21  ;;  %v7629_v21 = vld [vmem:[#allocation7 + $0x6f8] ss:$24 sps:$4 sm:$0xff]  }
 0x3cb   :  { %5064 = vmatpush1.bf16.msra.mxu1 %v7614_v20  ;;  %5095 = vmatprep.mubr.bf16.mxu1 %v8106_v53  ;;  %v7632_v53 = vld [vmem:[#allocation7 + $0x728] ss:$24 sps:$4 sm:$0xff]   ;;  %v7689_v20 = vld [vmem:[#allocation10 + $0x30] sm:$0xff]  }
 0x3cc   :  { %5065 = vmatprep.subr.bf16.mxu1 %v7619_v23 }
 0x3cf   :  { %5066 = vmatpush1.bf16.msra.mxu1 %v7617_v27 }
 0x3d0   :  { %5067 = vmatprep.subr.bf16.mxu1 %v7622_v28 }
 0x3d3   :  { %5068 = vmatpush1.bf16.msra.mxu1 %v7620_v17 }
 0x3d4   :  { %5069 = vmatprep.subr.bf16.mxu1 %v7625_v29 }
 0x3d7   :  { %5070 = vmatpush1.bf16.msra.mxu1 %v7623_v30 }
 0x3d8   :  { %5071 = vmatprep.subr.bf16.mxu1 %v7628_v31 }
 0x3db   :  { %5072 = vmatpush1.bf16.msra.mxu1 %v7626_v33 }
 0x3dc   :  { %5073 = vmatprep.subr.bf16.mxu1 %v7631_v35 }
 0x3df   :  { %5074 = vmatpush1.bf16.msra.mxu1 %v7629_v21 }
 0x3e0   :  { %5075 = vmatprep.subr.bf16.mxu1 %v7634_v36 }
 0x3e3   :  { %5076 = vmatpush1.bf16.msra.mxu1 %v7632_v53 }
 0x3e4   :  { %5077 = vmatprep.subr.bf16.mxu1 %v7637_v37 }
 0x3e7   :  { %5078 = vmatpush1.bf16.msra.mxu1 %v7635_v38  ;;  %v7693_v38 = vld [vmem:[#allocation10 + $0x38] sm:$0xff]  }
 0x3e8   :  { %5079 = vmatprep.subr.bf16.mxu1 %v7640_v5 }
 0x3eb   :  { %5080 = vmatpush1.bf16.msra.mxu1 %v7638_v39 }
 0x3ec   :  { %5081 = vmatprep.subr.bf16.mxu1 %v7643_v25  ;;  %v7694_v25 = vld [vmem:[#allocation10 + $0xc0] sm:$0xff]  }
 0x3ef   :  { %5082 = vmatpush1.bf16.msra.mxu1 %v7641_v40 }
 0x3f0   :  { %5083 = vmatprep.subr.bf16.mxu1 %v7646_v41 }
 0x3f3   :  { %5084 = vmatpush1.bf16.msra.mxu1 %v7644_v11  ;;  %v7695_v11 = vld [vmem:[#allocation10 + $0x80] sm:$0xff]  }
 0x3f4   :  { %5085 = vmatprep.subr.bf16.mxu1 %v7649_v42  ;;  %v7696_v42 = vld [vmem:[#allocation10 + $0xc8] sm:$0xff]  }
 0x3f7   :  { %5086 = vmatpush1.bf16.msra.mxu1 %v7647_v22  ;;  %v7697_v22 = vld [vmem:[#allocation10 + $0x88] sm:$0xff]  }
 0x3f8   :  { %5087 = vmatprep.subr.bf16.mxu1 %v7652_v43  ;;  %v7698_v43 = vld [vmem:[#allocation10 + $0xd0] sm:$0xff]  }
 0x3fb   :  { %5088 = vmatpush1.bf16.msra.mxu1 %v7650_v44  ;;  %v7699_v44 = vld [vmem:[#allocation10 + $0x90] sm:$0xff]  }
 0x3fc   :  { %5089 = vmatprep.subr.bf16.mxu1 %v7655_v50  ;;  %v7700_v50 = vld [vmem:[#allocation10 + $0xd8] sm:$0xff]  }
 0x3ff   :  { %5090 = vmatpush1.bf16.msra.mxu1 %v7653_v45  ;;  %v7701_v45 = vld [vmem:[#allocation10 + $0x98] sm:$0xff]  }
 0x400   :  { %5091 = vmatprep.subr.bf16.mxu1 %v7658_v46  ;;  %v7702_v46 = vld [vmem:[#allocation10 + $0xe0] sm:$0xff]  }
 0x403   :  { %5092 = vmatpush1.bf16.msra.mxu1 %v7656_v48  ;;  %v7703_v48 = vld [vmem:[#allocation10 + $0xa0] sm:$0xff]  }
 0x404   :  { %5093 = vmatprep.subr.bf16.mxu1 %v7661_v49  ;;  %v7704_v49 = vld [vmem:[#allocation10 + $0xe8] sm:$0xff]  }
 0x407   :  { %5094 = vmatpush1.bf16.msra.mxu1 %v7659_v56  ;;  %v7705_v56 = vld [vmem:[#allocation10 + $0xa8] sm:$0xff]  }
 0x408   :  { %6506 = vmatprep.subr.bf16.mxu1 %v7663_v57  ;;  %v7706_v57 = vld [vmem:[#allocation10 + $0xf0] sm:$0xff]  }
 0x40a   :  { %5096 = vmatmul.mubr.bf16.vlgmr.msra.gmra.mrb[8].mxu1 %v8104_v24  ;;  %v3381_v24 = vrot.slane %v8118_v2, %v3042_v16 }
 0x40b   :  { %6507 = vmatpush3.bf16.msra.mxu1 %v7665_v52  ;;  %v7707_v52 = vld [vmem:[#allocation10 + $0xb0] sm:$0xff]  }
 0x40c   :  { %6508 = vmatprep.subr.bf16.mxu1 %v7667_v58  ;;  %v7708_v58 = vld [vmem:[#allocation10 + $0xf8] sm:$0xff]  }
 0x40f   :  { %6509 = vmatpush3.bf16.msra.mxu1 %v7669_v59  ;;  %v7709_v59 = vld [vmem:[#allocation10 + $0xb8] sm:$0xff]  }
 0x410   :  { %6510 = vmatprep.subr.bf16.mxu1 %v7671_v60  ;;  %v3389_v60 = vrot.slane %v8118_v2, %v3050_v51 }
 0x413   :  { %6511 = vmatpush3.bf16.msra.mxu1 %v7673_v61  ;;  %v3393_v61 = vrot.slane %v8118_v2, %v3054_v55 }
 0x414   :  { %6512 = vmatprep.subr.bf16.mxu1 %v7675_v62 }
 0x417   :  { %6513 = vmatpush3.bf16.msra.mxu1 %v7677_v63 }
 0x418   :  { %6514 = vmatprep.subr.bf16.mxu1 %v7679_v0 }
 0x41b   :  { %6515 = vmatpush3.bf16.msra.mxu1 %v7681_v1 }
 0x41c   :  { %6516 = vmatprep.subr.bf16.mxu1 %v7683_v18 }
 0x41d   :  { %v4968_v9 = vpop.f32.mrb[4].mxu1  ;;  %v5226_v10 = vpop.f32.mrb[8].mxu0 }
 0x41e   :  { %v6572_v12 = vadd.f32 %v4968_v9, %v3381_v24  ;;  %v6580_v16 = vadd.f32 %v5226_v10, %v3397_v3  ;;  %v4970_v32 = vpop.f32.mrb[5].mxu1  ;;  %v5228_v13 = vpop.f32.mrb[9].mxu0 }
 0x41f   :  { %v6573_v14 = vadd.f32 %v4970_v32, %v3385_v4  ;;  %v6581_v34 = vadd.f32 %v5228_v13, %v3401_v6  ;;  %6517 = vmatpush3.bf16.msra.mxu1 %v7685_v7  ;;  %v4972_v15 = vpop.f32.mrb[6].mxu1  ;;  %v5230_v19 = vpop.f32.mrb[10].mxu0 }
 0x420   :  { %v6574_v54 = vadd.f32 %v4972_v15, %v3381_v24  ;;  %v6582_v23 = vadd.f32 %v5230_v19, %v3397_v3  ;;  %v4974_v27 = vpop.f32.mrb[7].mxu1  ;;  %v5232_v28 = vpop.f32.mrb[11].mxu0  ;;  %6518 = vmatprep.subr.bf16.mxu1 %v7687_v8  ;;  %v5235_v30 = vmax.f32 %v6572_v12, 0.0  ;;  %v5239_v31 = vmax.f32 %v6580_v16, 0.0 }
 0x421   :  { %v6575_v17 = vadd.f32 %v4974_v27, %v3385_v4  ;;  %v6583_v29 = vadd.f32 %v5232_v28, %v3401_v6  ;;  %v5236_v21 = vmax.f32 %v6573_v14, 0.0  ;;  %v5240_v36 = vmax.f32 %v6581_v34, 0.0 }
 0x422   :  { %v5241_v33 = vmax.f32 %v6574_v54, 0.0  ;;  %v5245_v35 = vmax.f32 %v6582_v23, 0.0  ;;  %v6457_v54 = vld [vmem:[#allocation11] ss:$0 sm:$0xff] }
 0x423   :  { %v5242_v53 = vmax.f32 %v6575_v17, 0.0  ;;  %v5246_v37 = vmax.f32 %v6583_v29, 0.0  ;;  %6519 = vmatpush3.bf16.msra.mxu1 %v7689_v20 }
 0x424   :  { %v5247_v5 = vpack.c.bf16 %v5241_v33, %v5235_v30  ;;  %v5251_v39 = vpack.c.bf16 %v5245_v35, %v5239_v31  ;;  %6520 = vmatprep.subr.bf16.mxu1 %v7691_v26 }
 0x425   :  { %v5248_v40 = vpack.c.bf16 %v5242_v53, %v5236_v21  ;;  %v5252_v41 = vpack.c.bf16 %v5246_v37, %v5240_v36 }
 0x427   :  { %6521 = vmatpush3.bf16.msra.mxu1 %v7693_v38  ;;  %5676 = vmatprep.mubr.bf16.mxu1 %v5248_v40 }
 0x428   :  { %5758 = vmatprep.mubr.bf16.mxu0 %v5252_v41  ;;  %6528 = vmatprep.subr.bf16.mxu1 %v7694_v25 }
 0x429   :  { %5759 = vmatmul.mubr.bf16.vlgmr.msra.gmra.mrb[12].mxu0 %v5251_v39 }
 0x42a   :  { %5677 = vmatmul.mubr.bf16.vlgmr.msra.gmra.mrb[12].mxu1 %v5247_v5 }
 0x42b   :  { %6529 = vmatpush3.bf16.msra.mxu1 %v7695_v11 }
 0x42c   :  { %6530 = vmatprep.subr.bf16.mxu1 %v7696_v42 }
 0x42f   :  { %6531 = vmatpush3.bf16.msra.mxu1 %v7697_v22 }
 0x430   :  { %6532 = vmatprep.subr.bf16.mxu1 %v7698_v43 }
 0x433   :  { %6533 = vmatpush3.bf16.msra.mxu1 %v7699_v44 }
 0x434   :  { %6534 = vmatprep.subr.bf16.mxu1 %v7700_v50 }
 0x437   :  { %6535 = vmatpush3.bf16.msra.mxu1 %v7701_v45 }
 0x438   :  { %6536 = vmatprep.subr.bf16.mxu1 %v7702_v46 }
 0x43b   :  { %6537 = vmatpush3.bf16.msra.mxu1 %v7703_v48 }
 0x43c   :  { %6538 = vmatprep.subr.bf16.mxu1 %v7704_v49 }
 0x43f   :  { %6539 = vmatpush3.bf16.msra.mxu1 %v7705_v56 }
 0x440   :  { %6540 = vmatprep.subr.bf16.mxu1 %v7706_v57 }
 0x443   :  { %6541 = vmatpush3.bf16.msra.mxu1 %v7707_v52 }
 0x444   :  { %6542 = vmatprep.subr.bf16.mxu1 %v7708_v58 }
 0x447   :  { %6543 = vmatpush3.bf16.msra.mxu1 %v7709_v59 }
 0x4dd   :  { %v5097_v62 = vpop.f32.mrb[8].mxu1 }
 0x4de   :  { %v6576_v63 = vadd.f32 %v5097_v62, %v3389_v60  ;;  %v5099_v0 = vpop.f32.mrb[9].mxu1 }
 0x4df   :  { %v6577_v1 = vadd.f32 %v5099_v0, %v3393_v61  ;;  %v5101_v18 = vpop.f32.mrb[10].mxu1 }
 0x4e0   :  { %v6578_v24 = vadd.f32 %v5101_v18, %v3389_v60  ;;  %v5103_v3 = vpop.f32.mrb[11].mxu1  ;;  %v5237_v6 = vmax.f32 %v6576_v63, 0.0 }
 0x4e1   :  { %v6579_v4 = vadd.f32 %v5103_v3, %v3393_v61  ;;  %v5238_v8 = vmax.f32 %v6577_v1, 0.0 }
 0x4e2   :  { %v5243_v7 = vmax.f32 %v6578_v24, 0.0 }
 0x4e3   :  { %v5244_v9 = vmax.f32 %v6579_v4, 0.0 }
 0x4e4   :  { %v5249_v10 = vpack.c.bf16 %v5243_v7, %v5237_v6 }
 0x4e5   :  { %v5250_v12 = vpack.c.bf16 %v5244_v9, %v5238_v8 }
 0x4e7   :  { %5717 = vmatprep.mubr.bf16.mxu1 %v5250_v12 }
 0x4e8   :  { %5718 = vmatmul.mubr.bf16.vlgmr.msra.gmra.mrb[16].mxu1 %v5249_v10 }
 0x4fc   :  { %v6566_v51 = vpop.f32.mrb[12].mxu0 }
 0x4fd   :  { %v6522_v47 = vpop.f32.mrb[12].mxu1  ;;  %v6567_v16 = vpop.f32.mrb[13].mxu0 }
 0x4fe   :  { %v6568_v55 = vadd.f32 %v6567_v16, %v6566_v51  ;;  %v6523_v2 = vpop.f32.mrb[13].mxu1  ;;  %v6569_v32 = vpop.f32.mrb[14].mxu0 }
 0x4ff   :  { %v6524_v13 = vadd.f32 %v6523_v2, %v6522_v47  ;;  %v6525_v14 = vpop.f32.mrb[14].mxu1  ;;  %v6570_v34 = vpop.f32.mrb[15].mxu0 }
 0x500   :  { %v6571_v15 = vadd.f32 %v6570_v34, %v6569_v32  ;;  %v6526_v19 = vpop.f32.mrb[15].mxu1 }
 0x501   :  { %v6527_v20 = vadd.f32 %v6526_v19, %v6525_v14  ;;  %v5679_v28 = vadd.f32 %v6524_v13, %v6457_v54 }
 0x503   :  { %v5682_v30 = vadd.f32 %v6527_v20, %v6457_v54 }
 0x5bb   :  { %v6544_v23 = vpop.f32.mrb[16].mxu1 }
 0x5bc   :  { %v6545_v27 = vpop.f32.mrb[17].mxu1 }
 0x5bd   :  { %v6546_v26 = vadd.f32 %v6545_v27, %v6544_v23  ;;  %v6547_v17 = vpop.f32.mrb[18].mxu1 }
 0x5be   :  { %v6548_v29 = vpop.f32.mrb[19].mxu1 }
 0x5bf   :  { %v5720_v31 = vadd.f32 %v6546_v26, %v5679_v28  ;;  %v6549_v33 = vadd.f32 %v6548_v29, %v6547_v17 }
 0x5c1   :  { %v5761_v35 = vadd.f32 %v6568_v55, %v5720_v31  ;;  %v5723_v21 = vadd.f32 %v6549_v33, %v5682_v30 }
 0x5c3   :  { %5767 = vst [vmem:[%s8151_s7] sm:$0xff] %v5761_v35  ;;  %v5764_v36 = vadd.f32 %v6571_v15, %v5723_v21 }
 0x5c5   :  { %5768 = vst [vmem:[%s8151_s7 + $0x8] sm:$0xff] %v5764_v36 }
 0x5c6   :  { %5773 = vsyncpa [#allocation4], 1 }
 0x5c7   :  { %5774 = vsyncpa [#allocation6], 1 }
 0x5c8   :  { %5775 = vsyncpa [#allocation9], 1 }
 0x5c9   :  { %5776 = vsyncpa [#allocation12], 1 }

</bundles_post_ra>
